<compile_context>
chip_gen: v6e
topology: v6e:2x2x1
jax: 0.10.0
libtpu: 0.0.40
codegen_flags: <defaults>
</compile_context>

<pallas_src>
import jax
import jax.numpy as jnp
from jax.experimental import pallas as pl
from jax.experimental.pallas import tpu as pltpu

NUM_CLASSES = 4
TIME_STEPS = 16
HIDDEN = 64


def point_model_kernel(x_ref, h0_ref, c0_ref, wih_ref, whh_ref, b_ref,
                       w1_ref, b1_ref, w2_ref, b2_ref, out_ref,
                       xp_ref, hflat_ref):
    Bt, T, _ = x_ref.shape
    H = h0_ref.shape[1]
    H3 = 3 * H

    # ---- Input projection for all timesteps at once via two VPU broadcast-FMAs
    #      (K=2 would badly underfill the MXU contraction dimension).
    #      Gate columns are already ordered (i, f, o, g) by the wrapper.
    x = x_ref[...]                                          # (Bt, T, 2)
    xp_ref[...] = (x[:, :, 0:1] * wih_ref[0:1, :]
                   + x[:, :, 1:2] * wih_ref[1:2, :]
                   + b_ref[...])                            # (Bt, T, 4H)

    # ---- Serial LSTM recurrence (fully unrolled, T=16).
    whh = whh_ref[...]                                      # (H, 4H), loaded once
    h = h0_ref[...]                                         # (Bt, H)
    c = c0_ref[...]                                         # (Bt, H)
    for t in range(T):
        gates = xp_ref[:, t, :] + jnp.dot(
            h, whh, preferred_element_type=jnp.float32)     # (Bt, 4H)
        sig = jax.nn.sigmoid(gates[:, :H3])                 # fused i|f|o sigmoid
        i_g = sig[:, 0:H]
        f_g = sig[:, H:2 * H]
        o_g = sig[:, 2 * H:H3]
        g_g = jnp.tanh(gates[:, H3:])
        c = f_g * c + i_g * g_g
        h = o_g * jnp.tanh(c)
        # Store h_t for the post-loop linear1 (off the serial critical path).
        hflat_ref[:, t * H:(t + 1) * H] = h

    # ---- Head.  Dropout(p=0.5) in eval/inference mode == identity.
    z1 = jnp.dot(hflat_ref[...], w1_ref[...],
                 preferred_element_type=jnp.float32) + b1_ref[...]   # (Bt, 10)
    z1 = jnp.maximum(z1, 0.0)                                        # ReLU
    out = jnp.dot(z1, w2_ref[...],
                  preferred_element_type=jnp.float32) + b2_ref[...]  # (Bt, C)
    out_ref[...] = out.astype(out_ref.dtype)


def _pick_batch_tile(B):
    if B <= 8:
        return B
    for cand in (128, 64, 32, 16, 8):
        if B % cand == 0:
            return cand
    return B


def _reorder_gates(w):
    """Reorder PyTorch LSTM gate blocks (i, f, g, o) -> (i, f, o, g) on last axis."""
    i, f, g, o = jnp.split(w, 4, axis=-1)
    return jnp.concatenate([i, f, o, g], axis=-1)


@jax.jit
def point_model_forward(x, states, params):
    """x: (B, T*2) float32; states: (h0, c0) each (1, B, H) (PyTorch convention)."""
    h0, c0 = states
    B = x.shape[0]
    T, H, C = TIME_STEPS, HIDDEN, NUM_CLASSES

    x_bm = x.reshape(B, T, 2)                              # batch-major
    h0 = h0.reshape(B, H)
    c0 = c0.reshape(B, H)

    wih_t = _reorder_gates(params["w_ih"].T)               # (2, 4H)
    whh_t = _reorder_gates(params["w_hh"].T)               # (H, 4H)
    b = _reorder_gates(params["b_ih"] + params["b_hh"]).reshape(1, 4 * H)
    w1_t = params["w1"].T                                  # (T*H, 10)
    b1 = params["b1"].reshape(1, -1)
    w2_t = params["w2"].T                                  # (10, C)
    b2 = params["b2"].reshape(1, -1)

    bt = _pick_batch_tile(B)
    grid = (B // bt,)

    in_specs = [
        pl.BlockSpec((bt, T, 2), lambda i: (i, 0, 0)),     # x (batch-sliced)
        pl.BlockSpec((bt, H), lambda i: (i, 0)),           # h0
        pl.BlockSpec((bt, H), lambda i: (i, 0)),           # c0
        pl.BlockSpec((2, 4 * H), lambda i: (0, 0)),        # w_ih^T
        pl.BlockSpec((H, 4 * H), lambda i: (0, 0)),        # w_hh^T
        pl.BlockSpec((1, 4 * H), lambda i: (0, 0)),        # b_ih + b_hh
        pl.BlockSpec((T * H, 10), lambda i: (0, 0)),       # w1^T
        pl.BlockSpec((1, 10), lambda i: (0, 0)),           # b1
        pl.BlockSpec((10, C), lambda i: (0, 0)),           # w2^T
        pl.BlockSpec((1, C), lambda i: (0, 0)),            # b2
    ]
    out_specs = pl.BlockSpec((bt, C), lambda i: (i, 0))

    flops = (2 * B * T * 2 * 4 * H          # input projection
             + 2 * B * T * H * 4 * H        # recurrent matmuls
             + 2 * B * T * H * 10           # linear1
             + 2 * B * 10 * C)              # linear2
    transcendentals = B * T * 5 * H
    bytes_accessed = 4 * (x_bm.size + h0.size + c0.size + wih_t.size + whh_t.size
                          + b.size + w1_t.size + b1.size + w2_t.size + b2.size
                          + B * C)

    return pl.pallas_call(
        point_model_kernel,
        out_shape=jax.ShapeDtypeStruct((B, C), jnp.float32),
        grid=grid,
        in_specs=in_specs,
        out_specs=out_specs,
        scratch_shapes=[
            pltpu.VMEM((bt, T, 4 * H), jnp.float32),       # xp (input projection)
            pltpu.VMEM((bt, T * H), jnp.float32),          # flattened hidden states
        ],
        compiler_params=pltpu.CompilerParams(dimension_semantics=("parallel",)),
        cost_estimate=pl.CostEstimate(flops=flops,
                                      transcendentals=transcendentals,
                                      bytes_accessed=bytes_accessed),
    )(x_bm, h0, c0, wih_t, whh_t, b, w1_t, b1, w2_t, b2)


def init_params(key):
    H, T, C = HIDDEN, TIME_STEPS, NUM_CLASSES
    ks = jax.random.split(key, 8)
    s = 1.0 / jnp.sqrt(H)
    return {
        "w_ih": jax.random.uniform(ks[0], (4 * H, 2), jnp.float32, -s, s),
        "w_hh": jax.random.uniform(ks[1], (4 * H, H), jnp.float32, -s, s),
        "b_ih": jax.random.uniform(ks[2], (4 * H,), jnp.float32, -s, s),
        "b_hh": jax.random.uniform(ks[3], (4 * H,), jnp.float32, -s, s),
        "w1": jax.random.uniform(ks[4], (10, H * T), jnp.float32, -0.03, 0.03),
        "b1": jax.random.uniform(ks[5], (10,), jnp.float32, -0.03, 0.03),
        "w2": jax.random.uniform(ks[6], (C, 10), jnp.float32, -0.3, 0.3),
        "b2": jax.random.uniform(ks[7], (C,), jnp.float32, -0.3, 0.3),
    }


def reference_forward(x, states, params):
    """Pure-JAX reference matching torch semantics (eval mode), PyTorch gate order."""
    h0, c0 = states
    B = x.shape[0]
    T, H = TIME_STEPS, HIDDEN
    xs = x.reshape(B, T, 2)
    h = h0.reshape(B, H)
    c = c0.reshape(B, H)
    outs = []
    for t in range(T):
        gates = xs[:, t, :] @ params["w_ih"].T + h @ params["w_hh"].T \
                + params["b_ih"] + params["b_hh"]
        i = jax.nn.sigmoid(gates[:, 0:H])
        f = jax.nn.sigmoid(gates[:, H:2 * H])
        g = jnp.tanh(gates[:, 2 * H:3 * H])
        o = jax.nn.sigmoid(gates[:, 3 * H:4 * H])
        c = f * c + i * g
        h = o * jnp.tanh(c)
        outs.append(h)
    flat = jnp.concatenate(outs, axis=-1)                  # (B, T*H) == torch flatten
    z1 = jnp.maximum(flat @ params["w1"].T + params["b1"], 0.0)
    return z1 @ params["w2"].T + params["b2"]


if __name__ == "__main__":
    key = jax.random.PRNGKey(0)
    k_param, k_x, k_h, k_c = jax.random.split(key, 4)

    B = 2
    params = init_params(k_param)
    x = jax.random.normal(k_x, (B, TIME_STEPS * 2), jnp.float32)
    h0 = jax.random.normal(k_h, (1, B, HIDDEN), jnp.float32)
    c0 = jax.random.normal(k_c, (1, B, HIDDEN), jnp.float32)

    out = point_model_forward(x, (h0, c0), params)
    out = jax.block_until_ready(out)

    ref = reference_forward(x, (h0, c0), params)
    assert out.shape == (B, NUM_CLASSES)
    assert jnp.allclose(out, ref, atol=1e-4, rtol=1e-4), "mismatch vs reference"
    print("KERNEL_OK")
</pallas_src>

<mosaic_0001>
module attributes {stable_mosaic.version = 11 : i64} {
  func.func @point_model_kernel(%arg0: i32, %arg1: memref<2x16x2xf32, #tpu.memory_space<vmem>>, %arg2: memref<2x64xf32, #tpu.memory_space<vmem>>, %arg3: memref<2x64xf32, #tpu.memory_space<vmem>>, %arg4: memref<2x256xf32, #tpu.memory_space<vmem>>, %arg5: memref<64x256xf32, #tpu.memory_space<vmem>>, %arg6: memref<1x256xf32, #tpu.memory_space<vmem>>, %arg7: memref<1024x10xf32, #tpu.memory_space<vmem>>, %arg8: memref<1x10xf32, #tpu.memory_space<vmem>>, %arg9: memref<10x4xf32, #tpu.memory_space<vmem>>, %arg10: memref<1x4xf32, #tpu.memory_space<vmem>>, %arg11: memref<2x4xf32, #tpu.memory_space<vmem>>, %arg12: memref<2x16x256xf32, #tpu.memory_space<vmem>>, %arg13: memref<2x1024xf32, #tpu.memory_space<vmem>>) attributes {dimension_semantics = [#tpu.dimension_semantics<parallel>], iteration_bounds = array<i64: 1>, scalar_prefetch = 0 : i64, scratch_operands = 2 : i64, tpu.core_type = #tpu.core_type<tc>, window_params = [{transform_indices = @transform_0, window_bounds = array<i64: 2, 16, 2>}, {transform_indices = @transform_1, window_bounds = array<i64: 2, 64>}, {transform_indices = @transform_2, window_bounds = array<i64: 2, 64>}, {pipeline_mode = #tpu.pipeline_mode<synchronous>, transform_indices = @transform_3, window_bounds = array<i64: 2, 256>}, {pipeline_mode = #tpu.pipeline_mode<synchronous>, transform_indices = @transform_4, window_bounds = array<i64: 64, 256>}, {pipeline_mode = #tpu.pipeline_mode<synchronous>, transform_indices = @transform_5, window_bounds = array<i64: 1, 256>}, {pipeline_mode = #tpu.pipeline_mode<synchronous>, transform_indices = @transform_6, window_bounds = array<i64: 1024, 10>}, {pipeline_mode = #tpu.pipeline_mode<synchronous>, transform_indices = @transform_7, window_bounds = array<i64: 1, 10>}, {pipeline_mode = #tpu.pipeline_mode<synchronous>, transform_indices = @transform_8, window_bounds = array<i64: 10, 4>}, {pipeline_mode = #tpu.pipeline_mode<synchronous>, transform_indices = @transform_9, window_bounds = array<i64: 1, 4>}, {transform_indices = @transform_10, window_bounds = array<i64: 2, 4>}]} {
    %c0 = arith.constant 0 : index
    %c0_0 = arith.constant 0 : index
    %c0_1 = arith.constant 0 : index
    %0 = vector.load %arg1[%c0, %c0_0, %c0_1] : memref<2x16x2xf32, #tpu.memory_space<vmem>>, vector<2x16x2xf32>
    %1 = vector.extract_strided_slice %0 {offsets = [0, 0, 0], sizes = [2, 16, 1], strides = [1, 1, 1]} : vector<2x16x2xf32> to vector<2x16x1xf32>
    %c0_2 = arith.constant 0 : index
    %c0_3 = arith.constant 0 : index
    %2 = vector.load %arg4[%c0_2, %c0_3] : memref<2x256xf32, #tpu.memory_space<vmem>>, vector<1x256xf32>
    %3 = vector.shape_cast %2 : vector<1x256xf32> to vector<1x1x256xf32>
    %4 = vector.broadcast %1 : vector<2x16x1xf32> to vector<2x16x256xf32>
    %5 = vector.broadcast %3 : vector<1x1x256xf32> to vector<2x16x256xf32>
    %6 = arith.mulf %4, %5 : vector<2x16x256xf32>
    %7 = vector.extract_strided_slice %0 {offsets = [0, 0, 1], sizes = [2, 16, 1], strides = [1, 1, 1]} : vector<2x16x2xf32> to vector<2x16x1xf32>
    %c1 = arith.constant 1 : index
    %c0_4 = arith.constant 0 : index
    %8 = vector.load %arg4[%c1, %c0_4] : memref<2x256xf32, #tpu.memory_space<vmem>>, vector<1x256xf32>
    %9 = vector.shape_cast %8 : vector<1x256xf32> to vector<1x1x256xf32>
    %10 = vector.broadcast %7 : vector<2x16x1xf32> to vector<2x16x256xf32>
    %11 = vector.broadcast %9 : vector<1x1x256xf32> to vector<2x16x256xf32>
    %12 = arith.mulf %10, %11 : vector<2x16x256xf32>
    %13 = arith.addf %6, %12 : vector<2x16x256xf32>
    %c0_5 = arith.constant 0 : index
    %c0_6 = arith.constant 0 : index
    %14 = vector.load %arg6[%c0_5, %c0_6] : memref<1x256xf32, #tpu.memory_space<vmem>>, vector<1x256xf32>
    %15 = vector.shape_cast %14 : vector<1x256xf32> to vector<1x1x256xf32>
    %16 = vector.broadcast %15 : vector<1x1x256xf32> to vector<2x16x256xf32>
    %17 = arith.addf %13, %16 : vector<2x16x256xf32>
    %c0_7 = arith.constant 0 : index
    %c0_8 = arith.constant 0 : index
    %c0_9 = arith.constant 0 : index
    %18 = vector.load %arg12[%c0_7, %c0_8, %c0_9] : memref<2x16x256xf32, #tpu.memory_space<vmem>>, vector<2x16x256xf32>
    tpu.vector_store %arg12[%c0_7, %c0_8, %c0_9], %17 {strides = array<i32>} : memref<2x16x256xf32, #tpu.memory_space<vmem>>, vector<2x16x256xf32>,
    %c0_10 = arith.constant 0 : index
    %c0_11 = arith.constant 0 : index
    %19 = vector.load %arg5[%c0_10, %c0_11] : memref<64x256xf32, #tpu.memory_space<vmem>>, vector<64x256xf32>
    %c0_12 = arith.constant 0 : index
    %c0_13 = arith.constant 0 : index
    %20 = vector.load %arg2[%c0_12, %c0_13] : memref<2x64xf32, #tpu.memory_space<vmem>>, vector<2x64xf32>
    %c0_14 = arith.constant 0 : index
    %c0_15 = arith.constant 0 : index
    %21 = vector.load %arg3[%c0_14, %c0_15] : memref<2x64xf32, #tpu.memory_space<vmem>>, vector<2x64xf32>
    %c0_16 = arith.constant 0 : index
    %c0_17 = arith.constant 0 : index
    %c0_18 = arith.constant 0 : index
    %22 = vector.load %arg12[%c0_16, %c0_17, %c0_18] : memref<2x16x256xf32, #tpu.memory_space<vmem>>, vector<2x1x256xf32>
    %23 = vector.shape_cast %22 : vector<2x1x256xf32> to vector<2x256xf32>
    %cst = arith.constant dense<0.000000e+00> : vector<2x256xf32>
    %24 = tpu.matmul %20, %19, %cst {dimension_numbers = #tpu.dot_dimension_numbers<[1], [0], [0], [1], [0, 0, 1, 1], [], []>} : vector<2x64xf32>, vector<64x256xf32>, vector<2x256xf32> -> vector<2x256xf32>
    %25 = arith.addf %23, %24 : vector<2x256xf32>
    %26 = vector.extract_strided_slice %25 {offsets = [0, 0], sizes = [2, 192], strides = [1, 1]} : vector<2x256xf32> to vector<2x192xf32>
    %27 = arith.negf %26 : vector<2x192xf32>
    %28 = math.exp %27 : vector<2x192xf32>
    %cst_19 = arith.constant 1.000000e+00 : f32
    %29 = vector.broadcast %cst_19 : f32 to vector<2x192xf32>
    %30 = arith.addf %29, %28 : vector<2x192xf32>
    %31 = arith.divf %29, %30 : vector<2x192xf32>
    %32 = vector.extract_strided_slice %31 {offsets = [0, 0], sizes = [2, 64], strides = [1, 1]} : vector<2x192xf32> to vector<2x64xf32>
    %33 = vector.extract_strided_slice %31 {offsets = [0, 64], sizes = [2, 64], strides = [1, 1]} : vector<2x192xf32> to vector<2x64xf32>
    %34 = vector.extract_strided_slice %31 {offsets = [0, 128], sizes = [2, 64], strides = [1, 1]} : vector<2x192xf32> to vector<2x64xf32>
    %35 = vector.extract_strided_slice %25 {offsets = [0, 192], sizes = [2, 64], strides = [1, 1]} : vector<2x256xf32> to vector<2x64xf32>
    %36 = math.tanh %35 : vector<2x64xf32>
    %37 = arith.mulf %33, %21 : vector<2x64xf32>
    %38 = arith.mulf %32, %36 : vector<2x64xf32>
    %39 = arith.addf %37, %38 : vector<2x64xf32>
    %40 = math.tanh %39 : vector<2x64xf32>
    %41 = arith.mulf %34, %40 : vector<2x64xf32>
    %c0_20 = arith.constant 0 : index
    %c0_21 = arith.constant 0 : index
    %42 = vector.load %arg13[%c0_20, %c0_21] : memref<2x1024xf32, #tpu.memory_space<vmem>>, vector<2x64xf32>
    tpu.vector_store %arg13[%c0_20, %c0_21], %41 {strides = array<i32>} : memref<2x1024xf32, #tpu.memory_space<vmem>>, vector<2x64xf32>,
    %c0_22 = arith.constant 0 : index
    %c1_23 = arith.constant 1 : index
    %c0_24 = arith.constant 0 : index
    %43 = vector.load %arg12[%c0_22, %c1_23, %c0_24] : memref<2x16x256xf32, #tpu.memory_space<vmem>>, vector<2x1x256xf32>
    %44 = vector.shape_cast %43 : vector<2x1x256xf32> to vector<2x256xf32>
    %cst_25 = arith.constant dense<0.000000e+00> : vector<2x256xf32>
    %45 = tpu.matmul %41, %19, %cst_25 {dimension_numbers = #tpu.dot_dimension_numbers<[1], [0], [0], [1], [0, 0, 1, 1], [], []>} : vector<2x64xf32>, vector<64x256xf32>, vector<2x256xf32> -> vector<2x256xf32>
    %46 = arith.addf %44, %45 : vector<2x256xf32>
    %47 = vector.extract_strided_slice %46 {offsets = [0, 0], sizes = [2, 192], strides = [1, 1]} : vector<2x256xf32> to vector<2x192xf32>
    %48 = arith.negf %47 : vector<2x192xf32>
    %49 = math.exp %48 : vector<2x192xf32>
    %cst_26 = arith.constant 1.000000e+00 : f32
    %50 = vector.broadcast %cst_26 : f32 to vector<2x192xf32>
    %51 = arith.addf %50, %49 : vector<2x192xf32>
    %52 = arith.divf %50, %51 : vector<2x192xf32>
    %53 = vector.extract_strided_slice %52 {offsets = [0, 0], sizes = [2, 64], strides = [1, 1]} : vector<2x192xf32> to vector<2x64xf32>
    %54 = vector.extract_strided_slice %52 {offsets = [0, 64], sizes = [2, 64], strides = [1, 1]} : vector<2x192xf32> to vector<2x64xf32>
    %55 = vector.extract_strided_slice %52 {offsets = [0, 128], sizes = [2, 64], strides = [1, 1]} : vector<2x192xf32> to vector<2x64xf32>
    %56 = vector.extract_strided_slice %46 {offsets = [0, 192], sizes = [2, 64], strides = [1, 1]} : vector<2x256xf32> to vector<2x64xf32>
    %57 = math.tanh %56 : vector<2x64xf32>
    %58 = arith.mulf %54, %39 : vector<2x64xf32>
    %59 = arith.mulf %53, %57 : vector<2x64xf32>
    %60 = arith.addf %58, %59 : vector<2x64xf32>
    %61 = math.tanh %60 : vector<2x64xf32>
    %62 = arith.mulf %55, %61 : vector<2x64xf32>
    %c0_27 = arith.constant 0 : index
    %c64 = arith.constant 64 : index
    %63 = vector.load %arg13[%c0_27, %c64] : memref<2x1024xf32, #tpu.memory_space<vmem>>, vector<2x64xf32>
    tpu.vector_store %arg13[%c0_27, %c64], %62 {strides = array<i32>} : memref<2x1024xf32, #tpu.memory_space<vmem>>, vector<2x64xf32>,
    %c0_28 = arith.constant 0 : index
    %c2 = arith.constant 2 : index
    %c0_29 = arith.constant 0 : index
    %64 = vector.load %arg12[%c0_28, %c2, %c0_29] : memref<2x16x256xf32, #tpu.memory_space<vmem>>, vector<2x1x256xf32>
    %65 = vector.shape_cast %64 : vector<2x1x256xf32> to vector<2x256xf32>
    %cst_30 = arith.constant dense<0.000000e+00> : vector<2x256xf32>
    %66 = tpu.matmul %62, %19, %cst_30 {dimension_numbers = #tpu.dot_dimension_numbers<[1], [0], [0], [1], [0, 0, 1, 1], [], []>} : vector<2x64xf32>, vector<64x256xf32>, vector<2x256xf32> -> vector<2x256xf32>
    %67 = arith.addf %65, %66 : vector<2x256xf32>
    %68 = vector.extract_strided_slice %67 {offsets = [0, 0], sizes = [2, 192], strides = [1, 1]} : vector<2x256xf32> to vector<2x192xf32>
    %69 = arith.negf %68 : vector<2x192xf32>
    %70 = math.exp %69 : vector<2x192xf32>
    %cst_31 = arith.constant 1.000000e+00 : f32
    %71 = vector.broadcast %cst_31 : f32 to vector<2x192xf32>
    %72 = arith.addf %71, %70 : vector<2x192xf32>
    %73 = arith.divf %71, %72 : vector<2x192xf32>
    %74 = vector.extract_strided_slice %73 {offsets = [0, 0], sizes = [2, 64], strides = [1, 1]} : vector<2x192xf32> to vector<2x64xf32>
    %75 = vector.extract_strided_slice %73 {offsets = [0, 64], sizes = [2, 64], strides = [1, 1]} : vector<2x192xf32> to vector<2x64xf32>
    %76 = vector.extract_strided_slice %73 {offsets = [0, 128], sizes = [2, 64], strides = [1, 1]} : vector<2x192xf32> to vector<2x64xf32>
    %77 = vector.extract_strided_slice %67 {offsets = [0, 192], sizes = [2, 64], strides = [1, 1]} : vector<2x256xf32> to vector<2x64xf32>
    %78 = math.tanh %77 : vector<2x64xf32>
    %79 = arith.mulf %75, %60 : vector<2x64xf32>
    %80 = arith.mulf %74, %78 : vector<2x64xf32>
    %81 = arith.addf %79, %80 : vector<2x64xf32>
    %82 = math.tanh %81 : vector<2x64xf32>
    %83 = arith.mulf %76, %82 : vector<2x64xf32>
    %c0_32 = arith.constant 0 : index
    %c128 = arith.constant 128 : index
    %84 = vector.load %arg13[%c0_32, %c128] : memref<2x1024xf32, #tpu.memory_space<vmem>>, vector<2x64xf32>
    tpu.vector_store %arg13[%c0_32, %c128], %83 {strides = array<i32>} : memref<2x1024xf32, #tpu.memory_space<vmem>>, vector<2x64xf32>,
    %c0_33 = arith.constant 0 : index
    %c3 = arith.constant 3 : index
    %c0_34 = arith.constant 0 : index
    %85 = vector.load %arg12[%c0_33, %c3, %c0_34] : memref<2x16x256xf32, #tpu.memory_space<vmem>>, vector<2x1x256xf32>
    %86 = vector.shape_cast %85 : vector<2x1x256xf32> to vector<2x256xf32>
    %cst_35 = arith.constant dense<0.000000e+00> : vector<2x256xf32>
    %87 = tpu.matmul %83, %19, %cst_35 {dimension_numbers = #tpu.dot_dimension_numbers<[1], [0], [0], [1], [0, 0, 1, 1], [], []>} : vector<2x64xf32>, vector<64x256xf32>, vector<2x256xf32> -> vector<2x256xf32>
    %88 = arith.addf %86, %87 : vector<2x256xf32>
    %89 = vector.extract_strided_slice %88 {offsets = [0, 0], sizes = [2, 192], strides = [1, 1]} : vector<2x256xf32> to vector<2x192xf32>
    %90 = arith.negf %89 : vector<2x192xf32>
    %91 = math.exp %90 : vector<2x192xf32>
    %cst_36 = arith.constant 1.000000e+00 : f32
    %92 = vector.broadcast %cst_36 : f32 to vector<2x192xf32>
    %93 = arith.addf %92, %91 : vector<2x192xf32>
    %94 = arith.divf %92, %93 : vector<2x192xf32>
    %95 = vector.extract_strided_slice %94 {offsets = [0, 0], sizes = [2, 64], strides = [1, 1]} : vector<2x192xf32> to vector<2x64xf32>
    %96 = vector.extract_strided_slice %94 {offsets = [0, 64], sizes = [2, 64], strides = [1, 1]} : vector<2x192xf32> to vector<2x64xf32>
    %97 = vector.extract_strided_slice %94 {offsets = [0, 128], sizes = [2, 64], strides = [1, 1]} : vector<2x192xf32> to vector<2x64xf32>
    %98 = vector.extract_strided_slice %88 {offsets = [0, 192], sizes = [2, 64], strides = [1, 1]} : vector<2x256xf32> to vector<2x64xf32>
    %99 = math.tanh %98 : vector<2x64xf32>
    %100 = arith.mulf %96, %81 : vector<2x64xf32>
    %101 = arith.mulf %95, %99 : vector<2x64xf32>
    %102 = arith.addf %100, %101 : vector<2x64xf32>
    %103 = math.tanh %102 : vector<2x64xf32>
    %104 = arith.mulf %97, %103 : vector<2x64xf32>
    %c0_37 = arith.constant 0 : index
    %c192 = arith.constant 192 : index
    %105 = vector.load %arg13[%c0_37, %c192] : memref<2x1024xf32, #tpu.memory_space<vmem>>, vector<2x64xf32>
    tpu.vector_store %arg13[%c0_37, %c192], %104 {strides = array<i32>} : memref<2x1024xf32, #tpu.memory_space<vmem>>, vector<2x64xf32>,
    %c0_38 = arith.constant 0 : index
    %c4 = arith.constant 4 : index
    %c0_39 = arith.constant 0 : index
    %106 = vector.load %arg12[%c0_38, %c4, %c0_39] : memref<2x16x256xf32, #tpu.memory_space<vmem>>, vector<2x1x256xf32>
    %107 = vector.shape_cast %106 : vector<2x1x256xf32> to vector<2x256xf32>
    %cst_40 = arith.constant dense<0.000000e+00> : vector<2x256xf32>
    %108 = tpu.matmul %104, %19, %cst_40 {dimension_numbers = #tpu.dot_dimension_numbers<[1], [0], [0], [1], [0, 0, 1, 1], [], []>} : vector<2x64xf32>, vector<64x256xf32>, vector<2x256xf32> -> vector<2x256xf32>
    %109 = arith.addf %107, %108 : vector<2x256xf32>
    %110 = vector.extract_strided_slice %109 {offsets = [0, 0], sizes = [2, 192], strides = [1, 1]} : vector<2x256xf32> to vector<2x192xf32>
    %111 = arith.negf %110 : vector<2x192xf32>
    %112 = math.exp %111 : vector<2x192xf32>
    %cst_41 = arith.constant 1.000000e+00 : f32
    %113 = vector.broadcast %cst_41 : f32 to vector<2x192xf32>
    %114 = arith.addf %113, %112 : vector<2x192xf32>
    %115 = arith.divf %113, %114 : vector<2x192xf32>
    %116 = vector.extract_strided_slice %115 {offsets = [0, 0], sizes = [2, 64], strides = [1, 1]} : vector<2x192xf32> to vector<2x64xf32>
    %117 = vector.extract_strided_slice %115 {offsets = [0, 64], sizes = [2, 64], strides = [1, 1]} : vector<2x192xf32> to vector<2x64xf32>
    %118 = vector.extract_strided_slice %115 {offsets = [0, 128], sizes = [2, 64], strides = [1, 1]} : vector<2x192xf32> to vector<2x64xf32>
    %119 = vector.extract_strided_slice %109 {offsets = [0, 192], sizes = [2, 64], strides = [1, 1]} : vector<2x256xf32> to vector<2x64xf32>
    %120 = math.tanh %119 : vector<2x64xf32>
    %121 = arith.mulf %117, %102 : vector<2x64xf32>
    %122 = arith.mulf %116, %120 : vector<2x64xf32>
    %123 = arith.addf %121, %122 : vector<2x64xf32>
    %124 = math.tanh %123 : vector<2x64xf32>
    %125 = arith.mulf %118, %124 : vector<2x64xf32>
    %c0_42 = arith.constant 0 : index
    %c256 = arith.constant 256 : index
    %126 = vector.load %arg13[%c0_42, %c256] : memref<2x1024xf32, #tpu.memory_space<vmem>>, vector<2x64xf32>
    tpu.vector_store %arg13[%c0_42, %c256], %125 {strides = array<i32>} : memref<2x1024xf32, #tpu.memory_space<vmem>>, vector<2x64xf32>,
    %c0_43 = arith.constant 0 : index
    %c5 = arith.constant 5 : index
    %c0_44 = arith.constant 0 : index
    %127 = vector.load %arg12[%c0_43, %c5, %c0_44] : memref<2x16x256xf32, #tpu.memory_space<vmem>>, vector<2x1x256xf32>
    %128 = vector.shape_cast %127 : vector<2x1x256xf32> to vector<2x256xf32>
    %cst_45 = arith.constant dense<0.000000e+00> : vector<2x256xf32>
    %129 = tpu.matmul %125, %19, %cst_45 {dimension_numbers = #tpu.dot_dimension_numbers<[1], [0], [0], [1], [0, 0, 1, 1], [], []>} : vector<2x64xf32>, vector<64x256xf32>, vector<2x256xf32> -> vector<2x256xf32>
    %130 = arith.addf %128, %129 : vector<2x256xf32>
    %131 = vector.extract_strided_slice %130 {offsets = [0, 0], sizes = [2, 192], strides = [1, 1]} : vector<2x256xf32> to vector<2x192xf32>
    %132 = arith.negf %131 : vector<2x192xf32>
    %133 = math.exp %132 : vector<2x192xf32>
    %cst_46 = arith.constant 1.000000e+00 : f32
    %134 = vector.broadcast %cst_46 : f32 to vector<2x192xf32>
    %135 = arith.addf %134, %133 : vector<2x192xf32>
    %136 = arith.divf %134, %135 : vector<2x192xf32>
    %137 = vector.extract_strided_slice %136 {offsets = [0, 0], sizes = [2, 64], strides = [1, 1]} : vector<2x192xf32> to vector<2x64xf32>
    %138 = vector.extract_strided_slice %136 {offsets = [0, 64], sizes = [2, 64], strides = [1, 1]} : vector<2x192xf32> to vector<2x64xf32>
    %139 = vector.extract_strided_slice %136 {offsets = [0, 128], sizes = [2, 64], strides = [1, 1]} : vector<2x192xf32> to vector<2x64xf32>
    %140 = vector.extract_strided_slice %130 {offsets = [0, 192], sizes = [2, 64], strides = [1, 1]} : vector<2x256xf32> to vector<2x64xf32>
    %141 = math.tanh %140 : vector<2x64xf32>
    %142 = arith.mulf %138, %123 : vector<2x64xf32>
    %143 = arith.mulf %137, %141 : vector<2x64xf32>
    %144 = arith.addf %142, %143 : vector<2x64xf32>
    %145 = math.tanh %144 : vector<2x64xf32>
    %146 = arith.mulf %139, %145 : vector<2x64xf32>
    %c0_47 = arith.constant 0 : index
    %c320 = arith.constant 320 : index
    %147 = vector.load %arg13[%c0_47, %c320] : memref<2x1024xf32, #tpu.memory_space<vmem>>, vector<2x64xf32>
    tpu.vector_store %arg13[%c0_47, %c320], %146 {strides = array<i32>} : memref<2x1024xf32, #tpu.memory_space<vmem>>, vector<2x64xf32>,
    %c0_48 = arith.constant 0 : index
    %c6 = arith.constant 6 : index
    %c0_49 = arith.constant 0 : index
    %148 = vector.load %arg12[%c0_48, %c6, %c0_49] : memref<2x16x256xf32, #tpu.memory_space<vmem>>, vector<2x1x256xf32>
    %149 = vector.shape_cast %148 : vector<2x1x256xf32> to vector<2x256xf32>
    %cst_50 = arith.constant dense<0.000000e+00> : vector<2x256xf32>
    %150 = tpu.matmul %146, %19, %cst_50 {dimension_numbers = #tpu.dot_dimension_numbers<[1], [0], [0], [1], [0, 0, 1, 1], [], []>} : vector<2x64xf32>, vector<64x256xf32>, vector<2x256xf32> -> vector<2x256xf32>
    %151 = arith.addf %149, %150 : vector<2x256xf32>
    %152 = vector.extract_strided_slice %151 {offsets = [0, 0], sizes = [2, 192], strides = [1, 1]} : vector<2x256xf32> to vector<2x192xf32>
    %153 = arith.negf %152 : vector<2x192xf32>
    %154 = math.exp %153 : vector<2x192xf32>
    %cst_51 = arith.constant 1.000000e+00 : f32
    %155 = vector.broadcast %cst_51 : f32 to vector<2x192xf32>
    %156 = arith.addf %155, %154 : vector<2x192xf32>
    %157 = arith.divf %155, %156 : vector<2x192xf32>
    %158 = vector.extract_strided_slice %157 {offsets = [0, 0], sizes = [2, 64], strides = [1, 1]} : vector<2x192xf32> to vector<2x64xf32>
    %159 = vector.extract_strided_slice %157 {offsets = [0, 64], sizes = [2, 64], strides = [1, 1]} : vector<2x192xf32> to vector<2x64xf32>
    %160 = vector.extract_strided_slice %157 {offsets = [0, 128], sizes = [2, 64], strides = [1, 1]} : vector<2x192xf32> to vector<2x64xf32>
    %161 = vector.extract_strided_slice %151 {offsets = [0, 192], sizes = [2, 64], strides = [1, 1]} : vector<2x256xf32> to vector<2x64xf32>
    %162 = math.tanh %161 : vector<2x64xf32>
    %163 = arith.mulf %159, %144 : vector<2x64xf32>
    %164 = arith.mulf %158, %162 : vector<2x64xf32>
    %165 = arith.addf %163, %164 : vector<2x64xf32>
    %166 = math.tanh %165 : vector<2x64xf32>
    %167 = arith.mulf %160, %166 : vector<2x64xf32>
    %c0_52 = arith.constant 0 : index
    %c384 = arith.constant 384 : index
    %168 = vector.load %arg13[%c0_52, %c384] : memref<2x1024xf32, #tpu.memory_space<vmem>>, vector<2x64xf32>
    tpu.vector_store %arg13[%c0_52, %c384], %167 {strides = array<i32>} : memref<2x1024xf32, #tpu.memory_space<vmem>>, vector<2x64xf32>,
    %c0_53 = arith.constant 0 : index
    %c7 = arith.constant 7 : index
    %c0_54 = arith.constant 0 : index
    %169 = vector.load %arg12[%c0_53, %c7, %c0_54] : memref<2x16x256xf32, #tpu.memory_space<vmem>>, vector<2x1x256xf32>
    %170 = vector.shape_cast %169 : vector<2x1x256xf32> to vector<2x256xf32>
    %cst_55 = arith.constant dense<0.000000e+00> : vector<2x256xf32>
    %171 = tpu.matmul %167, %19, %cst_55 {dimension_numbers = #tpu.dot_dimension_numbers<[1], [0], [0], [1], [0, 0, 1, 1], [], []>} : vector<2x64xf32>, vector<64x256xf32>, vector<2x256xf32> -> vector<2x256xf32>
    %172 = arith.addf %170, %171 : vector<2x256xf32>
    %173 = vector.extract_strided_slice %172 {offsets = [0, 0], sizes = [2, 192], strides = [1, 1]} : vector<2x256xf32> to vector<2x192xf32>
    %174 = arith.negf %173 : vector<2x192xf32>
    %175 = math.exp %174 : vector<2x192xf32>
    %cst_56 = arith.constant 1.000000e+00 : f32
    %176 = vector.broadcast %cst_56 : f32 to vector<2x192xf32>
    %177 = arith.addf %176, %175 : vector<2x192xf32>
    %178 = arith.divf %176, %177 : vector<2x192xf32>
    %179 = vector.extract_strided_slice %178 {offsets = [0, 0], sizes = [2, 64], strides = [1, 1]} : vector<2x192xf32> to vector<2x64xf32>
    %180 = vector.extract_strided_slice %178 {offsets = [0, 64], sizes = [2, 64], strides = [1, 1]} : vector<2x192xf32> to vector<2x64xf32>
    %181 = vector.extract_strided_slice %178 {offsets = [0, 128], sizes = [2, 64], strides = [1, 1]} : vector<2x192xf32> to vector<2x64xf32>
    %182 = vector.extract_strided_slice %172 {offsets = [0, 192], sizes = [2, 64], strides = [1, 1]} : vector<2x256xf32> to vector<2x64xf32>
    %183 = math.tanh %182 : vector<2x64xf32>
    %184 = arith.mulf %180, %165 : vector<2x64xf32>
    %185 = arith.mulf %179, %183 : vector<2x64xf32>
    %186 = arith.addf %184, %185 : vector<2x64xf32>
    %187 = math.tanh %186 : vector<2x64xf32>
    %188 = arith.mulf %181, %187 : vector<2x64xf32>
    %c0_57 = arith.constant 0 : index
    %c448 = arith.constant 448 : index
    %189 = vector.load %arg13[%c0_57, %c448] : memref<2x1024xf32, #tpu.memory_space<vmem>>, vector<2x64xf32>
    tpu.vector_store %arg13[%c0_57, %c448], %188 {strides = array<i32>} : memref<2x1024xf32, #tpu.memory_space<vmem>>, vector<2x64xf32>,
    %c0_58 = arith.constant 0 : index
    %c8 = arith.constant 8 : index
    %c0_59 = arith.constant 0 : index
    %190 = vector.load %arg12[%c0_58, %c8, %c0_59] : memref<2x16x256xf32, #tpu.memory_space<vmem>>, vector<2x1x256xf32>
    %191 = vector.shape_cast %190 : vector<2x1x256xf32> to vector<2x256xf32>
    %cst_60 = arith.constant dense<0.000000e+00> : vector<2x256xf32>
    %192 = tpu.matmul %188, %19, %cst_60 {dimension_numbers = #tpu.dot_dimension_numbers<[1], [0], [0], [1], [0, 0, 1, 1], [], []>} : vector<2x64xf32>, vector<64x256xf32>, vector<2x256xf32> -> vector<2x256xf32>
    %193 = arith.addf %191, %192 : vector<2x256xf32>
    %194 = vector.extract_strided_slice %193 {offsets = [0, 0], sizes = [2, 192], strides = [1, 1]} : vector<2x256xf32> to vector<2x192xf32>
    %195 = arith.negf %194 : vector<2x192xf32>
    %196 = math.exp %195 : vector<2x192xf32>
    %cst_61 = arith.constant 1.000000e+00 : f32
    %197 = vector.broadcast %cst_61 : f32 to vector<2x192xf32>
    %198 = arith.addf %197, %196 : vector<2x192xf32>
    %199 = arith.divf %197, %198 : vector<2x192xf32>
    %200 = vector.extract_strided_slice %199 {offsets = [0, 0], sizes = [2, 64], strides = [1, 1]} : vector<2x192xf32> to vector<2x64xf32>
    %201 = vector.extract_strided_slice %199 {offsets = [0, 64], sizes = [2, 64], strides = [1, 1]} : vector<2x192xf32> to vector<2x64xf32>
    %202 = vector.extract_strided_slice %199 {offsets = [0, 128], sizes = [2, 64], strides = [1, 1]} : vector<2x192xf32> to vector<2x64xf32>
    %203 = vector.extract_strided_slice %193 {offsets = [0, 192], sizes = [2, 64], strides = [1, 1]} : vector<2x256xf32> to vector<2x64xf32>
    %204 = math.tanh %203 : vector<2x64xf32>
    %205 = arith.mulf %201, %186 : vector<2x64xf32>
    %206 = arith.mulf %200, %204 : vector<2x64xf32>
    %207 = arith.addf %205, %206 : vector<2x64xf32>
    %208 = math.tanh %207 : vector<2x64xf32>
    %209 = arith.mulf %202, %208 : vector<2x64xf32>
    %c0_62 = arith.constant 0 : index
    %c512 = arith.constant 512 : index
    %210 = vector.load %arg13[%c0_62, %c512] : memref<2x1024xf32, #tpu.memory_space<vmem>>, vector<2x64xf32>
    tpu.vector_store %arg13[%c0_62, %c512], %209 {strides = array<i32>} : memref<2x1024xf32, #tpu.memory_space<vmem>>, vector<2x64xf32>,
    %c0_63 = arith.constant 0 : index
    %c9 = arith.constant 9 : index
    %c0_64 = arith.constant 0 : index
    %211 = vector.load %arg12[%c0_63, %c9, %c0_64] : memref<2x16x256xf32, #tpu.memory_space<vmem>>, vector<2x1x256xf32>
    %212 = vector.shape_cast %211 : vector<2x1x256xf32> to vector<2x256xf32>
    %cst_65 = arith.constant dense<0.000000e+00> : vector<2x256xf32>
    %213 = tpu.matmul %209, %19, %cst_65 {dimension_numbers = #tpu.dot_dimension_numbers<[1], [0], [0], [1], [0, 0, 1, 1], [], []>} : vector<2x64xf32>, vector<64x256xf32>, vector<2x256xf32> -> vector<2x256xf32>
    %214 = arith.addf %212, %213 : vector<2x256xf32>
    %215 = vector.extract_strided_slice %214 {offsets = [0, 0], sizes = [2, 192], strides = [1, 1]} : vector<2x256xf32> to vector<2x192xf32>
    %216 = arith.negf %215 : vector<2x192xf32>
    %217 = math.exp %216 : vector<2x192xf32>
    %cst_66 = arith.constant 1.000000e+00 : f32
    %218 = vector.broadcast %cst_66 : f32 to vector<2x192xf32>
    %219 = arith.addf %218, %217 : vector<2x192xf32>
    %220 = arith.divf %218, %219 : vector<2x192xf32>
    %221 = vector.extract_strided_slice %220 {offsets = [0, 0], sizes = [2, 64], strides = [1, 1]} : vector<2x192xf32> to vector<2x64xf32>
    %222 = vector.extract_strided_slice %220 {offsets = [0, 64], sizes = [2, 64], strides = [1, 1]} : vector<2x192xf32> to vector<2x64xf32>
    %223 = vector.extract_strided_slice %220 {offsets = [0, 128], sizes = [2, 64], strides = [1, 1]} : vector<2x192xf32> to vector<2x64xf32>
    %224 = vector.extract_strided_slice %214 {offsets = [0, 192], sizes = [2, 64], strides = [1, 1]} : vector<2x256xf32> to vector<2x64xf32>
    %225 = math.tanh %224 : vector<2x64xf32>
    %226 = arith.mulf %222, %207 : vector<2x64xf32>
    %227 = arith.mulf %221, %225 : vector<2x64xf32>
    %228 = arith.addf %226, %227 : vector<2x64xf32>
    %229 = math.tanh %228 : vector<2x64xf32>
    %230 = arith.mulf %223, %229 : vector<2x64xf32>
    %c0_67 = arith.constant 0 : index
    %c576 = arith.constant 576 : index
    %231 = vector.load %arg13[%c0_67, %c576] : memref<2x1024xf32, #tpu.memory_space<vmem>>, vector<2x64xf32>
    tpu.vector_store %arg13[%c0_67, %c576], %230 {strides = array<i32>} : memref<2x1024xf32, #tpu.memory_space<vmem>>, vector<2x64xf32>,
    %c0_68 = arith.constant 0 : index
    %c10 = arith.constant 10 : index
    %c0_69 = arith.constant 0 : index
    %232 = vector.load %arg12[%c0_68, %c10, %c0_69] : memref<2x16x256xf32, #tpu.memory_space<vmem>>, vector<2x1x256xf32>
    %233 = vector.shape_cast %232 : vector<2x1x256xf32> to vector<2x256xf32>
    %cst_70 = arith.constant dense<0.000000e+00> : vector<2x256xf32>
    %234 = tpu.matmul %230, %19, %cst_70 {dimension_numbers = #tpu.dot_dimension_numbers<[1], [0], [0], [1], [0, 0, 1, 1], [], []>} : vector<2x64xf32>, vector<64x256xf32>, vector<2x256xf32> -> vector<2x256xf32>
    %235 = arith.addf %233, %234 : vector<2x256xf32>
    %236 = vector.extract_strided_slice %235 {offsets = [0, 0], sizes = [2, 192], strides = [1, 1]} : vector<2x256xf32> to vector<2x192xf32>
    %237 = arith.negf %236 : vector<2x192xf32>
    %238 = math.exp %237 : vector<2x192xf32>
    %cst_71 = arith.constant 1.000000e+00 : f32
    %239 = vector.broadcast %cst_71 : f32 to vector<2x192xf32>
    %240 = arith.addf %239, %238 : vector<2x192xf32>
    %241 = arith.divf %239, %240 : vector<2x192xf32>
    %242 = vector.extract_strided_slice %241 {offsets = [0, 0], sizes = [2, 64], strides = [1, 1]} : vector<2x192xf32> to vector<2x64xf32>
    %243 = vector.extract_strided_slice %241 {offsets = [0, 64], sizes = [2, 64], strides = [1, 1]} : vector<2x192xf32> to vector<2x64xf32>
    %244 = vector.extract_strided_slice %241 {offsets = [0, 128], sizes = [2, 64], strides = [1, 1]} : vector<2x192xf32> to vector<2x64xf32>
    %245 = vector.extract_strided_slice %235 {offsets = [0, 192], sizes = [2, 64], strides = [1, 1]} : vector<2x256xf32> to vector<2x64xf32>
    %246 = math.tanh %245 : vector<2x64xf32>
    %247 = arith.mulf %243, %228 : vector<2x64xf32>
    %248 = arith.mulf %242, %246 : vector<2x64xf32>
    %249 = arith.addf %247, %248 : vector<2x64xf32>
    %250 = math.tanh %249 : vector<2x64xf32>
    %251 = arith.mulf %244, %250 : vector<2x64xf32>
    %c0_72 = arith.constant 0 : index
    %c640 = arith.constant 640 : index
    %252 = vector.load %arg13[%c0_72, %c640] : memref<2x1024xf32, #tpu.memory_space<vmem>>, vector<2x64xf32>
    tpu.vector_store %arg13[%c0_72, %c640], %251 {strides = array<i32>} : memref<2x1024xf32, #tpu.memory_space<vmem>>, vector<2x64xf32>,
    %c0_73 = arith.constant 0 : index
    %c11 = arith.constant 11 : index
    %c0_74 = arith.constant 0 : index
    %253 = vector.load %arg12[%c0_73, %c11, %c0_74] : memref<2x16x256xf32, #tpu.memory_space<vmem>>, vector<2x1x256xf32>
    %254 = vector.shape_cast %253 : vector<2x1x256xf32> to vector<2x256xf32>
    %cst_75 = arith.constant dense<0.000000e+00> : vector<2x256xf32>
    %255 = tpu.matmul %251, %19, %cst_75 {dimension_numbers = #tpu.dot_dimension_numbers<[1], [0], [0], [1], [0, 0, 1, 1], [], []>} : vector<2x64xf32>, vector<64x256xf32>, vector<2x256xf32> -> vector<2x256xf32>
    %256 = arith.addf %254, %255 : vector<2x256xf32>
    %257 = vector.extract_strided_slice %256 {offsets = [0, 0], sizes = [2, 192], strides = [1, 1]} : vector<2x256xf32> to vector<2x192xf32>
    %258 = arith.negf %257 : vector<2x192xf32>
    %259 = math.exp %258 : vector<2x192xf32>
    %cst_76 = arith.constant 1.000000e+00 : f32
    %260 = vector.broadcast %cst_76 : f32 to vector<2x192xf32>
    %261 = arith.addf %260, %259 : vector<2x192xf32>
    %262 = arith.divf %260, %261 : vector<2x192xf32>
    %263 = vector.extract_strided_slice %262 {offsets = [0, 0], sizes = [2, 64], strides = [1, 1]} : vector<2x192xf32> to vector<2x64xf32>
    %264 = vector.extract_strided_slice %262 {offsets = [0, 64], sizes = [2, 64], strides = [1, 1]} : vector<2x192xf32> to vector<2x64xf32>
    %265 = vector.extract_strided_slice %262 {offsets = [0, 128], sizes = [2, 64], strides = [1, 1]} : vector<2x192xf32> to vector<2x64xf32>
    %266 = vector.extract_strided_slice %256 {offsets = [0, 192], sizes = [2, 64], strides = [1, 1]} : vector<2x256xf32> to vector<2x64xf32>
    %267 = math.tanh %266 : vector<2x64xf32>
    %268 = arith.mulf %264, %249 : vector<2x64xf32>
    %269 = arith.mulf %263, %267 : vector<2x64xf32>
    %270 = arith.addf %268, %269 : vector<2x64xf32>
    %271 = math.tanh %270 : vector<2x64xf32>
    %272 = arith.mulf %265, %271 : vector<2x64xf32>
    %c0_77 = arith.constant 0 : index
    %c704 = arith.constant 704 : index
    %273 = vector.load %arg13[%c0_77, %c704] : memref<2x1024xf32, #tpu.memory_space<vmem>>, vector<2x64xf32>
    tpu.vector_store %arg13[%c0_77, %c704], %272 {strides = array<i32>} : memref<2x1024xf32, #tpu.memory_space<vmem>>, vector<2x64xf32>,
    %c0_78 = arith.constant 0 : index
    %c12 = arith.constant 12 : index
    %c0_79 = arith.constant 0 : index
    %274 = vector.load %arg12[%c0_78, %c12, %c0_79] : memref<2x16x256xf32, #tpu.memory_space<vmem>>, vector<2x1x256xf32>
    %275 = vector.shape_cast %274 : vector<2x1x256xf32> to vector<2x256xf32>
    %cst_80 = arith.constant dense<0.000000e+00> : vector<2x256xf32>
    %276 = tpu.matmul %272, %19, %cst_80 {dimension_numbers = #tpu.dot_dimension_numbers<[1], [0], [0], [1], [0, 0, 1, 1], [], []>} : vector<2x64xf32>, vector<64x256xf32>, vector<2x256xf32> -> vector<2x256xf32>
    %277 = arith.addf %275, %276 : vector<2x256xf32>
    %278 = vector.extract_strided_slice %277 {offsets = [0, 0], sizes = [2, 192], strides = [1, 1]} : vector<2x256xf32> to vector<2x192xf32>
    %279 = arith.negf %278 : vector<2x192xf32>
    %280 = math.exp %279 : vector<2x192xf32>
    %cst_81 = arith.constant 1.000000e+00 : f32
    %281 = vector.broadcast %cst_81 : f32 to vector<2x192xf32>
    %282 = arith.addf %281, %280 : vector<2x192xf32>
    %283 = arith.divf %281, %282 : vector<2x192xf32>
    %284 = vector.extract_strided_slice %283 {offsets = [0, 0], sizes = [2, 64], strides = [1, 1]} : vector<2x192xf32> to vector<2x64xf32>
    %285 = vector.extract_strided_slice %283 {offsets = [0, 64], sizes = [2, 64], strides = [1, 1]} : vector<2x192xf32> to vector<2x64xf32>
    %286 = vector.extract_strided_slice %283 {offsets = [0, 128], sizes = [2, 64], strides = [1, 1]} : vector<2x192xf32> to vector<2x64xf32>
    %287 = vector.extract_strided_slice %277 {offsets = [0, 192], sizes = [2, 64], strides = [1, 1]} : vector<2x256xf32> to vector<2x64xf32>
    %288 = math.tanh %287 : vector<2x64xf32>
    %289 = arith.mulf %285, %270 : vector<2x64xf32>
    %290 = arith.mulf %284, %288 : vector<2x64xf32>
    %291 = arith.addf %289, %290 : vector<2x64xf32>
    %292 = math.tanh %291 : vector<2x64xf32>
    %293 = arith.mulf %286, %292 : vector<2x64xf32>
    %c0_82 = arith.constant 0 : index
    %c768 = arith.constant 768 : index
    %294 = vector.load %arg13[%c0_82, %c768] : memref<2x1024xf32, #tpu.memory_space<vmem>>, vector<2x64xf32>
    tpu.vector_store %arg13[%c0_82, %c768], %293 {strides = array<i32>} : memref<2x1024xf32, #tpu.memory_space<vmem>>, vector<2x64xf32>,
    %c0_83 = arith.constant 0 : index
    %c13 = arith.constant 13 : index
    %c0_84 = arith.constant 0 : index
    %295 = vector.load %arg12[%c0_83, %c13, %c0_84] : memref<2x16x256xf32, #tpu.memory_space<vmem>>, vector<2x1x256xf32>
    %296 = vector.shape_cast %295 : vector<2x1x256xf32> to vector<2x256xf32>
    %cst_85 = arith.constant dense<0.000000e+00> : vector<2x256xf32>
    %297 = tpu.matmul %293, %19, %cst_85 {dimension_numbers = #tpu.dot_dimension_numbers<[1], [0], [0], [1], [0, 0, 1, 1], [], []>} : vector<2x64xf32>, vector<64x256xf32>, vector<2x256xf32> -> vector<2x256xf32>
    %298 = arith.addf %296, %297 : vector<2x256xf32>
    %299 = vector.extract_strided_slice %298 {offsets = [0, 0], sizes = [2, 192], strides = [1, 1]} : vector<2x256xf32> to vector<2x192xf32>
    %300 = arith.negf %299 : vector<2x192xf32>
    %301 = math.exp %300 : vector<2x192xf32>
    %cst_86 = arith.constant 1.000000e+00 : f32
    %302 = vector.broadcast %cst_86 : f32 to vector<2x192xf32>
    %303 = arith.addf %302, %301 : vector<2x192xf32>
    %304 = arith.divf %302, %303 : vector<2x192xf32>
    %305 = vector.extract_strided_slice %304 {offsets = [0, 0], sizes = [2, 64], strides = [1, 1]} : vector<2x192xf32> to vector<2x64xf32>
    %306 = vector.extract_strided_slice %304 {offsets = [0, 64], sizes = [2, 64], strides = [1, 1]} : vector<2x192xf32> to vector<2x64xf32>
    %307 = vector.extract_strided_slice %304 {offsets = [0, 128], sizes = [2, 64], strides = [1, 1]} : vector<2x192xf32> to vector<2x64xf32>
    %308 = vector.extract_strided_slice %298 {offsets = [0, 192], sizes = [2, 64], strides = [1, 1]} : vector<2x256xf32> to vector<2x64xf32>
    %309 = math.tanh %308 : vector<2x64xf32>
    %310 = arith.mulf %306, %291 : vector<2x64xf32>
    %311 = arith.mulf %305, %309 : vector<2x64xf32>
    %312 = arith.addf %310, %311 : vector<2x64xf32>
    %313 = math.tanh %312 : vector<2x64xf32>
    %314 = arith.mulf %307, %313 : vector<2x64xf32>
    %c0_87 = arith.constant 0 : index
    %c832 = arith.constant 832 : index
    %315 = vector.load %arg13[%c0_87, %c832] : memref<2x1024xf32, #tpu.memory_space<vmem>>, vector<2x64xf32>
    tpu.vector_store %arg13[%c0_87, %c832], %314 {strides = array<i32>} : memref<2x1024xf32, #tpu.memory_space<vmem>>, vector<2x64xf32>,
    %c0_88 = arith.constant 0 : index
    %c14 = arith.constant 14 : index
    %c0_89 = arith.constant 0 : index
    %316 = vector.load %arg12[%c0_88, %c14, %c0_89] : memref<2x16x256xf32, #tpu.memory_space<vmem>>, vector<2x1x256xf32>
    %317 = vector.shape_cast %316 : vector<2x1x256xf32> to vector<2x256xf32>
    %cst_90 = arith.constant dense<0.000000e+00> : vector<2x256xf32>
    %318 = tpu.matmul %314, %19, %cst_90 {dimension_numbers = #tpu.dot_dimension_numbers<[1], [0], [0], [1], [0, 0, 1, 1], [], []>} : vector<2x64xf32>, vector<64x256xf32>, vector<2x256xf32> -> vector<2x256xf32>
    %319 = arith.addf %317, %318 : vector<2x256xf32>
    %320 = vector.extract_strided_slice %319 {offsets = [0, 0], sizes = [2, 192], strides = [1, 1]} : vector<2x256xf32> to vector<2x192xf32>
    %321 = arith.negf %320 : vector<2x192xf32>
    %322 = math.exp %321 : vector<2x192xf32>
    %cst_91 = arith.constant 1.000000e+00 : f32
    %323 = vector.broadcast %cst_91 : f32 to vector<2x192xf32>
    %324 = arith.addf %323, %322 : vector<2x192xf32>
    %325 = arith.divf %323, %324 : vector<2x192xf32>
    %326 = vector.extract_strided_slice %325 {offsets = [0, 0], sizes = [2, 64], strides = [1, 1]} : vector<2x192xf32> to vector<2x64xf32>
    %327 = vector.extract_strided_slice %325 {offsets = [0, 64], sizes = [2, 64], strides = [1, 1]} : vector<2x192xf32> to vector<2x64xf32>
    %328 = vector.extract_strided_slice %325 {offsets = [0, 128], sizes = [2, 64], strides = [1, 1]} : vector<2x192xf32> to vector<2x64xf32>
    %329 = vector.extract_strided_slice %319 {offsets = [0, 192], sizes = [2, 64], strides = [1, 1]} : vector<2x256xf32> to vector<2x64xf32>
    %330 = math.tanh %329 : vector<2x64xf32>
    %331 = arith.mulf %327, %312 : vector<2x64xf32>
    %332 = arith.mulf %326, %330 : vector<2x64xf32>
    %333 = arith.addf %331, %332 : vector<2x64xf32>
    %334 = math.tanh %333 : vector<2x64xf32>
    %335 = arith.mulf %328, %334 : vector<2x64xf32>
    %c0_92 = arith.constant 0 : index
    %c896 = arith.constant 896 : index
    %336 = vector.load %arg13[%c0_92, %c896] : memref<2x1024xf32, #tpu.memory_space<vmem>>, vector<2x64xf32>
    tpu.vector_store %arg13[%c0_92, %c896], %335 {strides = array<i32>} : memref<2x1024xf32, #tpu.memory_space<vmem>>, vector<2x64xf32>,
    %c0_93 = arith.constant 0 : index
    %c15 = arith.constant 15 : index
    %c0_94 = arith.constant 0 : index
    %337 = vector.load %arg12[%c0_93, %c15, %c0_94] : memref<2x16x256xf32, #tpu.memory_space<vmem>>, vector<2x1x256xf32>
    %338 = vector.shape_cast %337 : vector<2x1x256xf32> to vector<2x256xf32>
    %cst_95 = arith.constant dense<0.000000e+00> : vector<2x256xf32>
    %339 = tpu.matmul %335, %19, %cst_95 {dimension_numbers = #tpu.dot_dimension_numbers<[1], [0], [0], [1], [0, 0, 1, 1], [], []>} : vector<2x64xf32>, vector<64x256xf32>, vector<2x256xf32> -> vector<2x256xf32>
    %340 = arith.addf %338, %339 : vector<2x256xf32>
    %341 = vector.extract_strided_slice %340 {offsets = [0, 0], sizes = [2, 192], strides = [1, 1]} : vector<2x256xf32> to vector<2x192xf32>
    %342 = arith.negf %341 : vector<2x192xf32>
    %343 = math.exp %342 : vector<2x192xf32>
    %cst_96 = arith.constant 1.000000e+00 : f32
    %344 = vector.broadcast %cst_96 : f32 to vector<2x192xf32>
    %345 = arith.addf %344, %343 : vector<2x192xf32>
    %346 = arith.divf %344, %345 : vector<2x192xf32>
    %347 = vector.extract_strided_slice %346 {offsets = [0, 0], sizes = [2, 64], strides = [1, 1]} : vector<2x192xf32> to vector<2x64xf32>
    %348 = vector.extract_strided_slice %346 {offsets = [0, 64], sizes = [2, 64], strides = [1, 1]} : vector<2x192xf32> to vector<2x64xf32>
    %349 = vector.extract_strided_slice %346 {offsets = [0, 128], sizes = [2, 64], strides = [1, 1]} : vector<2x192xf32> to vector<2x64xf32>
    %350 = vector.extract_strided_slice %340 {offsets = [0, 192], sizes = [2, 64], strides = [1, 1]} : vector<2x256xf32> to vector<2x64xf32>
    %351 = math.tanh %350 : vector<2x64xf32>
    %352 = arith.mulf %348, %333 : vector<2x64xf32>
    %353 = arith.mulf %347, %351 : vector<2x64xf32>
    %354 = arith.addf %352, %353 : vector<2x64xf32>
    %355 = math.tanh %354 : vector<2x64xf32>
    %356 = arith.mulf %349, %355 : vector<2x64xf32>
    %c0_97 = arith.constant 0 : index
    %c960 = arith.constant 960 : index
    %357 = vector.load %arg13[%c0_97, %c960] : memref<2x1024xf32, #tpu.memory_space<vmem>>, vector<2x64xf32>
    tpu.vector_store %arg13[%c0_97, %c960], %356 {strides = array<i32>} : memref<2x1024xf32, #tpu.memory_space<vmem>>, vector<2x64xf32>,
    %c0_98 = arith.constant 0 : index
    %c0_99 = arith.constant 0 : index
    %358 = vector.load %arg13[%c0_98, %c0_99] : memref<2x1024xf32, #tpu.memory_space<vmem>>, vector<2x1024xf32>
    %c0_100 = arith.constant 0 : index
    %c0_101 = arith.constant 0 : index
    %359 = vector.load %arg7[%c0_100, %c0_101] : memref<1024x10xf32, #tpu.memory_space<vmem>>, vector<1024x10xf32>
    %cst_102 = arith.constant dense<0.000000e+00> : vector<2x10xf32>
    %360 = tpu.matmul %358, %359, %cst_102 {dimension_numbers = #tpu.dot_dimension_numbers<[1], [0], [0], [1], [0, 0, 1, 1], [], []>} : vector<2x1024xf32>, vector<1024x10xf32>, vector<2x10xf32> -> vector<2x10xf32>
    %c0_103 = arith.constant 0 : index
    %c0_104 = arith.constant 0 : index
    %361 = vector.load %arg8[%c0_103, %c0_104] : memref<1x10xf32, #tpu.memory_space<vmem>>, vector<1x10xf32>
    %362 = vector.broadcast %361 : vector<1x10xf32> to vector<2x10xf32>
    %363 = arith.addf %360, %362 : vector<2x10xf32>
    %cst_105 = arith.constant 0.000000e+00 : f32
    %364 = vector.broadcast %cst_105 : f32 to vector<2x10xf32>
    %365 = arith.maximumf %363, %364 : vector<2x10xf32>
    %c0_106 = arith.constant 0 : index
    %c0_107 = arith.constant 0 : index
    %366 = vector.load %arg9[%c0_106, %c0_107] : memref<10x4xf32, #tpu.memory_space<vmem>>, vector<10x4xf32>
    %cst_108 = arith.constant dense<0.000000e+00> : vector<2x4xf32>
    %367 = tpu.matmul %365, %366, %cst_108 {dimension_numbers = #tpu.dot_dimension_numbers<[1], [0], [0], [1], [0, 0, 1, 1], [], []>} : vector<2x10xf32>, vector<10x4xf32>, vector<2x4xf32> -> vector<2x4xf32>
    %c0_109 = arith.constant 0 : index
    %c0_110 = arith.constant 0 : index
    %368 = vector.load %arg10[%c0_109, %c0_110] : memref<1x4xf32, #tpu.memory_space<vmem>>, vector<1x4xf32>
    %369 = vector.broadcast %368 : vector<1x4xf32> to vector<2x4xf32>
    %370 = arith.addf %367, %369 : vector<2x4xf32>
    %c0_111 = arith.constant 0 : index
    %c0_112 = arith.constant 0 : index
    %371 = vector.load %arg11[%c0_111, %c0_112] : memref<2x4xf32, #tpu.memory_space<vmem>>, vector<2x4xf32>
    tpu.vector_store %arg11[%c0_111, %c0_112], %370 {strides = array<i32>} : memref<2x4xf32, #tpu.memory_space<vmem>>, vector<2x4xf32>,
    return
  }
  func.func @transform_0(%arg0: i32) -> (i32, i32, i32) {
    %c0_i32 = arith.constant 0 : i32
    %c0_i32_0 = arith.constant 0 : i32
    %c0_i32_1 = arith.constant 0 : i32
    return %arg0, %c0_i32, %c0_i32_0 : i32, i32, i32
  }
  func.func @transform_1(%arg0: i32) -> (i32, i32) {
    %c0_i32 = arith.constant 0 : i32
    %c0_i32_0 = arith.constant 0 : i32
    return %arg0, %c0_i32 : i32, i32
  }
  func.func @transform_2(%arg0: i32) -> (i32, i32) {
    %c0_i32 = arith.constant 0 : i32
    %c0_i32_0 = arith.constant 0 : i32
    return %arg0, %c0_i32 : i32, i32
  }
  func.func @transform_3(%arg0: i32) -> (i32, i32) {
    %c0_i32 = arith.constant 0 : i32
    %c0_i32_0 = arith.constant 0 : i32
    %c0_i32_1 = arith.constant 0 : i32
    return %c0_i32, %c0_i32_0 : i32, i32
  }
  func.func @transform_4(%arg0: i32) -> (i32, i32) {
    %c0_i32 = arith.constant 0 : i32
    %c0_i32_0 = arith.constant 0 : i32
    %c0_i32_1 = arith.constant 0 : i32
    return %c0_i32, %c0_i32_0 : i32, i32
  }
  func.func @transform_5(%arg0: i32) -> (i32, i32) {
    %c0_i32 = arith.constant 0 : i32
    %c0_i32_0 = arith.constant 0 : i32
    %c0_i32_1 = arith.constant 0 : i32
    return %c0_i32, %c0_i32_0 : i32, i32
  }
  func.func @transform_6(%arg0: i32) -> (i32, i32) {
    %c0_i32 = arith.constant 0 : i32
    %c0_i32_0 = arith.constant 0 : i32
    %c0_i32_1 = arith.constant 0 : i32
    return %c0_i32, %c0_i32_0 : i32, i32
  }
  func.func @transform_7(%arg0: i32) -> (i32, i32) {
    %c0_i32 = arith.constant 0 : i32
    %c0_i32_0 = arith.constant 0 : i32
    %c0_i32_1 = arith.constant 0 : i32
    return %c0_i32, %c0_i32_0 : i32, i32
  }
  func.func @transform_8(%arg0: i32) -> (i32, i32) {
    %c0_i32 = arith.constant 0 : i32
    %c0_i32_0 = arith.constant 0 : i32
    %c0_i32_1 = arith.constant 0 : i32
    return %c0_i32, %c0_i32_0 : i32, i32
  }
  func.func @transform_9(%arg0: i32) -> (i32, i32) {
    %c0_i32 = arith.constant 0 : i32
    %c0_i32_0 = arith.constant 0 : i32
    %c0_i32_1 = arith.constant 0 : i32
    return %c0_i32, %c0_i32_0 : i32, i32
  }
  func.func @transform_10(%arg0: i32) -> (i32, i32) {
    %c0_i32 = arith.constant 0 : i32
    %c0_i32_0 = arith.constant 0 : i32
    return %arg0, %c0_i32 : i32, i32
  }
}

</mosaic_0001>

<bundles_post_ra>
// kernel: point_model_forward.1
= control target key start
LH: loop header
LB: loop body
LE: loop exit
PB: predicated region body
PF: predicated region fallthrough
CT: control target
= control target key end

     0   :  { %v4307_v4 = vmov 0.0   ;;  %v4308_v6 = vmov 1   ;;  %v4309_v8 = vmov 0   ;;  %s5702_s0 = inlined_call_operand.vmem [shape: f32[2,16,2], index: 0, kind: input, shape index: {}]   ;;  %s5703_s1 = inlined_call_operand.vmem [shape: f32[2,64], index: 1, kind: input, shape index: {}]   ;;  %s5704_s2 = inlined_call_operand.vmem [shape: f32[2,64], index: 2, kind: input, shape index: {}]   ;;  %s5705_s3 = inlined_call_operand.vmem [shape: f32[2,256], index: 3, kind: input, shape index: {}]   ;;  %s5706_s4 = inlined_call_operand.vmem [shape: f32[64,256], index: 4, kind: input, shape index: {}]   ;;  %s5707_s5 = inlined_call_operand.vmem [shape: f32[1,256], index: 5, kind: input, shape index: {}]   ;;  %s5708_s6 = inlined_call_operand.vmem [shape: f32[1024,10], index: 6, kind: input, shape index: {}]   ;;  %s5709_s7 = inlined_call_operand.vmem [shape: f32[1,10], index: 7, kind: input, shape index: {}]   ;;  %s5710_s8 = inlined_call_operand.vmem [shape: f32[10,4], index: 8, kind: input, shape index: {}]   ;;  %s5711_s9 = inlined_call_operand.vmem [shape: f32[1,4], index: 9, kind: input, shape index: {}]   ;;  %s5712_s10 = inlined_call_operand.hbm [shape: f32[2,4], index: 10, kind: output, shape index: {}]  }
   0x1   :  { %v4374_v0 = vld [vmem:[%s5706_s4 + $0x78] sm:$0xff]  ;;  %v4379_v1 = vld [vmem:[%s5706_s4 + $0x70] sm:$0xff]  ;;  %v4384_v2 = vld [vmem:[%s5706_s4 + $0x68] sm:$0xff]  ;;  %242 = vmatprep.mubr.f32.mxu0 %v4307_v4  ;;  %3992 = vset.pattern.permute.xlu1 %v4308_v6 }
   0x2   :  { %194 = vmatprep.subr.mxu0 %v4374_v0  ;;  %v4390_v3 = vld [vmem:[%s5706_s4 + $0x60] sm:$0xff]  ;;  %v4397_v5 = vld [vmem:[%s5706_s4 + $0x58] sm:$0xff]  ;;  %v4404_v7 = vld [vmem:[%s5706_s4 + $0x50] sm:$0xff]  ;;  %3991 = vset.pattern.permute.xlu0 %v4309_v8 }
   0x3   :  { %195 = vmatpush1.msra.mxu0 %v4379_v1  ;;  %v4410_v9 = vld [vmem:[%s5706_s4 + $0x48] sm:$0xff]  ;;  %412 = vmatprep.subr.mxu1 %v4374_v0  ;;  %v4417_v10 = vld [vmem:[%s5706_s4 + $0x40] sm:$0xff]  ;;  %v4427_v12 = vld [vmem:[%s5706_s4 + $0x38] sm:$0xff] }
   0x4   :  { %196 = vmatprep.subr.mxu0 %v4384_v2  ;;  %v36_v11 = vld [vmem:[%s5702_s0] sm:$0xff]  ;;  %413 = vmatpush1.msra.mxu1 %v4379_v1  ;;  %v4433_v13 = vld [vmem:[%s5706_s4 + $0x30] sm:$0xff] }
   0x5   :  { %197 = vmatpush1.msra.mxu0 %v4390_v3  ;;  %83 = vperm.xlu1 %3992, %v36_v11   ;;  %v38_v14 = vld [vmem:[%s5702_s0 + $0x10] sm:$0xff] }
   0x6   :  { %198 = vmatprep.subr.mxu0 %v4397_v5  ;;  %43 = vperm.xlu0 %3991, %v36_v11  }
   0x7   :  { %199 = vmatpush1.msra.mxu0 %v4404_v7 }
   0x8   :  { %200 = vmatprep.subr.mxu0 %v4410_v9 }
   0x9   :  { %15 = vsyncpa [#allocation5], 0  ;;  %201 = vmatpush1.msra.mxu0 %v4417_v10  ;;  %v4442_v15 = vld [vmem:[%s5706_s4 + $0x28] sm:$0xff]  ;;  %v4448_v16 = vld [vmem:[%s5706_s4 + $0x20] sm:$0xff]  ;;  %414 = vmatprep.subr.mxu1 %v4384_v2  ;;  %vm174_vm0 = vcmask 523264   ;;  %v62_v22 = vlaneseq  ;;  %s4311_s16 = smov 64  }
   0xa   :  { %202 = vmatprep.subr.mxu0 %v4427_v12  ;;  %v4455_v17 = vld [vmem:[%s5706_s4 + $0x18] sm:$0xff]  ;;  %91 = vperm.xlu1 %3992, %v38_v14   ;;  %v4461_v18 = vld [vmem:[%s5706_s4 + $0x10] sm:$0xff]  ;;  %v4467_v19 = vld [vmem:[%s5706_s4 + $0x8] sm:$0xff]  ;;  %v4310_v55 = vmov 1966171168   ;;  %vm374_vm1 = vcmask 517120  }
   0xb   :  { %203 = vmatpush1.msra.mxu0 %v4433_v13  ;;  %53 = vperm.xlu0 %3991, %v38_v14   ;;  %v4474_v20 = vld [vmem:[%s5706_s4] sm:$0xff]  ;;  %v4515_v23 = vshrl.u32 %v62_v22, 7  ;;  %v253_v56 = vunpack.c.l.s4 %v4310_v55  ;;  %vm565_vm2 = vcmask 1041920   ;;  %vm3688_vm3 = vcmask 1041408  }
   0xc   :  { %204 = vmatprep.subr.mxu0 %v4442_v15  ;;  %415 = vmatpush1.msra.mxu1 %v4390_v3  ;;  %v169_v21 = vld [vmem:[%s5703_s1] sm:$0x3]  ;;  %vm4314_vm4 = vmmov 0   ;;  %vm3684_vm5 = vcmask 80896   ;;  %vm3762_vm6 = vcmask 25600  }
   0xd   :  { %205 = vmatpush1.msra.mxu0 %v4448_v16  ;;  %416 = vmatprep.subr.mxu1 %v4397_v5  ;;  %v64_v24 = vsub.s32 0, %v4515_v23  ;;  %v68_v25 = vsub.s32 1, %v4515_v23  ;;  %v3778_v26 = vld [vmem:[%s5705_s3 + $0x1] ss:$2 sm:$0x3]  ;;  %v254_v57 = vunpack.c.0.s8 %v253_v56 }
   0xe   :  { %206 = vmatprep.subr.mxu0 %v4455_v17  ;;  %417 = vmatpush1.msra.mxu1 %v4404_v7  ;;  %v40_v27 = vld [vmem:[%s5705_s3] ss:$2 sm:$0x3] }
   0xf   :  { %207 = vmatpush1.msra.mxu0 %v4461_v18  ;;  %418 = vmatprep.subr.mxu1 %v4410_v9  ;;  %v4525_v28 = vrot.slane %v3778_v26, %v64_v24  ;;  %v4527_v29 = vrot.slane %v3778_v26, %v68_v25  ;;  %v4529_v30 = vrot.slane %v40_v27, %v64_v24  ;;  %v125_v32 = vld [vmem:[%s5707_s5] sm:$0x3] }
  0x10   :  { %208 = vmatprep.subr.mxu0 %v4467_v19  ;;  %419 = vmatpush1.msra.mxu1 %v4417_v10  ;;  %v4531_v31 = vrot.slane %v40_v27, %v68_v25  ;;  %v4538_v37 = vrot.slane %v125_v32, %v64_v24  ;;  %v4540_v38 = vrot.slane %v125_v32, %v68_v25  ;;  %v3782_v63 = vld.sshfl [vmem:[%s5704_s2] sm:$0x11 pattern:$0x75316420] }
  0x11   :  { %209 = vmatpush1.msra.mxu0 %v4474_v20  ;;  %420 = vmatprep.subr.mxu1 %v4427_v12  ;;  %v4553_v59 = vsub.s32 %v254_v57, %v4515_v23  ;;  %v310_v24 = vcombine.high %v3782_v63, %v3782_v63 }
  0x12   :  { %3779 = vmatmul.mubr.msk.f32.vlgmr.msra.gmra.mxu0 %vm174_vm0, %v169_v21  ;;  %421 = vmatpush1.msra.mxu1 %v4433_v13 }
  0x13   :  { %460 = vmatprep.mubr.f32.mxu1 %v4307_v4  ;;  %422 = vmatprep.subr.mxu1 %v4442_v15  ;;  %v317_v27 = vrot.slane %v3782_v63, %v4553_v59  ;;  %v324_v32 = vrot.slane %v310_v24, %v4553_v59 }
  0x14   :  { %603 = vmatprep.subr.mxu0 %v4374_v0  ;;  %423 = vmatpush1.msra.mxu1 %v4448_v16 }
  0x15   :  { %604 = vmatpush1.msra.mxu0 %v4379_v1  ;;  %424 = vmatprep.subr.mxu1 %v4455_v17 }
  0x16   :  { %605 = vmatprep.subr.mxu0 %v4384_v2  ;;  %425 = vmatpush1.msra.mxu1 %v4461_v18 }
  0x17   :  { %606 = vmatpush1.msra.mxu0 %v4390_v3  ;;  %426 = vmatprep.subr.mxu1 %v4467_v19 }
  0x18   :  { %607 = vmatprep.subr.mxu0 %v4397_v5  ;;  %427 = vmatpush1.msra.mxu1 %v4474_v20 }
  0x19   :  { %608 = vmatpush1.msra.mxu0 %v4404_v7  ;;  %651 = vmatprep.mubr.f32.mxu0 %v4307_v4 }
  0x1a   :  { %609 = vmatprep.subr.mxu0 %v4410_v9  ;;  %791 = vmatprep.subr.mxu1 %v4374_v0 }
  0x1b   :  { %610 = vmatpush1.msra.mxu0 %v4417_v10  ;;  %3993 = vset.pattern.permute.xlu1 %v4309_v8 }
  0x1c   :  { %611 = vmatprep.subr.mxu0 %v4427_v12 }
  0x1d   :  { %612 = vmatpush1.msra.mxu0 %v4433_v13 }
  0x1e   :  { %613 = vmatprep.subr.mxu0 %v4442_v15 }
  0x1f   :  { %614 = vmatpush1.msra.mxu0 %v4448_v16 }
  0x20   :  { %615 = vmatprep.subr.mxu0 %v4455_v17 }
  0x21   :  { %616 = vmatpush1.msra.mxu0 %v4461_v18 }
  0x22   :  { %617 = vmatprep.subr.mxu0 %v4467_v19 }
  0x23   :  { %618 = vmatpush1.msra.mxu0 %v4474_v20 }
  0x24   :  { %981 = vmatprep.subr.mxu0 %v4374_v0 }
  0x80   :  { %v84_v33 = vpop.permute.xlu1 %83 }
  0x81   :  { %v109_v34 = vmul.f32 %v4525_v28, %v84_v33  ;;  %v110_v35 = vmul.f32 %v4527_v29, %v84_v33  ;;  %v44_v36 = vpop.permute.xlu0 %43 }
  0x82   :  { %v72_v39 = vmul.f32 %v4529_v30, %v44_v36  ;;  %v73_v40 = vmul.f32 %v4531_v31, %v44_v36 }
  0x84   :  { %v117_v41 = vadd.f32 %v109_v34, %v72_v39  ;;  %v118_v42 = vadd.f32 %v110_v35, %v73_v40 }
  0x85   :  { %v92_v43 = vpop.permute.xlu1 %91 }
  0x86   :  { %v113_v44 = vmul.f32 %v4525_v28, %v92_v43  ;;  %v114_v45 = vmul.f32 %v4527_v29, %v92_v43  ;;  %v54_v46 = vpop.permute.xlu0 %53  ;;  %v137_v47 = vadd.f32 %v4538_v37, %v117_v41  ;;  %v138_v48 = vadd.f32 %v4540_v38, %v118_v42 }
  0x87   :  { %v76_v49 = vmul.f32 %v4529_v30, %v54_v46  ;;  %v77_v50 = vmul.f32 %v4531_v31, %v54_v46 }
  0x88   :  { %145 = vst [vmem:[#allocation2] sm:$0xff] %v137_v47  ;;  %146 = vst [vmem:[#allocation2 + $0x8] sm:$0xff] %v138_v48 }
  0x89   :  { %v121_v51 = vadd.f32 %v113_v44, %v76_v49  ;;  %v122_v52 = vadd.f32 %v114_v45, %v77_v50 }
  0x8b   :  { %v141_v53 = vadd.f32 %v4538_v37, %v121_v51  ;;  %v142_v54 = vadd.f32 %v4540_v38, %v122_v52 }
  0x8d   :  { %149 = vst [vmem:[#allocation2 + $0x20] sm:$0xff] %v141_v53  ;;  %150 = vst [vmem:[#allocation2 + $0x28] sm:$0xff] %v142_v54 }
  0x8f   :  { %v171_v14 = vld [vmem:[#allocation2] ss:$8 sm:$0x3] }
  0x94   :  { %v173_v25 = vld [vmem:[#allocation2 + $0x20] ss:$8 sm:$0x3] }
  0xd2   :  { %v244_v58 = vpop.f32.mrf.mxu0 }
  0xd4   :  { %v246_v60 = vpop.f32.mrf.mxu0 }
  0xd5   :  { %v251_v61 = vcombine.low %v244_v58, %v246_v60 }
  0xd7   :  { %v258_v62 = vrot.slane %v251_v61, %v4553_v59 }
  0xd9   :  { %v259_v8 = vcombine.high %v258_v62, %v258_v62  ;;  %v266_v11 = vrot.slane %v258_v62, %v4553_v59  ;;  %v4312_v62 = vmov 1935823168  }
  0xda   :  { %v367_v63 = vunpack.c.l.s4 %v4312_v62 }
  0xdb   :  { %v276_v21 = vadd.f32 %v266_v11, %v171_v14  ;;  %v273_v22 = vrot.slane %v259_v8, %v4553_v59 }
  0xdc   :  { %v368_v8 = vunpack.c.0.s8 %v367_v63 }
  0xdd   :  { %292 = vrot.lane.b32.xlu0 %v276_v21, %s4311_s16  ;;  %v277_v26 = vadd.f32 %v273_v22, %v173_v25  ;;  %v3780_v33 = vmul.f32 -1.442695, %v276_v21 }
  0xde   :  { %v4578_v24 = vsub.s32 %v368_v8, %v4515_v23 }
  0xdf   :  { %294 = vrot.lane.b32.xlu1 %v277_v26, %s4311_s16  ;;  %v3781_v34 = vmul.f32 -1.442695, %v277_v26  ;;  %3998 = vpow2.f32 %v3780_v33 }
  0xe1   :  { %325 = vrot.lane.b32.xlu0 %v317_v27, %s4311_s16  ;;  %4000 = vpow2.f32 %v3781_v34 }
  0xe3   :  { %327 = vrot.lane.b32.xlu1 %v324_v32, %s4311_s16 }
  0xec   :  { %v3999_v35 = vpop.eup %3998 }
  0xed   :  { %v284_v39 = vadd.f32 1.0, %v3999_v35 }
  0xee   :  { %v4001_v36 = vpop.eup %4000 }
  0xef   :  { %v285_v40 = vadd.f32 1.0, %v4001_v36  ;;  %4002 = vrcp.f32 %v284_v39 }
  0xfc   :  { %v4003_v45 = vpop.eup %4002 }
  0xfd   :  { %v349_v14 = vrot.slane %v4003_v45, 1 }
 0x14f   :  { %v293_v41 = vpop.permute.xlu0 %292 }
 0x150   :  { %v296_v42 = vrot.slane %v293_v41, 1 }
 0x151   :  { %v295_v43 = vpop.permute.xlu1 %294 }
 0x152   :  { %4004 = vtanh.f32 %v296_v42  ;;  %v297_v44 = vrot.slane %v295_v43, 1  ;;  %v377_v43 = vld [vmem:[#allocation2 + $0x1] ss:$8 sm:$0x3] }
 0x153   :  { %4006 = vrcp.f32 %v285_v40  ;;  %v326_v51 = vpop.permute.xlu0 %325 }
 0x154   :  { %4008 = vtanh.f32 %v297_v44  ;;  %v331_v53 = vmul.f32 %v4003_v45, %v326_v51 }
 0x155   :  { %v328_v52 = vpop.permute.xlu1 %327 }
 0x15f   :  { %v4005_v46 = vpop.eup %4004 }
 0x160   :  { %v4007_v47 = vpop.eup %4006  ;;  %v333_v48 = vmul.f32 %v4005_v46, %v4003_v45  ;;  %v379_v46 = vld [vmem:[#allocation2 + $0x21] ss:$8 sm:$0x3] }
 0x161   :  { %v4009_v49 = vpop.eup %4008  ;;  %v332_v55 = vmul.f32 %v4007_v47, %v328_v52  ;;  %v350_v21 = vrot.slane %v4007_v47, 1 }
 0x162   :  { %337 = vrot.lane.b32.xlu0 %v333_v48, %s4311_s16  ;;  %v334_v50 = vmul.f32 %v4009_v49, %v4007_v47 }
 0x164   :  { %339 = vrot.lane.b32.xlu1 %v334_v50, %s4311_s16 }
 0x1d4   :  { %v338_v54 = vpop.permute.xlu0 %337 }
 0x1d5   :  { %v4569_v56 = vadd.f32 %v338_v54, %v331_v53 }
 0x1d6   :  { %v340_v57 = vpop.permute.xlu1 %339 }
 0x1d7   :  { %4010 = vtanh.f32 %v4569_v56  ;;  %v4572_v58 = vadd.f32 %v340_v57, %v332_v55 }
 0x1d9   :  { %4012 = vtanh.f32 %v4572_v58 }
 0x1e4   :  { %v4011_v60 = vpop.eup %4010 }
 0x1e5   :  { %355 = vrot.lane.b32.xlu0 %v4011_v60, %s4311_s16 }
 0x1e6   :  { %v4013_v61 = vpop.eup %4012 }
 0x1e7   :  { %357 = vrot.lane.b32.xlu1 %v4013_v61, %s4311_s16 }
 0x257   :  { %v356_v11 = vpop.permute.xlu0 %355 }
 0x258   :  { %v361_v25 = vmul.f32 %v356_v11, %v349_v14 }
 0x259   :  { %v358_v22 = vpop.permute.xlu1 %357 }
 0x25a   :  { %v362_v26 = vmul.f32 %v358_v22, %v350_v21 }
 0x25c   :  { %v365_v27 = vcombine.low %v361_v25, %v362_v26 }
 0x25e   :  { %v372_v32 = vrot.slane %v365_v27, %v4578_v24  ;;  %v386_v33 = vrot.slane %v365_v27, %v4553_v59 }
 0x260   :  { %v393_v34 = vrot.slane %v386_v33, %v4553_v59  ;;  %375 = vst.msk [vmem:[#allocation3] sm:$0x3] %vm374_vm1, %v372_v32 }
 0x262   :  { %3783 = vmatmul.mubr.msk.f32.vlgmr.msra.gmra.mxu1 %vm174_vm0, %v393_v34 }
 0x263   :  { %792 = vmatpush1.msra.mxu1 %v4379_v1  ;;  %839 = vmatprep.mubr.f32.mxu1 %v4307_v4 }
 0x264   :  { %793 = vmatprep.subr.mxu1 %v4384_v2 }
 0x265   :  { %794 = vmatpush1.msra.mxu1 %v4390_v3 }
 0x266   :  { %795 = vmatprep.subr.mxu1 %v4397_v5 }
 0x267   :  { %796 = vmatpush1.msra.mxu1 %v4404_v7 }
 0x268   :  { %797 = vmatprep.subr.mxu1 %v4410_v9 }
 0x269   :  { %798 = vmatpush1.msra.mxu1 %v4417_v10 }
 0x26a   :  { %799 = vmatprep.subr.mxu1 %v4427_v12 }
 0x26b   :  { %800 = vmatpush1.msra.mxu1 %v4433_v13 }
 0x26c   :  { %801 = vmatprep.subr.mxu1 %v4442_v15 }
 0x26d   :  { %802 = vmatpush1.msra.mxu1 %v4448_v16 }
 0x26e   :  { %803 = vmatprep.subr.mxu1 %v4455_v17 }
 0x26f   :  { %804 = vmatpush1.msra.mxu1 %v4461_v18 }
 0x270   :  { %805 = vmatprep.subr.mxu1 %v4467_v19 }
 0x271   :  { %806 = vmatpush1.msra.mxu1 %v4474_v20 }
 0x272   :  { %1169 = vmatprep.subr.mxu1 %v4374_v0 }
 0x322   :  { %v462_v35 = vpop.f32.mrf.mxu1 }
 0x324   :  { %v464_v36 = vpop.f32.mrf.mxu1 }
 0x325   :  { %v469_v39 = vcombine.low %v462_v35, %v464_v36 }
 0x327   :  { %v476_v40 = vrot.slane %v469_v39, %v4553_v59 }
 0x329   :  { %v477_v41 = vcombine.high %v476_v40, %v476_v40  ;;  %v484_v42 = vrot.slane %v476_v40, %v4553_v59 }
 0x32b   :  { %v494_v44 = vadd.f32 %v484_v42, %v377_v43  ;;  %v491_v45 = vrot.slane %v477_v41, %v4553_v59 }
 0x32d   :  { %510 = vrot.lane.b32.xlu0 %v494_v44, %s4311_s16  ;;  %v495_v47 = vadd.f32 %v491_v45, %v379_v46  ;;  %v3784_v48 = vmul.f32 -1.442695, %v494_v44 }
 0x32f   :  { %512 = vrot.lane.b32.xlu1 %v495_v47, %s4311_s16  ;;  %v3785_v49 = vmul.f32 -1.442695, %v495_v47  ;;  %4014 = vpow2.f32 %v3784_v48 }
 0x331   :  { %4016 = vpow2.f32 %v3785_v49 }
 0x33c   :  { %v4015_v50 = vpop.eup %4014 }
 0x33d   :  { %v502_v52 = vadd.f32 1.0, %v4015_v50  ;;  %v568_v50 = vld [vmem:[#allocation2 + $0x2] ss:$8 sm:$0x3] }
 0x33e   :  { %v4017_v51 = vpop.eup %4016 }
 0x33f   :  { %v503_v53 = vadd.f32 1.0, %v4017_v51  ;;  %4018 = vrcp.f32 %v502_v52 }
 0x34c   :  { %v4019_v61 = vpop.eup %4018 }
 0x34d   :  { %v520_v21 = vmul.f32 %v4019_v61, %v4569_v56  ;;  %v538_v56 = vrot.slane %v4019_v61, 1 }
 0x39f   :  { %v511_v54 = vpop.permute.xlu0 %510 }
 0x3a0   :  { %v514_v55 = vrot.slane %v511_v54, 1 }
 0x3a1   :  { %v513_v57 = vpop.permute.xlu1 %512 }
 0x3a2   :  { %4020 = vtanh.f32 %v514_v55  ;;  %v515_v60 = vrot.slane %v513_v57, 1 }
 0x3a3   :  { %4022 = vrcp.f32 %v503_v53  ;;  %v570_v53 = vld [vmem:[#allocation2 + $0x22] ss:$8 sm:$0x3] }
 0x3a4   :  { %4024 = vtanh.f32 %v515_v60 }
 0x3af   :  { %v4021_v62 = vpop.eup %4020 }
 0x3b0   :  { %v4023_v63 = vpop.eup %4022  ;;  %v522_v8 = vmul.f32 %v4021_v62, %v4019_v61 }
 0x3b1   :  { %v4025_v11 = vpop.eup %4024  ;;  %v521_v26 = vmul.f32 %v4023_v63, %v4572_v58  ;;  %v539_v36 = vrot.slane %v4023_v63, 1 }
 0x3b2   :  { %526 = vrot.lane.b32.xlu0 %v522_v8, %s4311_s16  ;;  %v523_v14 = vmul.f32 %v4025_v11, %v4023_v63 }
 0x3b4   :  { %528 = vrot.lane.b32.xlu1 %v523_v14, %s4311_s16 }
 0x424   :  { %v527_v22 = vpop.permute.xlu0 %526 }
 0x425   :  { %v4610_v25 = vadd.f32 %v527_v22, %v520_v21 }
 0x426   :  { %v529_v27 = vpop.permute.xlu1 %528 }
 0x427   :  { %4026 = vtanh.f32 %v4610_v25  ;;  %v4614_v32 = vadd.f32 %v529_v27, %v521_v26 }
 0x429   :  { %4028 = vtanh.f32 %v4614_v32 }
 0x434   :  { %v4027_v33 = vpop.eup %4026 }
 0x435   :  { %544 = vrot.lane.b32.xlu0 %v4027_v33, %s4311_s16 }
 0x436   :  { %v4029_v34 = vpop.eup %4028 }
 0x437   :  { %546 = vrot.lane.b32.xlu1 %v4029_v34, %s4311_s16 }
 0x4a7   :  { %v545_v35 = vpop.permute.xlu0 %544 }
 0x4a8   :  { %v550_v40 = vmul.f32 %v545_v35, %v538_v56 }
 0x4a9   :  { %v547_v39 = vpop.permute.xlu1 %546 }
 0x4aa   :  { %v551_v41 = vmul.f32 %v547_v39, %v539_v36 }
 0x4ac   :  { %v4619_v58 = vcombine.low %v550_v40, %v551_v41 }
 0x4ae   :  { %v577_v42 = vrot.slane %v4619_v58, %v4553_v59 }
 0x4b0   :  { %v584_v43 = vrot.slane %v577_v42, %v4553_v59 }
 0x4b2   :  { %3786 = vmatmul.mubr.msk.f32.vlgmr.msra.gmra.mxu0 %vm174_vm0, %v584_v43 }
 0x4b3   :  { %982 = vmatpush1.msra.mxu0 %v4379_v1  ;;  %1029 = vmatprep.mubr.f32.mxu0 %v4307_v4 }
 0x4b4   :  { %983 = vmatprep.subr.mxu0 %v4384_v2 }
 0x4b5   :  { %984 = vmatpush1.msra.mxu0 %v4390_v3 }
 0x4b6   :  { %985 = vmatprep.subr.mxu0 %v4397_v5 }
 0x4b7   :  { %986 = vmatpush1.msra.mxu0 %v4404_v7 }
 0x4b8   :  { %987 = vmatprep.subr.mxu0 %v4410_v9 }
 0x4b9   :  { %988 = vmatpush1.msra.mxu0 %v4417_v10 }
 0x4ba   :  { %989 = vmatprep.subr.mxu0 %v4427_v12 }
 0x4bb   :  { %990 = vmatpush1.msra.mxu0 %v4433_v13 }
 0x4bc   :  { %991 = vmatprep.subr.mxu0 %v4442_v15 }
 0x4bd   :  { %992 = vmatpush1.msra.mxu0 %v4448_v16 }
 0x4be   :  { %993 = vmatprep.subr.mxu0 %v4455_v17 }
 0x4bf   :  { %994 = vmatpush1.msra.mxu0 %v4461_v18 }
 0x4c0   :  { %995 = vmatprep.subr.mxu0 %v4467_v19 }
 0x4c1   :  { %996 = vmatpush1.msra.mxu0 %v4474_v20 }
 0x4c2   :  { %1359 = vmatprep.subr.mxu0 %v4374_v0 }
 0x572   :  { %v653_v44 = vpop.f32.mrf.mxu0 }
 0x574   :  { %v655_v45 = vpop.f32.mrf.mxu0 }
 0x575   :  { %v660_v46 = vcombine.low %v653_v44, %v655_v45 }
 0x577   :  { %v667_v47 = vrot.slane %v660_v46, %v4553_v59 }
 0x579   :  { %v668_v48 = vcombine.high %v667_v47, %v667_v47  ;;  %v675_v49 = vrot.slane %v667_v47, %v4553_v59 }
 0x57b   :  { %v685_v51 = vadd.f32 %v675_v49, %v568_v50  ;;  %v682_v52 = vrot.slane %v668_v48, %v4553_v59 }
 0x57d   :  { %701 = vrot.lane.b32.xlu0 %v685_v51, %s4311_s16  ;;  %v686_v54 = vadd.f32 %v682_v52, %v570_v53  ;;  %v3787_v55 = vmul.f32 -1.442695, %v685_v51 }
 0x57f   :  { %703 = vrot.lane.b32.xlu1 %v686_v54, %s4311_s16  ;;  %v3788_v57 = vmul.f32 -1.442695, %v686_v54  ;;  %4030 = vpow2.f32 %v3787_v55 }
 0x581   :  { %4032 = vpow2.f32 %v3788_v57 }
 0x58c   :  { %v4031_v60 = vpop.eup %4030 }
 0x58d   :  { %v693_v62 = vadd.f32 1.0, %v4031_v60 }
 0x58e   :  { %v4033_v61 = vpop.eup %4032 }
 0x58f   :  { %v694_v63 = vadd.f32 1.0, %v4033_v61  ;;  %4034 = vrcp.f32 %v693_v62  ;;  %v756_v62 = vld [vmem:[#allocation2 + $0x3] ss:$8 sm:$0x3] }
 0x59c   :  { %v4035_v22 = vpop.eup %4034 }
 0x59d   :  { %v711_v56 = vmul.f32 %v4035_v22, %v4610_v25  ;;  %v729_v25 = vrot.slane %v4035_v22, 1 }
 0x5ef   :  { %v702_v8 = vpop.permute.xlu0 %701 }
 0x5f0   :  { %v705_v11 = vrot.slane %v702_v8, 1 }
 0x5f1   :  { %v704_v14 = vpop.permute.xlu1 %703 }
 0x5f2   :  { %4036 = vtanh.f32 %v705_v11  ;;  %v706_v21 = vrot.slane %v704_v14, 1  ;;  %v758_v11 = vld [vmem:[#allocation2 + $0x23] ss:$8 sm:$0x3] }
 0x5f3   :  { %4038 = vrcp.f32 %v694_v63 }
 0x5f4   :  { %4040 = vtanh.f32 %v706_v21 }
 0x5ff   :  { %v4037_v26 = vpop.eup %4036 }
 0x600   :  { %v4039_v27 = vpop.eup %4038  ;;  %v713_v33 = vmul.f32 %v4037_v26, %v4035_v22 }
 0x601   :  { %v4041_v34 = vpop.eup %4040  ;;  %v712_v40 = vmul.f32 %v4039_v27, %v4614_v32  ;;  %v730_v46 = vrot.slane %v4039_v27, 1 }
 0x602   :  { %717 = vrot.lane.b32.xlu0 %v713_v33, %s4311_s16  ;;  %v714_v35 = vmul.f32 %v4041_v34, %v4039_v27 }
 0x604   :  { %719 = vrot.lane.b32.xlu1 %v714_v35, %s4311_s16 }
 0x674   :  { %v718_v36 = vpop.permute.xlu0 %717 }
 0x675   :  { %v4650_v39 = vadd.f32 %v718_v36, %v711_v56 }
 0x676   :  { %v720_v41 = vpop.permute.xlu1 %719 }
 0x677   :  { %4042 = vtanh.f32 %v4650_v39  ;;  %v4654_v42 = vadd.f32 %v720_v41, %v712_v40 }
 0x679   :  { %4044 = vtanh.f32 %v4654_v42 }
 0x684   :  { %v4043_v43 = vpop.eup %4042 }
 0x685   :  { %735 = vrot.lane.b32.xlu0 %v4043_v43, %s4311_s16 }
 0x686   :  { %v4045_v44 = vpop.eup %4044 }
 0x687   :  { %737 = vrot.lane.b32.xlu1 %v4045_v44, %s4311_s16 }
 0x6f7   :  { %v736_v45 = vpop.permute.xlu0 %735 }
 0x6f8   :  { %v741_v48 = vmul.f32 %v736_v45, %v729_v25 }
 0x6f9   :  { %v738_v47 = vpop.permute.xlu1 %737 }
 0x6fa   :  { %v742_v49 = vmul.f32 %v738_v47, %v730_v46 }
 0x6fc   :  { %v745_v32 = vcombine.low %v741_v48, %v742_v49 }
 0x6fe   :  { %v752_v50 = vrot.slane %v745_v32, %v4578_v24  ;;  %v765_v51 = vrot.slane %v745_v32, %v4553_v59 }
 0x700   :  { %v772_v52 = vrot.slane %v765_v51, %v4553_v59  ;;  %754 = vst.msk [vmem:[#allocation3 + $0x2] sm:$0x3] %vm374_vm1, %v752_v50 }
 0x702   :  { %3789 = vmatmul.mubr.msk.f32.vlgmr.msra.gmra.mxu1 %vm174_vm0, %v772_v52 }
 0x703   :  { %1170 = vmatpush1.msra.mxu1 %v4379_v1  ;;  %1217 = vmatprep.mubr.f32.mxu1 %v4307_v4 }
 0x704   :  { %1171 = vmatprep.subr.mxu1 %v4384_v2 }
 0x705   :  { %1172 = vmatpush1.msra.mxu1 %v4390_v3 }
 0x706   :  { %1173 = vmatprep.subr.mxu1 %v4397_v5 }
 0x707   :  { %1174 = vmatpush1.msra.mxu1 %v4404_v7 }
 0x708   :  { %1175 = vmatprep.subr.mxu1 %v4410_v9 }
 0x709   :  { %1176 = vmatpush1.msra.mxu1 %v4417_v10 }
 0x70a   :  { %1177 = vmatprep.subr.mxu1 %v4427_v12 }
 0x70b   :  { %1178 = vmatpush1.msra.mxu1 %v4433_v13 }
 0x70c   :  { %1179 = vmatprep.subr.mxu1 %v4442_v15 }
 0x70d   :  { %1180 = vmatpush1.msra.mxu1 %v4448_v16 }
 0x70e   :  { %1181 = vmatprep.subr.mxu1 %v4455_v17 }
 0x70f   :  { %1182 = vmatpush1.msra.mxu1 %v4461_v18 }
 0x710   :  { %1183 = vmatprep.subr.mxu1 %v4467_v19 }
 0x711   :  { %1184 = vmatpush1.msra.mxu1 %v4474_v20 }
 0x712   :  { %1547 = vmatprep.subr.mxu1 %v4374_v0 }
 0x7c2   :  { %v841_v53 = vpop.f32.mrf.mxu1 }
 0x7c4   :  { %v843_v54 = vpop.f32.mrf.mxu1 }
 0x7c5   :  { %v848_v55 = vcombine.low %v841_v53, %v843_v54 }
 0x7c7   :  { %v855_v57 = vrot.slane %v848_v55, %v4553_v59 }
 0x7c9   :  { %v856_v60 = vcombine.high %v855_v57, %v855_v57  ;;  %v863_v61 = vrot.slane %v855_v57, %v4553_v59 }
 0x7cb   :  { %v873_v63 = vadd.f32 %v863_v61, %v756_v62  ;;  %v870_v8 = vrot.slane %v856_v60, %v4553_v59 }
 0x7cd   :  { %889 = vrot.lane.b32.xlu0 %v873_v63, %s4311_s16  ;;  %v874_v14 = vadd.f32 %v870_v8, %v758_v11  ;;  %v3790_v21 = vmul.f32 -1.442695, %v873_v63 }
 0x7cf   :  { %891 = vrot.lane.b32.xlu1 %v874_v14, %s4311_s16  ;;  %v3791_v22 = vmul.f32 -1.442695, %v874_v14  ;;  %4046 = vpow2.f32 %v3790_v21 }
 0x7d1   :  { %4048 = vpow2.f32 %v3791_v22 }
 0x7dc   :  { %v4047_v26 = vpop.eup %4046 }
 0x7dd   :  { %v881_v33 = vadd.f32 1.0, %v4047_v26 }
 0x7de   :  { %v4049_v27 = vpop.eup %4048 }
 0x7df   :  { %v882_v34 = vadd.f32 1.0, %v4049_v27  ;;  %4050 = vrcp.f32 %v881_v33  ;;  %v946_v27 = vld [vmem:[#allocation2 + $0x4] ss:$8 sm:$0x3] }
 0x7ec   :  { %v4051_v41 = vpop.eup %4050 }
 0x7ed   :  { %v899_v47 = vmul.f32 %v4051_v41, %v4650_v39  ;;  %v917_v39 = vrot.slane %v4051_v41, 1 }
 0x83f   :  { %v890_v35 = vpop.permute.xlu0 %889 }
 0x840   :  { %v893_v56 = vrot.slane %v890_v35, 1  ;;  %v948_v35 = vld [vmem:[#allocation2 + $0x24] ss:$8 sm:$0x3] }
 0x841   :  { %v892_v36 = vpop.permute.xlu1 %891 }
 0x842   :  { %4052 = vtanh.f32 %v893_v56  ;;  %v894_v40 = vrot.slane %v892_v36, 1 }
 0x843   :  { %4054 = vrcp.f32 %v882_v34 }
 0x844   :  { %4056 = vtanh.f32 %v894_v40 }
 0x84f   :  { %v4053_v43 = vpop.eup %4052 }
 0x850   :  { %v4055_v44 = vpop.eup %4054  ;;  %v901_v45 = vmul.f32 %v4053_v43, %v4051_v41 }
 0x851   :  { %v4057_v25 = vpop.eup %4056  ;;  %v900_v32 = vmul.f32 %v4055_v44, %v4654_v42  ;;  %v918_v55 = vrot.slane %v4055_v44, 1 }
 0x852   :  { %905 = vrot.lane.b32.xlu0 %v901_v45, %s4311_s16  ;;  %v902_v46 = vmul.f32 %v4057_v25, %v4055_v44 }
 0x854   :  { %907 = vrot.lane.b32.xlu1 %v902_v46, %s4311_s16 }
 0x8c4   :  { %v906_v48 = vpop.permute.xlu0 %905 }
 0x8c5   :  { %v4689_v49 = vadd.f32 %v906_v48, %v899_v47 }
 0x8c6   :  { %v908_v50 = vpop.permute.xlu1 %907 }
 0x8c7   :  { %4058 = vtanh.f32 %v4689_v49  ;;  %v4693_v51 = vadd.f32 %v908_v50, %v900_v32 }
 0x8c9   :  { %4060 = vtanh.f32 %v4693_v51 }
 0x8d4   :  { %v4059_v52 = vpop.eup %4058 }
 0x8d5   :  { %923 = vrot.lane.b32.xlu0 %v4059_v52, %s4311_s16 }
 0x8d6   :  { %v4061_v53 = vpop.eup %4060 }
 0x8d7   :  { %925 = vrot.lane.b32.xlu1 %v4061_v53, %s4311_s16 }
 0x947   :  { %v924_v54 = vpop.permute.xlu0 %923 }
 0x948   :  { %v929_v60 = vmul.f32 %v924_v54, %v917_v39 }
 0x949   :  { %v926_v57 = vpop.permute.xlu1 %925 }
 0x94a   :  { %v930_v61 = vmul.f32 %v926_v57, %v918_v55 }
 0x94c   :  { %v4698_v42 = vcombine.low %v929_v60, %v930_v61 }
 0x94e   :  { %v955_v62 = vrot.slane %v4698_v42, %v4553_v59 }
 0x950   :  { %v962_v63 = vrot.slane %v955_v62, %v4553_v59 }
 0x952   :  { %3792 = vmatmul.mubr.msk.f32.vlgmr.msra.gmra.mxu0 %vm174_vm0, %v962_v63 }
 0x953   :  { %1360 = vmatpush1.msra.mxu0 %v4379_v1  ;;  %1407 = vmatprep.mubr.f32.mxu0 %v4307_v4 }
 0x954   :  { %1361 = vmatprep.subr.mxu0 %v4384_v2 }
 0x955   :  { %1362 = vmatpush1.msra.mxu0 %v4390_v3 }
 0x956   :  { %1363 = vmatprep.subr.mxu0 %v4397_v5 }
 0x957   :  { %1364 = vmatpush1.msra.mxu0 %v4404_v7 }
 0x958   :  { %1365 = vmatprep.subr.mxu0 %v4410_v9 }
 0x959   :  { %1366 = vmatpush1.msra.mxu0 %v4417_v10 }
 0x95a   :  { %1367 = vmatprep.subr.mxu0 %v4427_v12 }
 0x95b   :  { %1368 = vmatpush1.msra.mxu0 %v4433_v13 }
 0x95c   :  { %1369 = vmatprep.subr.mxu0 %v4442_v15 }
 0x95d   :  { %1370 = vmatpush1.msra.mxu0 %v4448_v16 }
 0x95e   :  { %1371 = vmatprep.subr.mxu0 %v4455_v17 }
 0x95f   :  { %1372 = vmatpush1.msra.mxu0 %v4461_v18 }
 0x960   :  { %1373 = vmatprep.subr.mxu0 %v4467_v19 }
 0x961   :  { %1374 = vmatpush1.msra.mxu0 %v4474_v20 }
 0x962   :  { %1737 = vmatprep.subr.mxu0 %v4374_v0 }
 0xa12   :  { %v1031_v8 = vpop.f32.mrf.mxu0 }
 0xa14   :  { %v1033_v11 = vpop.f32.mrf.mxu0 }
 0xa15   :  { %v1038_v14 = vcombine.low %v1031_v8, %v1033_v11 }
 0xa17   :  { %v1045_v21 = vrot.slane %v1038_v14, %v4553_v59 }
 0xa19   :  { %v1046_v22 = vcombine.high %v1045_v21, %v1045_v21  ;;  %v1053_v26 = vrot.slane %v1045_v21, %v4553_v59 }
 0xa1b   :  { %v1063_v33 = vadd.f32 %v1053_v26, %v946_v27  ;;  %v1060_v34 = vrot.slane %v1046_v22, %v4553_v59 }
 0xa1d   :  { %1079 = vrot.lane.b32.xlu0 %v1063_v33, %s4311_s16  ;;  %v1064_v56 = vadd.f32 %v1060_v34, %v948_v35  ;;  %v3793_v36 = vmul.f32 -1.442695, %v1063_v33 }
 0xa1f   :  { %1081 = vrot.lane.b32.xlu1 %v1064_v56, %s4311_s16  ;;  %v3794_v0 = vmul.f32 -1.442695, %v1064_v56  ;;  %4062 = vpow2.f32 %v3793_v36 }
 0xa21   :  { %4064 = vpow2.f32 %v3794_v0 }
 0xa2c   :  { %v4063_v40 = vpop.eup %4062 }
 0xa2d   :  { %v1071_v43 = vadd.f32 1.0, %v4063_v40 }
 0xa2e   :  { %v4065_v41 = vpop.eup %4064 }
 0xa2f   :  { %v1072_v44 = vadd.f32 1.0, %v4065_v41  ;;  %4066 = vrcp.f32 %v1071_v43 }
 0xa3c   :  { %v4067_v48 = vpop.eup %4066 }
 0xa3d   :  { %v1089_v39 = vmul.f32 %v4067_v48, %v4689_v49  ;;  %v1107_v49 = vrot.slane %v4067_v48, 1 }
 0xa8f   :  { %v1080_v45 = vpop.permute.xlu0 %1079 }
 0xa90   :  { %v1083_v25 = vrot.slane %v1080_v45, 1 }
 0xa91   :  { %v1082_v46 = vpop.permute.xlu1 %1081 }
 0xa92   :  { %4068 = vtanh.f32 %v1083_v25  ;;  %v1084_v47 = vrot.slane %v1082_v46, 1 }
 0xa93   :  { %4070 = vrcp.f32 %v1072_v44 }
 0xa94   :  { %4072 = vtanh.f32 %v1084_v47 }
 0xa9f   :  { %v4069_v32 = vpop.eup %4068 }
 0xaa0   :  { %v4071_v50 = vpop.eup %4070  ;;  %v1091_v52 = vmul.f32 %v4069_v32, %v4067_v48 }
 0xaa1   :  { %v4073_v53 = vpop.eup %4072  ;;  %v1090_v60 = vmul.f32 %v4071_v50, %v4693_v51  ;;  %v1108_v14 = vrot.slane %v4071_v50, 1 }
 0xaa2   :  { %1095 = vrot.lane.b32.xlu0 %v1091_v52, %s4311_s16  ;;  %v1092_v54 = vmul.f32 %v4073_v53, %v4071_v50 }
 0xaa4   :  { %1097 = vrot.lane.b32.xlu1 %v1092_v54, %s4311_s16 }
 0xb14   :  { %v1096_v55 = vpop.permute.xlu0 %1095 }
 0xb15   :  { %v4729_v57 = vadd.f32 %v1096_v55, %v1089_v39 }
 0xb16   :  { %v1098_v61 = vpop.permute.xlu1 %1097 }
 0xb17   :  { %4074 = vtanh.f32 %v4729_v57  ;;  %v4733_v62 = vadd.f32 %v1098_v61, %v1090_v60 }
 0xb19   :  { %4076 = vtanh.f32 %v4733_v62 }
 0xb24   :  { %v4075_v63 = vpop.eup %4074 }
 0xb25   :  { %1113 = vrot.lane.b32.xlu0 %v4075_v63, %s4311_s16 }
 0xb26   :  { %v4077_v8 = vpop.eup %4076 }
 0xb27   :  { %1115 = vrot.lane.b32.xlu1 %v4077_v8, %s4311_s16 }
 0xb97   :  { %v1114_v11 = vpop.permute.xlu0 %1113 }
 0xb98   :  { %v1119_v22 = vmul.f32 %v1114_v11, %v1107_v49 }
 0xb99   :  { %v1116_v21 = vpop.permute.xlu1 %1115 }
 0xb9a   :  { %v1120_v26 = vmul.f32 %v1116_v21, %v1108_v14 }
 0xb9c   :  { %v1123_v51 = vcombine.low %v1119_v22, %v1120_v26  ;;  %v4791_v22 = vld [vmem:[%s5706_s4 + $0x70] sm:$0xff]  ;;  %v4798_v26 = vld [vmem:[%s5706_s4 + $0x68] sm:$0xff] }
 0xb9e   :  { %v1130_v27 = vrot.slane %v1123_v51, %v4578_v24  ;;  %v1143_v33 = vrot.slane %v1123_v51, %v4553_v59  ;;  %v4804_v51 = vld [vmem:[%s5706_s4 + $0x60] sm:$0xff] }
 0xba0   :  { %v1150_v34 = vrot.slane %v1143_v33, %v4553_v59  ;;  %1132 = vst.msk [vmem:[#allocation3 + $0x4] sm:$0x3] %vm374_vm1, %v1130_v27  ;;  %v4810_v27 = vld [vmem:[%s5706_s4 + $0x58] sm:$0xff]  ;;  %v4816_v33 = vld [vmem:[%s5706_s4 + $0x50] sm:$0xff] }
 0xba2   :  { %3795 = vmatmul.mubr.msk.f32.vlgmr.msra.gmra.mxu1 %vm174_vm0, %v1150_v34  ;;  %v4822_v34 = vld [vmem:[%s5706_s4 + $0x48] sm:$0xff] }
 0xba3   :  { %1548 = vmatpush1.msra.mxu1 %v4379_v1  ;;  %1595 = vmatprep.mubr.f32.mxu1 %v4307_v4  ;;  %v4762_v1 = vld [vmem:[%s5706_s4 + $0x78] sm:$0xff] }
 0xba4   :  { %1549 = vmatprep.subr.mxu1 %v4384_v2 }
 0xba5   :  { %1550 = vmatpush1.msra.mxu1 %v4390_v3 }
 0xba6   :  { %1551 = vmatprep.subr.mxu1 %v4397_v5 }
 0xba7   :  { %1552 = vmatpush1.msra.mxu1 %v4404_v7 }
 0xba8   :  { %1553 = vmatprep.subr.mxu1 %v4410_v9 }
 0xba9   :  { %1554 = vmatpush1.msra.mxu1 %v4417_v10 }
 0xbaa   :  { %1555 = vmatprep.subr.mxu1 %v4427_v12  ;;  %v1134_v12 = vld [vmem:[#allocation2 + $0x5] ss:$8 sm:$0x3] }
 0xbab   :  { %1556 = vmatpush1.msra.mxu1 %v4433_v13 }
 0xbac   :  { %1557 = vmatprep.subr.mxu1 %v4442_v15 }
 0xbad   :  { %1558 = vmatpush1.msra.mxu1 %v4448_v16  ;;  %v1136_v16 = vld [vmem:[#allocation2 + $0x25] ss:$8 sm:$0x3] }
 0xbae   :  { %1559 = vmatprep.subr.mxu1 %v4455_v17 }
 0xbaf   :  { %1560 = vmatpush1.msra.mxu1 %v4461_v18 }
 0xbb0   :  { %1561 = vmatprep.subr.mxu1 %v4467_v19 }
 0xbb1   :  { %1562 = vmatpush1.msra.mxu1 %v4474_v20 }
 0xbb2   :  { %1925 = vmatprep.subr.mxu1 %v4762_v1 }
 0xc62   :  { %v1219_v2 = vpop.f32.mrf.mxu1 }
 0xc64   :  { %v1221_v3 = vpop.f32.mrf.mxu1 }
 0xc65   :  { %v1226_v5 = vcombine.low %v1219_v2, %v1221_v3  ;;  %v4828_v2 = vld [vmem:[%s5706_s4 + $0x40] sm:$0xff]  ;;  %v4834_v3 = vld [vmem:[%s5706_s4 + $0x38] sm:$0xff] }
 0xc67   :  { %v1233_v7 = vrot.slane %v1226_v5, %v4553_v59  ;;  %v4840_v5 = vld [vmem:[%s5706_s4 + $0x30] sm:$0xff] }
 0xc69   :  { %v1234_v9 = vcombine.high %v1233_v7, %v1233_v7  ;;  %v1241_v10 = vrot.slane %v1233_v7, %v4553_v59  ;;  %v4846_v7 = vld [vmem:[%s5706_s4 + $0x28] sm:$0xff] }
 0xc6b   :  { %v1251_v13 = vadd.f32 %v1241_v10, %v1134_v12  ;;  %v1248_v15 = vrot.slane %v1234_v9, %v4553_v59  ;;  %v4852_v9 = vld [vmem:[%s5706_s4 + $0x20] sm:$0xff]  ;;  %v4858_v10 = vld [vmem:[%s5706_s4 + $0x18] sm:$0xff]  ;;  %v4864_v12 = vld [vmem:[%s5706_s4 + $0x10] sm:$0xff] }
 0xc6d   :  { %1267 = vrot.lane.b32.xlu0 %v1251_v13, %s4311_s16  ;;  %v1252_v17 = vadd.f32 %v1248_v15, %v1136_v16  ;;  %v3796_v18 = vmul.f32 -1.442695, %v1251_v13  ;;  %v4870_v13 = vld [vmem:[%s5706_s4 + $0x8] sm:$0xff]  ;;  %v4876_v15 = vld [vmem:[%s5706_s4] sm:$0xff] }
 0xc6f   :  { %1269 = vrot.lane.b32.xlu1 %v1252_v17, %s4311_s16  ;;  %v3797_v19 = vmul.f32 -1.442695, %v1252_v17  ;;  %4078 = vpow2.f32 %v3796_v18 }
 0xc71   :  { %4080 = vpow2.f32 %v3797_v19 }
 0xc7c   :  { %v4079_v20 = vpop.eup %4078 }
 0xc7d   :  { %v1259_v56 = vadd.f32 1.0, %v4079_v20 }
 0xc7e   :  { %v4081_v35 = vpop.eup %4080 }
 0xc7f   :  { %v1260_v36 = vadd.f32 1.0, %v4081_v35  ;;  %4082 = vrcp.f32 %v1259_v56  ;;  %v1324_v56 = vld [vmem:[#allocation2 + $0x6] ss:$8 sm:$0x3] }
 0xc8c   :  { %v4083_v44 = vpop.eup %4082 }
 0xc8d   :  { %v1277_v32 = vmul.f32 %v4083_v44, %v4729_v57  ;;  %v1295_v57 = vrot.slane %v4083_v44, 1 }
 0xcdf   :  { %v1268_v0 = vpop.permute.xlu0 %1267 }
 0xce0   :  { %v1271_v40 = vrot.slane %v1268_v0, 1 }
 0xce1   :  { %v1270_v41 = vpop.permute.xlu1 %1269 }
 0xce2   :  { %4084 = vtanh.f32 %v1271_v40  ;;  %v1272_v43 = vrot.slane %v1270_v41, 1  ;;  %v1326_v40 = vld [vmem:[#allocation2 + $0x26] ss:$8 sm:$0x3] }
 0xce3   :  { %4086 = vrcp.f32 %v1260_v36 }
 0xce4   :  { %4088 = vtanh.f32 %v1272_v43 }
 0xcef   :  { %v4085_v45 = vpop.eup %4084 }
 0xcf0   :  { %v4087_v25 = vpop.eup %4086  ;;  %v1279_v46 = vmul.f32 %v4085_v45, %v4083_v44 }
 0xcf1   :  { %v4089_v47 = vpop.eup %4088  ;;  %v1278_v53 = vmul.f32 %v4087_v25, %v4733_v62  ;;  %v1296_v63 = vrot.slane %v4087_v25, 1 }
 0xcf2   :  { %1283 = vrot.lane.b32.xlu0 %v1279_v46, %s4311_s16  ;;  %v1280_v48 = vmul.f32 %v4089_v47, %v4087_v25 }
 0xcf4   :  { %1285 = vrot.lane.b32.xlu1 %v1280_v48, %s4311_s16 }
 0xd64   :  { %v1284_v50 = vpop.permute.xlu0 %1283 }
 0xd65   :  { %v4773_v52 = vadd.f32 %v1284_v50, %v1277_v32 }
 0xd66   :  { %v1286_v54 = vpop.permute.xlu1 %1285 }
 0xd67   :  { %4090 = vtanh.f32 %v4773_v52  ;;  %v4777_v39 = vadd.f32 %v1286_v54, %v1278_v53 }
 0xd69   :  { %4092 = vtanh.f32 %v4777_v39 }
 0xd74   :  { %v4091_v55 = vpop.eup %4090 }
 0xd75   :  { %1301 = vrot.lane.b32.xlu0 %v4091_v55, %s4311_s16 }
 0xd76   :  { %v4093_v60 = vpop.eup %4092 }
 0xd77   :  { %1303 = vrot.lane.b32.xlu1 %v4093_v60, %s4311_s16 }
 0xde7   :  { %v1302_v61 = vpop.permute.xlu0 %1301 }
 0xde8   :  { %v1307_v11 = vmul.f32 %v1302_v61, %v1295_v57 }
 0xde9   :  { %v1304_v8 = vpop.permute.xlu1 %1303 }
 0xdea   :  { %v1308_v49 = vmul.f32 %v1304_v8, %v1296_v63 }
 0xdec   :  { %v4782_v62 = vcombine.low %v1307_v11, %v1308_v49 }
 0xdee   :  { %v1333_v14 = vrot.slane %v4782_v62, %v4553_v59 }
 0xdf0   :  { %v1340_v21 = vrot.slane %v1333_v14, %v4553_v59 }
 0xdf2   :  { %3798 = vmatmul.mubr.msk.f32.vlgmr.msra.gmra.mxu0 %vm174_vm0, %v1340_v21 }
 0xdf3   :  { %1738 = vmatpush1.msra.mxu0 %v4791_v22  ;;  %1785 = vmatprep.mubr.f32.mxu0 %v4307_v4 }
 0xdf4   :  { %1739 = vmatprep.subr.mxu0 %v4798_v26 }
 0xdf5   :  { %1740 = vmatpush1.msra.mxu0 %v4804_v51 }
 0xdf6   :  { %1741 = vmatprep.subr.mxu0 %v4810_v27 }
 0xdf7   :  { %1742 = vmatpush1.msra.mxu0 %v4816_v33 }
 0xdf8   :  { %1743 = vmatprep.subr.mxu0 %v4822_v34 }
 0xdf9   :  { %1744 = vmatpush1.msra.mxu0 %v4828_v2 }
 0xdfa   :  { %1745 = vmatprep.subr.mxu0 %v4834_v3 }
 0xdfb   :  { %1746 = vmatpush1.msra.mxu0 %v4840_v5 }
 0xdfc   :  { %1747 = vmatprep.subr.mxu0 %v4846_v7 }
 0xdfd   :  { %1748 = vmatpush1.msra.mxu0 %v4852_v9 }
 0xdfe   :  { %1749 = vmatprep.subr.mxu0 %v4858_v10 }
 0xdff   :  { %1750 = vmatpush1.msra.mxu0 %v4864_v12 }
 0xe00   :  { %1751 = vmatprep.subr.mxu0 %v4870_v13 }
 0xe01   :  { %1752 = vmatpush1.msra.mxu0 %v4876_v15 }
 0xe02   :  { %2115 = vmatprep.subr.mxu0 %v4762_v1 }
 0xeb2   :  { %v1409_v16 = vpop.f32.mrf.mxu0 }
 0xeb4   :  { %v1411_v17 = vpop.f32.mrf.mxu0 }
 0xeb5   :  { %v1416_v18 = vcombine.low %v1409_v16, %v1411_v17 }
 0xeb7   :  { %v1423_v19 = vrot.slane %v1416_v18, %v4553_v59 }
 0xeb9   :  { %v1424_v20 = vcombine.high %v1423_v19, %v1423_v19  ;;  %v1431_v35 = vrot.slane %v1423_v19, %v4553_v59 }
 0xebb   :  { %v1441_v36 = vadd.f32 %v1431_v35, %v1324_v56  ;;  %v1438_v0 = vrot.slane %v1424_v20, %v4553_v59 }
 0xebd   :  { %1457 = vrot.lane.b32.xlu0 %v1441_v36, %s4311_s16  ;;  %v1442_v41 = vadd.f32 %v1438_v0, %v1326_v40  ;;  %v3799_v43 = vmul.f32 -1.442695, %v1441_v36 }
 0xebf   :  { %1459 = vrot.lane.b32.xlu1 %v1442_v41, %s4311_s16  ;;  %v3800_v44 = vmul.f32 -1.442695, %v1442_v41  ;;  %4094 = vpow2.f32 %v3799_v43 }
 0xec1   :  { %4096 = vpow2.f32 %v3800_v44 }
 0xecc   :  { %v4095_v45 = vpop.eup %4094 }
 0xecd   :  { %v1449_v46 = vadd.f32 1.0, %v4095_v45 }
 0xece   :  { %v4097_v25 = vpop.eup %4096 }
 0xecf   :  { %v1450_v47 = vadd.f32 1.0, %v4097_v25  ;;  %4098 = vrcp.f32 %v1449_v46 }
 0xedc   :  { %v4099_v54 = vpop.eup %4098 }
 0xedd   :  { %v1467_v8 = vmul.f32 %v4099_v54, %v4773_v52  ;;  %v1485_v52 = vrot.slane %v4099_v54, 1 }
 0xf2f   :  { %v1458_v48 = vpop.permute.xlu0 %1457 }
 0xf30   :  { %v1461_v32 = vrot.slane %v1458_v48, 1  ;;  %v1512_v48 = vld [vmem:[#allocation2 + $0x7] ss:$8 sm:$0x3] }
 0xf31   :  { %v1460_v50 = vpop.permute.xlu1 %1459 }
 0xf32   :  { %4100 = vtanh.f32 %v1461_v32  ;;  %v1462_v53 = vrot.slane %v1460_v50, 1 }
 0xf33   :  { %4102 = vrcp.f32 %v1450_v47 }
 0xf34   :  { %4104 = vtanh.f32 %v1462_v53  ;;  %v1514_v53 = vld [vmem:[#allocation2 + $0x27] ss:$8 sm:$0x3] }
 0xf3f   :  { %v4101_v55 = vpop.eup %4100 }
 0xf40   :  { %v4103_v60 = vpop.eup %4102  ;;  %v1469_v61 = vmul.f32 %v4101_v55, %v4099_v54 }
 0xf41   :  { %v4105_v57 = vpop.eup %4104  ;;  %v1468_v14 = vmul.f32 %v4103_v60, %v4777_v39  ;;  %v1486_v20 = vrot.slane %v4103_v60, 1 }
 0xf42   :  { %1473 = vrot.lane.b32.xlu0 %v1469_v61, %s4311_s16  ;;  %v1470_v63 = vmul.f32 %v4105_v57, %v4103_v60 }
 0xf44   :  { %1475 = vrot.lane.b32.xlu1 %v1470_v63, %s4311_s16 }
 0xfb4   :  { %v1474_v11 = vpop.permute.xlu0 %1473 }
 0xfb5   :  { %v4888_v49 = vadd.f32 %v1474_v11, %v1467_v8 }
 0xfb6   :  { %v1476_v21 = vpop.permute.xlu1 %1475 }
 0xfb7   :  { %4106 = vtanh.f32 %v4888_v49  ;;  %v4892_v16 = vadd.f32 %v1476_v21, %v1468_v14 }
 0xfb9   :  { %4108 = vtanh.f32 %v4892_v16 }
 0xfc4   :  { %v4107_v17 = vpop.eup %4106 }
 0xfc5   :  { %1491 = vrot.lane.b32.xlu0 %v4107_v17, %s4311_s16 }
 0xfc6   :  { %v4109_v18 = vpop.eup %4108 }
 0xfc7   :  { %1493 = vrot.lane.b32.xlu1 %v4109_v18, %s4311_s16 }
0x1037   :  { %v1492_v19 = vpop.permute.xlu0 %1491 }
0x1038   :  { %v1497_v56 = vmul.f32 %v1492_v19, %v1485_v52 }
0x1039   :  { %v1494_v35 = vpop.permute.xlu1 %1493 }
0x103a   :  { %v1498_v36 = vmul.f32 %v1494_v35, %v1486_v20 }
0x103c   :  { %v1501_v39 = vcombine.low %v1497_v56, %v1498_v36 }
0x103e   :  { %v1508_v0 = vrot.slane %v1501_v39, %v4578_v24  ;;  %v1521_v40 = vrot.slane %v1501_v39, %v4553_v59 }
0x1040   :  { %v1528_v41 = vrot.slane %v1521_v40, %v4553_v59  ;;  %1510 = vst.msk [vmem:[#allocation3 + $0x6] sm:$0x3] %vm374_vm1, %v1508_v0 }
0x1042   :  { %3801 = vmatmul.mubr.msk.f32.vlgmr.msra.gmra.mxu1 %vm174_vm0, %v1528_v41 }
0x1043   :  { %1926 = vmatpush1.msra.mxu1 %v4791_v22  ;;  %1973 = vmatprep.mubr.f32.mxu1 %v4307_v4 }
0x1044   :  { %1927 = vmatprep.subr.mxu1 %v4798_v26 }
0x1045   :  { %1928 = vmatpush1.msra.mxu1 %v4804_v51 }
0x1046   :  { %1929 = vmatprep.subr.mxu1 %v4810_v27 }
0x1047   :  { %1930 = vmatpush1.msra.mxu1 %v4816_v33 }
0x1048   :  { %1931 = vmatprep.subr.mxu1 %v4822_v34 }
0x1049   :  { %1932 = vmatpush1.msra.mxu1 %v4828_v2 }
0x104a   :  { %1933 = vmatprep.subr.mxu1 %v4834_v3 }
0x104b   :  { %1934 = vmatpush1.msra.mxu1 %v4840_v5 }
0x104c   :  { %1935 = vmatprep.subr.mxu1 %v4846_v7 }
0x104d   :  { %1936 = vmatpush1.msra.mxu1 %v4852_v9 }
0x104e   :  { %1937 = vmatprep.subr.mxu1 %v4858_v10 }
0x104f   :  { %1938 = vmatpush1.msra.mxu1 %v4864_v12 }
0x1050   :  { %1939 = vmatprep.subr.mxu1 %v4870_v13 }
0x1051   :  { %1940 = vmatpush1.msra.mxu1 %v4876_v15 }
0x1052   :  { %2303 = vmatprep.subr.mxu1 %v4762_v1 }
0x1102   :  { %v1597_v43 = vpop.f32.mrf.mxu1 }
0x1104   :  { %v1599_v44 = vpop.f32.mrf.mxu1 }
0x1105   :  { %v1604_v45 = vcombine.low %v1597_v43, %v1599_v44 }
0x1107   :  { %v1611_v25 = vrot.slane %v1604_v45, %v4553_v59 }
0x1109   :  { %v1612_v46 = vcombine.high %v1611_v25, %v1611_v25  ;;  %v1619_v47 = vrot.slane %v1611_v25, %v4553_v59 }
0x110b   :  { %v1629_v32 = vadd.f32 %v1619_v47, %v1512_v48  ;;  %v1626_v50 = vrot.slane %v1612_v46, %v4553_v59 }
0x110d   :  { %1645 = vrot.lane.b32.xlu0 %v1629_v32, %s4311_s16  ;;  %v1630_v54 = vadd.f32 %v1626_v50, %v1514_v53  ;;  %v3802_v55 = vmul.f32 -1.442695, %v1629_v32 }
0x110f   :  { %1647 = vrot.lane.b32.xlu1 %v1630_v54, %s4311_s16  ;;  %v3803_v60 = vmul.f32 -1.442695, %v1630_v54  ;;  %4110 = vpow2.f32 %v3802_v55 }
0x1111   :  { %4112 = vpow2.f32 %v3803_v60 }
0x111c   :  { %v4111_v61 = vpop.eup %4110 }
0x111d   :  { %v1637_v63 = vadd.f32 1.0, %v4111_v61 }
0x111e   :  { %v4113_v57 = vpop.eup %4112 }
0x111f   :  { %v1638_v8 = vadd.f32 1.0, %v4113_v57  ;;  %4114 = vrcp.f32 %v1637_v63 }
0x112c   :  { %v4115_v18 = vpop.eup %4114 }
0x112d   :  { %v1655_v36 = vmul.f32 %v4115_v18, %v4888_v49  ;;  %v37_v49 = vld [vmem:[%s5702_s0 + $0x8] sm:$0xff]  ;;  %v1673_v46 = vrot.slane %v4115_v18, 1 }
0x117f   :  { %v1646_v11 = vpop.permute.xlu0 %1645 }
0x1180   :  { %v1649_v14 = vrot.slane %v1646_v11, 1 }
0x1181   :  { %v1648_v21 = vpop.permute.xlu1 %1647 }
0x1182   :  { %4116 = vtanh.f32 %v1649_v14  ;;  %v1650_v17 = vrot.slane %v1648_v21, 1 }
0x1183   :  { %4118 = vrcp.f32 %v1638_v8 }
0x1184   :  { %4120 = vtanh.f32 %v1650_v17 }
0x118f   :  { %v4117_v19 = vpop.eup %4116 }
0x1190   :  { %v4119_v52 = vpop.eup %4118  ;;  %v1657_v20 = vmul.f32 %v4117_v19, %v4115_v18 }
0x1191   :  { %v4121_v35 = vpop.eup %4120  ;;  %v1656_v40 = vmul.f32 %v4119_v52, %v4892_v16  ;;  %v39_v16 = vld [vmem:[%s5702_s0 + $0x18] sm:$0xff]  ;;  %v1674_v47 = vrot.slane %v4119_v52, 1 }
0x1192   :  { %1661 = vrot.lane.b32.xlu0 %v1657_v20, %s4311_s16  ;;  %v1658_v56 = vmul.f32 %v4121_v35, %v4119_v52 }
0x1194   :  { %1663 = vrot.lane.b32.xlu1 %v1658_v56, %s4311_s16 }
0x1204   :  { %v1662_v39 = vpop.permute.xlu0 %1661 }
0x1205   :  { %v4927_v0 = vadd.f32 %v1662_v39, %v1655_v36 }
0x1206   :  { %v1664_v41 = vpop.permute.xlu1 %1663 }
0x1207   :  { %4122 = vtanh.f32 %v4927_v0  ;;  %v4931_v43 = vadd.f32 %v1664_v41, %v1656_v40 }
0x1209   :  { %4124 = vtanh.f32 %v4931_v43 }
0x1214   :  { %v4123_v44 = vpop.eup %4122 }
0x1215   :  { %1679 = vrot.lane.b32.xlu0 %v4123_v44, %s4311_s16 }
0x1216   :  { %v4125_v45 = vpop.eup %4124 }
0x1217   :  { %1681 = vrot.lane.b32.xlu1 %v4125_v45, %s4311_s16 }
0x1219   :  { %48 = vperm.xlu0 %3991, %v37_v49  }
0x121b   :  { %58 = vperm.xlu1 %3993, %v39_v16  }
0x121d   :  { %3994 = vset.pattern.permute.xlu0 %v4308_v6 }
0x121e   :  { %87 = vperm.xlu0 %3994, %v37_v49  }
0x121f   :  { %3995 = vset.pattern.permute.xlu1 %v4308_v6 }
0x1220   :  { %95 = vperm.xlu1 %3995, %v39_v16  }
0x1287   :  { %v1680_v25 = vpop.permute.xlu0 %1679 }
0x1288   :  { %v1685_v32 = vmul.f32 %v1680_v25, %v1673_v46 }
0x1289   :  { %v1682_v48 = vpop.permute.xlu1 %1681 }
0x128a   :  { %v1686_v50 = vmul.f32 %v1682_v48, %v1674_v47 }
0x128c   :  { %v4944_v53 = vcombine.low %v1685_v32, %v1686_v50 }
0x128e   :  { %v1711_v54 = vrot.slane %v4944_v53, %v4553_v59 }
0x1290   :  { %v1718_v55 = vrot.slane %v1711_v54, %v4553_v59 }
0x1292   :  { %3804 = vmatmul.mubr.msk.f32.vlgmr.msra.gmra.mxu0 %vm174_vm0, %v1718_v55 }
0x1293   :  { %2116 = vmatpush1.msra.mxu0 %v4791_v22  ;;  %2163 = vmatprep.mubr.f32.mxu0 %v4307_v4 }
0x1294   :  { %v49_v6 = vpop.permute.xlu0 %48  ;;  %2117 = vmatprep.subr.mxu0 %v4798_v26 }
0x1295   :  { %2118 = vmatpush1.msra.mxu0 %v4804_v51  ;;  %v74_v61 = vmul.f32 %v4529_v30, %v49_v6  ;;  %v75_v57 = vmul.f32 %v4531_v31, %v49_v6 }
0x1296   :  { %2119 = vmatprep.subr.mxu0 %v4810_v27  ;;  %v59_v21 = vpop.permute.xlu1 %58 }
0x1297   :  { %2120 = vmatpush1.msra.mxu0 %v4816_v33  ;;  %v78_v19 = vmul.f32 %v4529_v30, %v59_v21  ;;  %v79_v52 = vmul.f32 %v4531_v31, %v59_v21 }
0x1298   :  { %2121 = vmatprep.subr.mxu0 %v4822_v34 }
0x1299   :  { %v88_v60 = vpop.permute.xlu0 %87  ;;  %2122 = vmatpush1.msra.mxu0 %v4828_v2 }
0x129a   :  { %v111_v63 = vmul.f32 %v4525_v28, %v88_v60  ;;  %v112_v8 = vmul.f32 %v4527_v29, %v88_v60  ;;  %2123 = vmatprep.subr.mxu0 %v4834_v3 }
0x129b   :  { %2124 = vmatpush1.msra.mxu0 %v4840_v5  ;;  %v96_v20 = vpop.permute.xlu1 %95 }
0x129c   :  { %v119_v11 = vadd.f32 %v111_v63, %v74_v61  ;;  %v120_v14 = vadd.f32 %v112_v8, %v75_v57  ;;  %2125 = vmatprep.subr.mxu0 %v4846_v7  ;;  %v115_v35 = vmul.f32 %v4525_v28, %v96_v20  ;;  %v116_v56 = vmul.f32 %v4527_v29, %v96_v20 }
0x129d   :  { %2126 = vmatpush1.msra.mxu0 %v4852_v9 }
0x129e   :  { %v139_v17 = vadd.f32 %v4538_v37, %v119_v11  ;;  %v140_v18 = vadd.f32 %v4540_v38, %v120_v14  ;;  %2127 = vmatprep.subr.mxu0 %v4858_v10  ;;  %v123_v36 = vadd.f32 %v115_v35, %v78_v19  ;;  %v124_v39 = vadd.f32 %v116_v56, %v79_v52 }
0x129f   :  { %2128 = vmatpush1.msra.mxu0 %v4864_v12 }
0x12a0   :  { %147 = vst [vmem:[#allocation2 + $0x10] sm:$0xff] %v139_v17  ;;  %148 = vst [vmem:[#allocation2 + $0x18] sm:$0xff] %v140_v18  ;;  %2129 = vmatprep.subr.mxu0 %v4870_v13  ;;  %v143_v40 = vadd.f32 %v4538_v37, %v123_v36  ;;  %v144_v41 = vadd.f32 %v4540_v38, %v124_v39 }
0x12a1   :  { %2130 = vmatpush1.msra.mxu0 %v4876_v15 }
0x12a2   :  { %2493 = vmatprep.subr.mxu0 %v4762_v1  ;;  %151 = vst [vmem:[#allocation2 + $0x30] sm:$0xff] %v143_v40  ;;  %152 = vst [vmem:[#allocation2 + $0x38] sm:$0xff] %v144_v41 }
0x12a7   :  { %v1702_v16 = vld [vmem:[#allocation2 + $0x10] ss:$8 sm:$0x3] }
0x12a9   :  { %v1704_v46 = vld [vmem:[#allocation2 + $0x30] ss:$8 sm:$0x3] }
0x1352   :  { %v1787_v30 = vpop.f32.mrf.mxu0 }
0x1354   :  { %v1789_v31 = vpop.f32.mrf.mxu0 }
0x1355   :  { %v1794_v44 = vcombine.low %v1787_v30, %v1789_v31 }
0x1357   :  { %v1801_v45 = vrot.slane %v1794_v44, %v4553_v59 }
0x1359   :  { %v1802_v49 = vcombine.high %v1801_v45, %v1801_v45  ;;  %v1809_v28 = vrot.slane %v1801_v45, %v4553_v59 }
0x135b   :  { %v1819_v29 = vadd.f32 %v1809_v28, %v1702_v16  ;;  %v1816_v25 = vrot.slane %v1802_v49, %v4553_v59 }
0x135d   :  { %1835 = vrot.lane.b32.xlu1 %v1819_v29, %s4311_s16  ;;  %v1820_v37 = vadd.f32 %v1816_v25, %v1704_v46  ;;  %v3805_v38 = vmul.f32 -1.442695, %v1819_v29 }
0x135f   :  { %1837 = vrot.lane.b32.xlu0 %v1820_v37, %s4311_s16  ;;  %v3806_v47 = vmul.f32 -1.442695, %v1820_v37  ;;  %4126 = vpow2.f32 %v3805_v38  ;;  %v1890_v38 = vld [vmem:[#allocation2 + $0x11] ss:$8 sm:$0x3] }
0x1361   :  { %4128 = vpow2.f32 %v3806_v47 }
0x136c   :  { %v4127_v48 = vpop.eup %4126 }
0x136d   :  { %v1827_v50 = vadd.f32 1.0, %v4127_v48 }
0x136e   :  { %v4129_v32 = vpop.eup %4128 }
0x136f   :  { %v1828_v54 = vadd.f32 1.0, %v4129_v32  ;;  %4130 = vrcp.f32 %v1827_v50  ;;  %v1892_v32 = vld [vmem:[#allocation2 + $0x31] ss:$8 sm:$0x3] }
0x137c   :  { %v4131_v57 = vpop.eup %4130 }
0x137d   :  { %v1845_v17 = vmul.f32 %v4131_v57, %v4927_v0  ;;  %v1863_v0 = vrot.slane %v4131_v57, 1 }
0x13cf   :  { %v1836_v55 = vpop.permute.xlu1 %1835 }
0x13d0   :  { %v1839_v6 = vrot.slane %v1836_v55, 1 }
0x13d1   :  { %v1838_v60 = vpop.permute.xlu0 %1837 }
0x13d2   :  { %4132 = vtanh.f32 %v1839_v6  ;;  %v1840_v61 = vrot.slane %v1838_v60, 1 }
0x13d3   :  { %4134 = vrcp.f32 %v1828_v54 }
0x13d4   :  { %4136 = vtanh.f32 %v1840_v61 }
0x13df   :  { %v4133_v63 = vpop.eup %4132 }
0x13e0   :  { %v4135_v8 = vpop.eup %4134  ;;  %v1847_v11 = vmul.f32 %v4133_v63, %v4131_v57 }
0x13e1   :  { %v4137_v14 = vpop.eup %4136  ;;  %v1846_v52 = vmul.f32 %v4135_v8, %v4931_v43  ;;  %v1864_v40 = vrot.slane %v4135_v8, 1 }
0x13e2   :  { %1851 = vrot.lane.b32.xlu1 %v1847_v11, %s4311_s16  ;;  %v1848_v21 = vmul.f32 %v4137_v14, %v4135_v8 }
0x13e4   :  { %1853 = vrot.lane.b32.xlu0 %v1848_v21, %s4311_s16 }
0x1454   :  { %v1852_v18 = vpop.permute.xlu1 %1851 }
0x1455   :  { %v4987_v19 = vadd.f32 %v1852_v18, %v1845_v17 }
0x1456   :  { %v1854_v20 = vpop.permute.xlu0 %1853 }
0x1457   :  { %4138 = vtanh.f32 %v4987_v19  ;;  %v4991_v35 = vadd.f32 %v1854_v20, %v1846_v52 }
0x1459   :  { %4140 = vtanh.f32 %v4991_v35 }
0x1464   :  { %v4139_v56 = vpop.eup %4138 }
0x1465   :  { %1869 = vrot.lane.b32.xlu1 %v4139_v56, %s4311_s16 }
0x1466   :  { %v4141_v36 = vpop.eup %4140 }
0x1467   :  { %1871 = vrot.lane.b32.xlu0 %v4141_v36, %s4311_s16 }
0x14d7   :  { %v1870_v39 = vpop.permute.xlu1 %1869 }
0x14d8   :  { %v1875_v30 = vmul.f32 %v1870_v39, %v1863_v0 }
0x14d9   :  { %v1872_v41 = vpop.permute.xlu0 %1871 }
0x14da   :  { %v1876_v31 = vmul.f32 %v1872_v41, %v1864_v40 }
0x14dc   :  { %v1879_v43 = vcombine.low %v1875_v30, %v1876_v31 }
0x14de   :  { %v1886_v44 = vrot.slane %v1879_v43, %v4578_v24  ;;  %v1899_v45 = vrot.slane %v1879_v43, %v4553_v59 }
0x14e0   :  { %v1906_v49 = vrot.slane %v1899_v45, %v4553_v59  ;;  %1888 = vst.msk [vmem:[#allocation3 + $0x8] sm:$0x3] %vm374_vm1, %v1886_v44 }
0x14e2   :  { %3807 = vmatmul.mubr.msk.f32.vlgmr.msra.gmra.mxu1 %vm174_vm0, %v1906_v49 }
0x14e3   :  { %2304 = vmatpush1.msra.mxu1 %v4791_v22  ;;  %2351 = vmatprep.mubr.f32.mxu1 %v4307_v4 }
0x14e4   :  { %2305 = vmatprep.subr.mxu1 %v4798_v26 }
0x14e5   :  { %2306 = vmatpush1.msra.mxu1 %v4804_v51 }
0x14e6   :  { %2307 = vmatprep.subr.mxu1 %v4810_v27 }
0x14e7   :  { %2308 = vmatpush1.msra.mxu1 %v4816_v33 }
0x14e8   :  { %2309 = vmatprep.subr.mxu1 %v4822_v34 }
0x14e9   :  { %2310 = vmatpush1.msra.mxu1 %v4828_v2 }
0x14ea   :  { %2311 = vmatprep.subr.mxu1 %v4834_v3 }
0x14eb   :  { %2312 = vmatpush1.msra.mxu1 %v4840_v5 }
0x14ec   :  { %2313 = vmatprep.subr.mxu1 %v4846_v7 }
0x14ed   :  { %2314 = vmatpush1.msra.mxu1 %v4852_v9 }
0x14ee   :  { %2315 = vmatprep.subr.mxu1 %v4858_v10 }
0x14ef   :  { %2316 = vmatpush1.msra.mxu1 %v4864_v12 }
0x14f0   :  { %2317 = vmatprep.subr.mxu1 %v4870_v13 }
0x14f1   :  { %2318 = vmatpush1.msra.mxu1 %v4876_v15 }
0x14f2   :  { %2681 = vmatprep.subr.mxu1 %v4762_v1 }
0x15a2   :  { %v1975_v28 = vpop.f32.mrf.mxu1 }
0x15a4   :  { %v1977_v16 = vpop.f32.mrf.mxu1 }
0x15a5   :  { %v1982_v29 = vcombine.low %v1975_v28, %v1977_v16 }
0x15a7   :  { %v1989_v25 = vrot.slane %v1982_v29, %v4553_v59 }
0x15a9   :  { %v1990_v46 = vcombine.high %v1989_v25, %v1989_v25  ;;  %v1997_v37 = vrot.slane %v1989_v25, %v4553_v59 }
0x15ab   :  { %v2007_v47 = vadd.f32 %v1997_v37, %v1890_v38  ;;  %v2004_v48 = vrot.slane %v1990_v46, %v4553_v59 }
0x15ad   :  { %2023 = vrot.lane.b32.xlu1 %v2007_v47, %s4311_s16  ;;  %v2008_v50 = vadd.f32 %v2004_v48, %v1892_v32  ;;  %v3808_v54 = vmul.f32 -1.442695, %v2007_v47 }
0x15af   :  { %2025 = vrot.lane.b32.xlu0 %v2008_v50, %s4311_s16  ;;  %v3809_v55 = vmul.f32 -1.442695, %v2008_v50  ;;  %4142 = vpow2.f32 %v3808_v54  ;;  %v2080_v50 = vld [vmem:[#allocation2 + $0x12] ss:$8 sm:$0x3] }
0x15b1   :  { %4144 = vpow2.f32 %v3809_v55 }
0x15bc   :  { %v4143_v6 = vpop.eup %4142 }
0x15bd   :  { %v2015_v61 = vadd.f32 1.0, %v4143_v6  ;;  %v2082_v6 = vld [vmem:[#allocation2 + $0x32] ss:$8 sm:$0x3] }
0x15be   :  { %v4145_v60 = vpop.eup %4144 }
0x15bf   :  { %v2016_v57 = vadd.f32 1.0, %v4145_v60  ;;  %4146 = vrcp.f32 %v2015_v61 }
0x15cc   :  { %v4147_v21 = vpop.eup %4146 }
0x15cd   :  { %v2033_v36 = vmul.f32 %v4147_v21, %v4987_v19  ;;  %v2051_v19 = vrot.slane %v4147_v21, 1 }
0x161f   :  { %v2024_v63 = vpop.permute.xlu1 %2023 }
0x1620   :  { %v2027_v8 = vrot.slane %v2024_v63, 1 }
0x1621   :  { %v2026_v11 = vpop.permute.xlu0 %2025 }
0x1622   :  { %4148 = vtanh.f32 %v2027_v8  ;;  %v2028_v14 = vrot.slane %v2026_v11, 1 }
0x1623   :  { %4150 = vrcp.f32 %v2016_v57 }
0x1624   :  { %4152 = vtanh.f32 %v2028_v14 }
0x162f   :  { %v4149_v17 = vpop.eup %4148 }
0x1630   :  { %v4151_v18 = vpop.eup %4150  ;;  %v2035_v52 = vmul.f32 %v4149_v17, %v4147_v21 }
0x1631   :  { %v4153_v20 = vpop.eup %4152  ;;  %v2034_v40 = vmul.f32 %v4151_v18, %v4991_v35  ;;  %v2052_v45 = vrot.slane %v4151_v18, 1 }
0x1632   :  { %2039 = vrot.lane.b32.xlu1 %v2035_v52, %s4311_s16  ;;  %v2036_v56 = vmul.f32 %v4153_v20, %v4151_v18 }
0x1634   :  { %2041 = vrot.lane.b32.xlu0 %v2036_v56, %s4311_s16 }
0x16a4   :  { %v2040_v39 = vpop.permute.xlu1 %2039 }
0x16a5   :  { %v5026_v0 = vadd.f32 %v2040_v39, %v2033_v36 }
0x16a6   :  { %v2042_v41 = vpop.permute.xlu0 %2041 }
0x16a7   :  { %4154 = vtanh.f32 %v5026_v0  ;;  %v5030_v30 = vadd.f32 %v2042_v41, %v2034_v40 }
0x16a9   :  { %4156 = vtanh.f32 %v5030_v30 }
0x16b4   :  { %v4155_v31 = vpop.eup %4154 }
0x16b5   :  { %2057 = vrot.lane.b32.xlu1 %v4155_v31, %s4311_s16 }
0x16b6   :  { %v4157_v43 = vpop.eup %4156 }
0x16b7   :  { %2059 = vrot.lane.b32.xlu0 %v4157_v43, %s4311_s16 }
0x1727   :  { %v2058_v44 = vpop.permute.xlu1 %2057 }
0x1728   :  { %v2063_v28 = vmul.f32 %v2058_v44, %v2051_v19 }
0x1729   :  { %v2060_v49 = vpop.permute.xlu0 %2059 }
0x172a   :  { %v2064_v16 = vmul.f32 %v2060_v49, %v2052_v45 }
0x172c   :  { %v5035_v35 = vcombine.low %v2063_v28, %v2064_v16 }
0x172e   :  { %v2089_v29 = vrot.slane %v5035_v35, %v4553_v59 }
0x1730   :  { %v2096_v25 = vrot.slane %v2089_v29, %v4553_v59 }
0x1732   :  { %3810 = vmatmul.mubr.msk.f32.vlgmr.msra.gmra.mxu0 %vm174_vm0, %v2096_v25 }
0x1733   :  { %2494 = vmatpush1.msra.mxu0 %v4791_v22  ;;  %2541 = vmatprep.mubr.f32.mxu0 %v4307_v4 }
0x1734   :  { %2495 = vmatprep.subr.mxu0 %v4798_v26 }
0x1735   :  { %2496 = vmatpush1.msra.mxu0 %v4804_v51 }
0x1736   :  { %2497 = vmatprep.subr.mxu0 %v4810_v27 }
0x1737   :  { %2498 = vmatpush1.msra.mxu0 %v4816_v33 }
0x1738   :  { %2499 = vmatprep.subr.mxu0 %v4822_v34 }
0x1739   :  { %2500 = vmatpush1.msra.mxu0 %v4828_v2 }
0x173a   :  { %2501 = vmatprep.subr.mxu0 %v4834_v3 }
0x173b   :  { %2502 = vmatpush1.msra.mxu0 %v4840_v5 }
0x173c   :  { %2503 = vmatprep.subr.mxu0 %v4846_v7 }
0x173d   :  { %2504 = vmatpush1.msra.mxu0 %v4852_v9 }
0x173e   :  { %2505 = vmatprep.subr.mxu0 %v4858_v10 }
0x173f   :  { %2506 = vmatpush1.msra.mxu0 %v4864_v12 }
0x1740   :  { %2507 = vmatprep.subr.mxu0 %v4870_v13 }
0x1741   :  { %2508 = vmatpush1.msra.mxu0 %v4876_v15 }
0x1742   :  { %2871 = vmatprep.subr.mxu0 %v4762_v1 }
0x17f2   :  { %v2165_v46 = vpop.f32.mrf.mxu0 }
0x17f4   :  { %v2167_v37 = vpop.f32.mrf.mxu0 }
0x17f5   :  { %v2172_v38 = vcombine.low %v2165_v46, %v2167_v37 }
0x17f7   :  { %v2179_v47 = vrot.slane %v2172_v38, %v4553_v59 }
0x17f9   :  { %v2180_v48 = vcombine.high %v2179_v47, %v2179_v47  ;;  %v2187_v32 = vrot.slane %v2179_v47, %v4553_v59 }
0x17fb   :  { %v2197_v54 = vadd.f32 %v2187_v32, %v2080_v50  ;;  %v2194_v55 = vrot.slane %v2180_v48, %v4553_v59 }
0x17fd   :  { %2213 = vrot.lane.b32.xlu1 %v2197_v54, %s4311_s16  ;;  %v2198_v60 = vadd.f32 %v2194_v55, %v2082_v6  ;;  %v3811_v61 = vmul.f32 -1.442695, %v2197_v54 }
0x17ff   :  { %2215 = vrot.lane.b32.xlu0 %v2198_v60, %s4311_s16  ;;  %v3812_v57 = vmul.f32 -1.442695, %v2198_v60  ;;  %4158 = vpow2.f32 %v3811_v61 }
0x1801   :  { %4160 = vpow2.f32 %v3812_v57  ;;  %v2268_v57 = vld [vmem:[#allocation2 + $0x13] ss:$8 sm:$0x3] }
0x180c   :  { %v4159_v63 = vpop.eup %4158 }
0x180d   :  { %v2205_v11 = vadd.f32 1.0, %v4159_v63 }
0x180e   :  { %v4161_v8 = vpop.eup %4160 }
0x180f   :  { %v2206_v14 = vadd.f32 1.0, %v4161_v8  ;;  %4162 = vrcp.f32 %v2205_v11  ;;  %v2270_v11 = vld [vmem:[#allocation2 + $0x33] ss:$8 sm:$0x3] }
0x181c   :  { %v4163_v20 = vpop.eup %4162 }
0x181d   :  { %v2223_v31 = vmul.f32 %v4163_v20, %v5026_v0  ;;  %v2241_v0 = vrot.slane %v4163_v20, 1 }
0x186f   :  { %v2214_v21 = vpop.permute.xlu1 %2213 }
0x1870   :  { %v2217_v17 = vrot.slane %v2214_v21, 1 }
0x1871   :  { %v2216_v18 = vpop.permute.xlu0 %2215 }
0x1872   :  { %4164 = vtanh.f32 %v2217_v17  ;;  %v2218_v52 = vrot.slane %v2216_v18, 1 }
0x1873   :  { %4166 = vrcp.f32 %v2206_v14 }
0x1874   :  { %4168 = vtanh.f32 %v2218_v52 }
0x187f   :  { %v4165_v56 = vpop.eup %4164 }
0x1880   :  { %v4167_v36 = vpop.eup %4166  ;;  %v2225_v39 = vmul.f32 %v4165_v56, %v4163_v20 }
0x1881   :  { %v4169_v40 = vpop.eup %4168  ;;  %v2224_v19 = vmul.f32 %v4167_v36, %v5030_v30  ;;  %v2242_v25 = vrot.slane %v4167_v36, 1 }
0x1882   :  { %2229 = vrot.lane.b32.xlu1 %v2225_v39, %s4311_s16  ;;  %v2226_v41 = vmul.f32 %v4169_v40, %v4167_v36 }
0x1884   :  { %2231 = vrot.lane.b32.xlu0 %v2226_v41, %s4311_s16 }
0x18f4   :  { %v2230_v43 = vpop.permute.xlu1 %2229 }
0x18f5   :  { %v5066_v44 = vadd.f32 %v2230_v43, %v2223_v31 }
0x18f6   :  { %v2232_v45 = vpop.permute.xlu0 %2231 }
0x18f7   :  { %4170 = vtanh.f32 %v5066_v44  ;;  %v5070_v49 = vadd.f32 %v2232_v45, %v2224_v19 }
0x18f9   :  { %4172 = vtanh.f32 %v5070_v49 }
0x1904   :  { %v4171_v28 = vpop.eup %4170 }
0x1905   :  { %2247 = vrot.lane.b32.xlu1 %v4171_v28, %s4311_s16 }
0x1906   :  { %v4173_v16 = vpop.eup %4172 }
0x1907   :  { %2249 = vrot.lane.b32.xlu0 %v4173_v16, %s4311_s16 }
0x1977   :  { %v2248_v29 = vpop.permute.xlu1 %2247 }
0x1978   :  { %v2253_v37 = vmul.f32 %v2248_v29, %v2241_v0 }
0x1979   :  { %v2250_v46 = vpop.permute.xlu0 %2249 }
0x197a   :  { %v2254_v38 = vmul.f32 %v2250_v46, %v2242_v25 }
0x197c   :  { %v2257_v30 = vcombine.low %v2253_v37, %v2254_v38 }
0x197e   :  { %v2264_v47 = vrot.slane %v2257_v30, %v4578_v24  ;;  %v2277_v48 = vrot.slane %v2257_v30, %v4553_v59 }
0x1980   :  { %v2284_v32 = vrot.slane %v2277_v48, %v4553_v59  ;;  %2266 = vst.msk [vmem:[#allocation3 + $0xa] sm:$0x3] %vm374_vm1, %v2264_v47 }
0x1982   :  { %3813 = vmatmul.mubr.msk.f32.vlgmr.msra.gmra.mxu1 %vm174_vm0, %v2284_v32 }
0x1983   :  { %2682 = vmatpush1.msra.mxu1 %v4791_v22  ;;  %2729 = vmatprep.mubr.f32.mxu1 %v4307_v4 }
0x1984   :  { %2683 = vmatprep.subr.mxu1 %v4798_v26 }
0x1985   :  { %2684 = vmatpush1.msra.mxu1 %v4804_v51 }
0x1986   :  { %2685 = vmatprep.subr.mxu1 %v4810_v27 }
0x1987   :  { %2686 = vmatpush1.msra.mxu1 %v4816_v33 }
0x1988   :  { %2687 = vmatprep.subr.mxu1 %v4822_v34 }
0x1989   :  { %2688 = vmatpush1.msra.mxu1 %v4828_v2 }
0x198a   :  { %2689 = vmatprep.subr.mxu1 %v4834_v3 }
0x198b   :  { %2690 = vmatpush1.msra.mxu1 %v4840_v5 }
0x198c   :  { %2691 = vmatprep.subr.mxu1 %v4846_v7 }
0x198d   :  { %2692 = vmatpush1.msra.mxu1 %v4852_v9 }
0x198e   :  { %2693 = vmatprep.subr.mxu1 %v4858_v10 }
0x198f   :  { %2694 = vmatpush1.msra.mxu1 %v4864_v12 }
0x1990   :  { %2695 = vmatprep.subr.mxu1 %v4870_v13 }
0x1991   :  { %2696 = vmatpush1.msra.mxu1 %v4876_v15 }
0x1992   :  { %3059 = vmatprep.subr.mxu1 %v4762_v1 }
0x1a42   :  { %v2353_v50 = vpop.f32.mrf.mxu1 }
0x1a44   :  { %v2355_v54 = vpop.f32.mrf.mxu1 }
0x1a45   :  { %v2360_v55 = vcombine.low %v2353_v50, %v2355_v54 }
0x1a47   :  { %v2367_v6 = vrot.slane %v2360_v55, %v4553_v59 }
0x1a49   :  { %v2368_v60 = vcombine.high %v2367_v6, %v2367_v6  ;;  %v2375_v61 = vrot.slane %v2367_v6, %v4553_v59 }
0x1a4b   :  { %v2385_v63 = vadd.f32 %v2375_v61, %v2268_v57  ;;  %v2382_v8 = vrot.slane %v2368_v60, %v4553_v59 }
0x1a4d   :  { %2401 = vrot.lane.b32.xlu1 %v2385_v63, %s4311_s16  ;;  %v2386_v14 = vadd.f32 %v2382_v8, %v2270_v11  ;;  %v3814_v21 = vmul.f32 -1.442695, %v2385_v63 }
0x1a4f   :  { %2403 = vrot.lane.b32.xlu0 %v2386_v14, %s4311_s16  ;;  %v3815_v1 = vmul.f32 -1.442695, %v2386_v14  ;;  %4174 = vpow2.f32 %v3814_v21 }
0x1a51   :  { %4176 = vpow2.f32 %v3815_v1 }
0x1a5c   :  { %v4175_v17 = vpop.eup %4174 }
0x1a5d   :  { %v2393_v52 = vadd.f32 1.0, %v4175_v17 }
0x1a5e   :  { %v4177_v18 = vpop.eup %4176 }
0x1a5f   :  { %v2394_v20 = vadd.f32 1.0, %v4177_v18  ;;  %4178 = vrcp.f32 %v2393_v52 }
0x1a6c   :  { %v4179_v41 = vpop.eup %4178 }
0x1a6d   :  { %v2411_v16 = vmul.f32 %v4179_v41, %v5066_v44  ;;  %v2429_v44 = vrot.slane %v4179_v41, 1 }
0x1abf   :  { %v2402_v56 = vpop.permute.xlu1 %2401 }
0x1ac0   :  { %v2405_v36 = vrot.slane %v2402_v56, 1 }
0x1ac1   :  { %v2404_v39 = vpop.permute.xlu0 %2403 }
0x1ac2   :  { %4180 = vtanh.f32 %v2405_v36  ;;  %v2406_v40 = vrot.slane %v2404_v39, 1 }
0x1ac3   :  { %4182 = vrcp.f32 %v2394_v20 }
0x1ac4   :  { %4184 = vtanh.f32 %v2406_v40 }
0x1acf   :  { %v4181_v31 = vpop.eup %4180 }
0x1ad0   :  { %v4183_v43 = vpop.eup %4182  ;;  %v2413_v19 = vmul.f32 %v4181_v31, %v4179_v41 }
0x1ad1   :  { %v4185_v45 = vpop.eup %4184  ;;  %v2412_v25 = vmul.f32 %v4183_v43, %v5070_v49  ;;  %v2430_v48 = vrot.slane %v4183_v43, 1 }
0x1ad2   :  { %2417 = vrot.lane.b32.xlu1 %v2413_v19, %s4311_s16  ;;  %v2414_v28 = vmul.f32 %v4185_v45, %v4183_v43 }
0x1ad4   :  { %2419 = vrot.lane.b32.xlu0 %v2414_v28, %s4311_s16 }
0x1b44   :  { %v2418_v29 = vpop.permute.xlu1 %2417 }
0x1b45   :  { %v5105_v0 = vadd.f32 %v2418_v29, %v2411_v16 }
0x1b46   :  { %v2420_v46 = vpop.permute.xlu0 %2419 }
0x1b47   :  { %4186 = vtanh.f32 %v5105_v0  ;;  %v5109_v37 = vadd.f32 %v2420_v46, %v2412_v25 }
0x1b49   :  { %4188 = vtanh.f32 %v5109_v37 }
0x1b54   :  { %v4187_v38 = vpop.eup %4186 }
0x1b55   :  { %2435 = vrot.lane.b32.xlu1 %v4187_v38, %s4311_s16 }
0x1b56   :  { %v4189_v30 = vpop.eup %4188 }
0x1b57   :  { %2437 = vrot.lane.b32.xlu0 %v4189_v30, %s4311_s16  ;;  %v4270_v30 = vld [vmem:[%s5706_s4 + $0x70] sm:$0xff] }
0x1bc7   :  { %v2436_v47 = vpop.permute.xlu1 %2435 }
0x1bc8   :  { %v2441_v50 = vmul.f32 %v2436_v47, %v2429_v44  ;;  %v4271_v47 = vld [vmem:[%s5706_s4 + $0x68] sm:$0xff]  ;;  %v4272_v44 = vld [vmem:[%s5706_s4 + $0x60] sm:$0xff] }
0x1bc9   :  { %v2438_v32 = vpop.permute.xlu0 %2437 }
0x1bca   :  { %v2442_v54 = vmul.f32 %v2438_v32, %v2430_v48  ;;  %v4273_v48 = vld [vmem:[%s5706_s4 + $0x58] sm:$0xff]  ;;  %v4274_v32 = vld [vmem:[%s5706_s4 + $0x50] sm:$0xff] }
0x1bcc   :  { %v5114_v49 = vcombine.low %v2441_v50, %v2442_v54  ;;  %v4275_v50 = vld [vmem:[%s5706_s4 + $0x48] sm:$0xff]  ;;  %v4276_v54 = vld [vmem:[%s5706_s4 + $0x40] sm:$0xff] }
0x1bce   :  { %v2467_v55 = vrot.slane %v5114_v49, %v4553_v59 }
0x1bd0   :  { %v2474_v6 = vrot.slane %v2467_v55, %v4553_v59  ;;  %v4277_v55 = vld [vmem:[%s5706_s4 + $0x38] sm:$0xff] }
0x1bd2   :  { %3816 = vmatmul.mubr.msk.f32.vlgmr.msra.gmra.mxu0 %vm174_vm0, %v2474_v6  ;;  %v4278_v6 = vld [vmem:[%s5706_s4 + $0x30] sm:$0xff] }
0x1bd3   :  { %2872 = vmatpush1.msra.mxu0 %v4791_v22  ;;  %2919 = vmatprep.mubr.f32.mxu0 %v4307_v4 }
0x1bd4   :  { %2873 = vmatprep.subr.mxu0 %v4798_v26 }
0x1bd5   :  { %2874 = vmatpush1.msra.mxu0 %v4804_v51 }
0x1bd6   :  { %2875 = vmatprep.subr.mxu0 %v4810_v27 }
0x1bd7   :  { %2876 = vmatpush1.msra.mxu0 %v4816_v33 }
0x1bd8   :  { %2877 = vmatprep.subr.mxu0 %v4822_v34 }
0x1bd9   :  { %2878 = vmatpush1.msra.mxu0 %v4828_v2  ;;  %v2458_v2 = vld [vmem:[#allocation2 + $0x14] ss:$8 sm:$0x3] }
0x1bda   :  { %2879 = vmatprep.subr.mxu0 %v4834_v3 }
0x1bdb   :  { %2880 = vmatpush1.msra.mxu0 %v4840_v5 }
0x1bdc   :  { %2881 = vmatprep.subr.mxu0 %v4846_v7  ;;  %v2460_v7 = vld [vmem:[#allocation2 + $0x34] ss:$8 sm:$0x3] }
0x1bdd   :  { %2882 = vmatpush1.msra.mxu0 %v4852_v9 }
0x1bde   :  { %2883 = vmatprep.subr.mxu0 %v4858_v10 }
0x1bdf   :  { %2884 = vmatpush1.msra.mxu0 %v4864_v12 }
0x1be0   :  { %2885 = vmatprep.subr.mxu0 %v4870_v13 }
0x1be1   :  { %2886 = vmatpush1.msra.mxu0 %v4876_v15 }
0x1c92   :  { %v2543_v22 = vpop.f32.mrf.mxu0 }
0x1c94   :  { %v2545_v26 = vpop.f32.mrf.mxu0 }
0x1c95   :  { %v2550_v51 = vcombine.low %v2543_v22, %v2545_v26  ;;  %v4279_v22 = vld [vmem:[%s5706_s4 + $0x28] sm:$0xff]  ;;  %v4280_v26 = vld [vmem:[%s5706_s4 + $0x20] sm:$0xff] }
0x1c97   :  { %v2557_v27 = vrot.slane %v2550_v51, %v4553_v59  ;;  %v4281_v51 = vld [vmem:[%s5706_s4 + $0x18] sm:$0xff] }
0x1c99   :  { %v2558_v33 = vcombine.high %v2557_v27, %v2557_v27  ;;  %v2565_v34 = vrot.slane %v2557_v27, %v4553_v59  ;;  %v4282_v27 = vld [vmem:[%s5706_s4 + $0x10] sm:$0xff] }
0x1c9b   :  { %v2575_v3 = vadd.f32 %v2565_v34, %v2458_v2  ;;  %v2572_v5 = vrot.slane %v2558_v33, %v4553_v59  ;;  %v4283_v33 = vld [vmem:[%s5706_s4 + $0x8] sm:$0xff]  ;;  %v4284_v34 = vld [vmem:[%s5706_s4] sm:$0xff] }
0x1c9d   :  { %2591 = vrot.lane.b32.xlu1 %v2575_v3, %s4311_s16  ;;  %v2576_v9 = vadd.f32 %v2572_v5, %v2460_v7  ;;  %v3817_v10 = vmul.f32 -1.442695, %v2575_v3 }
0x1c9f   :  { %2593 = vrot.lane.b32.xlu0 %v2576_v9, %s4311_s16  ;;  %v3818_v12 = vmul.f32 -1.442695, %v2576_v9  ;;  %4190 = vpow2.f32 %v3817_v10 }
0x1ca1   :  { %4192 = vpow2.f32 %v3818_v12  ;;  %v2646_v12 = vld [vmem:[#allocation2 + $0x15] ss:$8 sm:$0x3] }
0x1cac   :  { %v4191_v13 = vpop.eup %4190 }
0x1cad   :  { %v2583_v60 = vadd.f32 1.0, %v4191_v13 }
0x1cae   :  { %v4193_v15 = vpop.eup %4192 }
0x1caf   :  { %v2584_v61 = vadd.f32 1.0, %v4193_v15  ;;  %4194 = vrcp.f32 %v2583_v60  ;;  %v2648_v60 = vld [vmem:[#allocation2 + $0x35] ss:$8 sm:$0x3] }
0x1cbc   :  { %v4195_v14 = vpop.eup %4194 }
0x1cbd   :  { %v2601_v20 = vmul.f32 %v4195_v14, %v5105_v0  ;;  %v2619_v45 = vrot.slane %v4195_v14, 1 }
0x1d0f   :  { %v2592_v57 = vpop.permute.xlu1 %2591 }
0x1d10   :  { %v2595_v63 = vrot.slane %v2592_v57, 1 }
0x1d11   :  { %v2594_v8 = vpop.permute.xlu0 %2593 }
0x1d12   :  { %4196 = vtanh.f32 %v2595_v63  ;;  %v2596_v11 = vrot.slane %v2594_v8, 1 }
0x1d13   :  { %4198 = vrcp.f32 %v2584_v61 }
0x1d14   :  { %4200 = vtanh.f32 %v2596_v11 }
0x1d1f   :  { %v4197_v21 = vpop.eup %4196 }
0x1d20   :  { %v4199_v1 = vpop.eup %4198  ;;  %v2603_v17 = vmul.f32 %v4197_v21, %v4195_v14 }
0x1d21   :  { %v4201_v18 = vpop.eup %4200  ;;  %v2602_v39 = vmul.f32 %v4199_v1, %v5109_v37  ;;  %v2620_v28 = vrot.slane %v4199_v1, 1 }
0x1d22   :  { %2607 = vrot.lane.b32.xlu1 %v2603_v17, %s4311_s16  ;;  %v2604_v52 = vmul.f32 %v4201_v18, %v4199_v1 }
0x1d24   :  { %2609 = vrot.lane.b32.xlu0 %v2604_v52, %s4311_s16 }
0x1d94   :  { %v2608_v56 = vpop.permute.xlu1 %2607 }
0x1d95   :  { %v5144_v36 = vadd.f32 %v2608_v56, %v2601_v20 }
0x1d96   :  { %v2610_v40 = vpop.permute.xlu0 %2609 }
0x1d97   :  { %4202 = vtanh.f32 %v5144_v36  ;;  %v5148_v41 = vadd.f32 %v2610_v40, %v2602_v39 }
0x1d99   :  { %4204 = vtanh.f32 %v5148_v41 }
0x1da4   :  { %v4203_v31 = vpop.eup %4202 }
0x1da5   :  { %2625 = vrot.lane.b32.xlu1 %v4203_v31, %s4311_s16 }
0x1da6   :  { %v4205_v43 = vpop.eup %4204 }
0x1da7   :  { %2627 = vrot.lane.b32.xlu0 %v4205_v43, %s4311_s16 }
0x1e17   :  { %v2626_v19 = vpop.permute.xlu1 %2625 }
0x1e18   :  { %v2631_v29 = vmul.f32 %v2626_v19, %v2619_v45 }
0x1e19   :  { %v2628_v16 = vpop.permute.xlu0 %2627 }
0x1e1a   :  { %v2632_v0 = vmul.f32 %v2628_v16, %v2620_v28 }
0x1e1c   :  { %v2635_v25 = vcombine.low %v2631_v29, %v2632_v0 }
0x1e1e   :  { %v2642_v46 = vrot.slane %v2635_v25, %v4578_v24  ;;  %v2655_v37 = vrot.slane %v2635_v25, %v4553_v59 }
0x1e20   :  { %v2662_v38 = vrot.slane %v2655_v37, %v4553_v59  ;;  %2644 = vst.msk [vmem:[#allocation3 + $0xc] sm:$0x3] %vm374_vm1, %v2642_v46 }
0x1e22   :  { %3819 = vmatmul.mubr.msk.f32.vlgmr.msra.gmra.mxu1 %vm174_vm0, %v2662_v38 }
0x1e23   :  { %3060 = vmatpush1.msra.mxu1 %v4270_v30  ;;  %3107 = vmatprep.mubr.f32.mxu1 %v4307_v4 }
0x1e24   :  { %3061 = vmatprep.subr.mxu1 %v4271_v47 }
0x1e25   :  { %3062 = vmatpush1.msra.mxu1 %v4272_v44 }
0x1e26   :  { %3063 = vmatprep.subr.mxu1 %v4273_v48 }
0x1e27   :  { %3064 = vmatpush1.msra.mxu1 %v4274_v32 }
0x1e28   :  { %3065 = vmatprep.subr.mxu1 %v4275_v50 }
0x1e29   :  { %3066 = vmatpush1.msra.mxu1 %v4276_v54 }
0x1e2a   :  { %3067 = vmatprep.subr.mxu1 %v4277_v55 }
0x1e2b   :  { %3068 = vmatpush1.msra.mxu1 %v4278_v6 }
0x1e2c   :  { %3069 = vmatprep.subr.mxu1 %v4279_v22 }
0x1e2d   :  { %3070 = vmatpush1.msra.mxu1 %v4280_v26 }
0x1e2e   :  { %3071 = vmatprep.subr.mxu1 %v4281_v51  ;;  %v2836_v51 = vld [vmem:[#allocation2 + $0x16] ss:$8 sm:$0x3] }
0x1e2f   :  { %3072 = vmatpush1.msra.mxu1 %v4282_v27 }
0x1e30   :  { %3073 = vmatprep.subr.mxu1 %v4283_v33 }
0x1e31   :  { %3074 = vmatpush1.msra.mxu1 %v4284_v34  ;;  %v2838_v34 = vld [vmem:[#allocation2 + $0x36] ss:$8 sm:$0x3] }
0x1ee2   :  { %v2731_v2 = vpop.f32.mrf.mxu1 }
0x1ee4   :  { %v2733_v3 = vpop.f32.mrf.mxu1 }
0x1ee5   :  { %v2738_v5 = vcombine.low %v2731_v2, %v2733_v3 }
0x1ee7   :  { %v2745_v7 = vrot.slane %v2738_v5, %v4553_v59 }
0x1ee9   :  { %v2746_v9 = vcombine.high %v2745_v7, %v2745_v7  ;;  %v2753_v10 = vrot.slane %v2745_v7, %v4553_v59 }
0x1eeb   :  { %v2763_v13 = vadd.f32 %v2753_v10, %v2646_v12  ;;  %v2760_v15 = vrot.slane %v2746_v9, %v4553_v59 }
0x1eed   :  { %2779 = vrot.lane.b32.xlu1 %v2763_v13, %s4311_s16  ;;  %v2764_v61 = vadd.f32 %v2760_v15, %v2648_v60  ;;  %v3820_v57 = vmul.f32 -1.442695, %v2763_v13 }
0x1eef   :  { %2781 = vrot.lane.b32.xlu0 %v2764_v61, %s4311_s16  ;;  %v3821_v63 = vmul.f32 -1.442695, %v2764_v61  ;;  %4206 = vpow2.f32 %v3820_v57 }
0x1ef1   :  { %4208 = vpow2.f32 %v3821_v63 }
0x1efc   :  { %v4207_v8 = vpop.eup %4206 }
0x1efd   :  { %v2771_v14 = vadd.f32 1.0, %v4207_v8 }
0x1efe   :  { %v4209_v11 = vpop.eup %4208 }
0x1eff   :  { %v2772_v21 = vadd.f32 1.0, %v4209_v11  ;;  %4210 = vrcp.f32 %v2771_v14 }
0x1f0c   :  { %v4211_v20 = vpop.eup %4210 }
0x1f0d   :  { %v2789_v19 = vmul.f32 %v4211_v20, %v5144_v36  ;;  %v2807_v38 = vrot.slane %v4211_v20, 1 }
0x1f5f   :  { %v2780_v1 = vpop.permute.xlu1 %2779 }
0x1f60   :  { %v2783_v17 = vrot.slane %v2780_v1, 1 }
0x1f61   :  { %v2782_v18 = vpop.permute.xlu0 %2781 }
0x1f62   :  { %4212 = vtanh.f32 %v2783_v17  ;;  %v2784_v52 = vrot.slane %v2782_v18, 1 }
0x1f63   :  { %4214 = vrcp.f32 %v2772_v21 }
0x1f64   :  { %4216 = vtanh.f32 %v2784_v52 }
0x1f6f   :  { %v4213_v56 = vpop.eup %4212 }
0x1f70   :  { %v4215_v39 = vpop.eup %4214  ;;  %v2791_v40 = vmul.f32 %v4213_v56, %v4211_v20 }
0x1f71   :  { %v4217_v31 = vpop.eup %4216  ;;  %v2790_v16 = vmul.f32 %v4215_v39, %v5148_v41  ;;  %v2808_v30 = vrot.slane %v4215_v39, 1 }
0x1f72   :  { %2795 = vrot.lane.b32.xlu1 %v2791_v40, %s4311_s16  ;;  %v2792_v43 = vmul.f32 %v4217_v31, %v4215_v39 }
0x1f74   :  { %2797 = vrot.lane.b32.xlu0 %v2792_v43, %s4311_s16 }
0x1fe4   :  { %v2796_v45 = vpop.permute.xlu1 %2795 }
0x1fe5   :  { %v2801_v28 = vadd.f32 %v2796_v45, %v2789_v19 }
0x1fe6   :  { %v2798_v29 = vpop.permute.xlu0 %2797 }
0x1fe7   :  { %4218 = vtanh.f32 %v2801_v28  ;;  %v2802_v0 = vadd.f32 %v2798_v29, %v2790_v16 }
0x1fe9   :  { %4220 = vtanh.f32 %v2802_v0 }
0x1ff4   :  { %v4219_v25 = vpop.eup %4218 }
0x1ff5   :  { %2813 = vrot.lane.b32.xlu1 %v4219_v25, %s4311_s16 }
0x1ff6   :  { %v4221_v46 = vpop.eup %4220 }
0x1ff7   :  { %2815 = vrot.lane.b32.xlu0 %v4221_v46, %s4311_s16 }
0x2067   :  { %v2814_v37 = vpop.permute.xlu1 %2813 }
0x2068   :  { %v2819_v44 = vmul.f32 %v2814_v37, %v2807_v38 }
0x2069   :  { %v2816_v47 = vpop.permute.xlu0 %2815 }
0x206a   :  { %v2820_v36 = vmul.f32 %v2816_v47, %v2808_v30 }
0x206c   :  { %v5215_v48 = vcombine.low %v2819_v44, %v2820_v36 }
0x206e   :  { %v2845_v41 = vrot.slane %v5215_v48, %v4553_v59 }
0x2070   :  { %v2852_v32 = vrot.slane %v2845_v41, %v4553_v59  ;;  %v3024_v41 = vld [vmem:[#allocation2 + $0x17] ss:$8 sm:$0x3] }
0x2072   :  { %3822 = vmatmul.mubr.msk.f32.vlgmr.msra.gmra.mxu0 %vm174_vm0, %v2852_v32 }
0x2132   :  { %v2921_v50 = vpop.f32.mrf.mxu0 }
0x2134   :  { %v2923_v54 = vpop.f32.mrf.mxu0 }
0x2135   :  { %v2928_v55 = vcombine.low %v2921_v50, %v2923_v54  ;;  %v3026_v54 = vld [vmem:[#allocation2 + $0x37] ss:$8 sm:$0x3] }
0x2137   :  { %v2935_v6 = vrot.slane %v2928_v55, %v4553_v59 }
0x2139   :  { %v2936_v22 = vcombine.high %v2935_v6, %v2935_v6  ;;  %v2943_v26 = vrot.slane %v2935_v6, %v4553_v59 }
0x213b   :  { %v2953_v27 = vadd.f32 %v2943_v26, %v2836_v51  ;;  %v2950_v33 = vrot.slane %v2936_v22, %v4553_v59 }
0x213d   :  { %2969 = vrot.lane.b32.xlu1 %v2953_v27, %s4311_s16  ;;  %v2954_v2 = vadd.f32 %v2950_v33, %v2838_v34  ;;  %v3823_v3 = vmul.f32 -1.442695, %v2953_v27 }
0x213f   :  { %2971 = vrot.lane.b32.xlu0 %v2954_v2, %s4311_s16  ;;  %v3824_v5 = vmul.f32 -1.442695, %v2954_v2  ;;  %4222 = vpow2.f32 %v3823_v3 }
0x2141   :  { %4224 = vpow2.f32 %v3824_v5 }
0x214c   :  { %v4223_v7 = vpop.eup %4222 }
0x214d   :  { %v2961_v10 = vadd.f32 1.0, %v4223_v7 }
0x214e   :  { %v4225_v9 = vpop.eup %4224 }
0x214f   :  { %v2962_v12 = vadd.f32 1.0, %v4225_v9  ;;  %4226 = vrcp.f32 %v2961_v10 }
0x215c   :  { %v4227_v57 = vpop.eup %4226 }
0x215d   :  { %v2979_v1 = vmul.f32 %v4227_v57, %v2801_v28  ;;  %v2997_v43 = vrot.slane %v4227_v57, 1 }
0x21af   :  { %v2970_v13 = vpop.permute.xlu1 %2969 }
0x21b0   :  { %v2973_v15 = vrot.slane %v2970_v13, 1 }
0x21b1   :  { %v2972_v60 = vpop.permute.xlu0 %2971 }
0x21b2   :  { %4228 = vtanh.f32 %v2973_v15  ;;  %v2974_v61 = vrot.slane %v2972_v60, 1  ;;  %v3246_v15 = vld [vmem:[%s5708_s6 + $0xf8] sm:$0xff] }
0x21b3   :  { %4230 = vrcp.f32 %v2962_v12  ;;  %v3230_v60 = vld [vmem:[%s5708_s6 + $0x78] sm:$0xff]  ;;  %3832 = vmatprep.subr.mxu0 %v3246_v15  ;;  %v3268_v15 = vld [vmem:[%s5708_s6 + $0x1a8] sm:$0xff] }
0x21b4   :  { %4232 = vtanh.f32 %v2974_v61  ;;  %v3245_v61 = vld [vmem:[%s5708_s6 + $0xf0] sm:$0xff]  ;;  %3833 = vmatpush3.msra.mxu0 %v3230_v60  ;;  %v3219_v60 = vld [vmem:[%s5708_s6 + $0x20] sm:$0xff] }
0x21b5   :  { %3834 = vmatprep.subr.mxu0 %v3245_v61  ;;  %v3252_v61 = vld [vmem:[%s5708_s6 + $0x128] sm:$0xff] }
0x21bf   :  { %v4229_v63 = vpop.eup %4228 }
0x21c0   :  { %v4231_v8 = vpop.eup %4230  ;;  %v2981_v11 = vmul.f32 %v4229_v63, %v4227_v57  ;;  %v3278_v57 = vld [vmem:[%s5708_s6 + $0x1f8] sm:$0xff]  ;;  %v3229_v63 = vld [vmem:[%s5708_s6 + $0x70] sm:$0xff] }
0x21c1   :  { %v4233_v14 = vpop.eup %4232  ;;  %v2980_v52 = vmul.f32 %v4231_v8, %v2802_v0  ;;  %v2998_v19 = vrot.slane %v4231_v8, 1  ;;  %3867 = vmatprep.subr.mxu1 %v3278_v57  ;;  %3835 = vmatpush3.msra.mxu0 %v3229_v63  ;;  %v3234_v57 = vld [vmem:[%s5708_s6 + $0x98] sm:$0xff]  ;;  %v3267_v63 = vld [vmem:[%s5708_s6 + $0x1a0] sm:$0xff] }
0x21c2   :  { %2985 = vrot.lane.b32.xlu1 %v2981_v11, %s4311_s16  ;;  %v2982_v21 = vmul.f32 %v4233_v14, %v4231_v8  ;;  %v3262_v8 = vld [vmem:[%s5708_s6 + $0x178] sm:$0xff]  ;;  %v3244_v11 = vld [vmem:[%s5708_s6 + $0xe8] sm:$0xff]  ;;  %v3277_v14 = vld [vmem:[%s5708_s6 + $0x1f0] sm:$0xff] }
0x21c3   :  { %3836 = vmatprep.subr.mxu0 %v3244_v11  ;;  %v3251_v11 = vld [vmem:[%s5708_s6 + $0x120] sm:$0xff] }
0x21c4   :  { %2987 = vrot.lane.b32.xlu0 %v2982_v21, %s4311_s16  ;;  %v3228_v21 = vld [vmem:[%s5708_s6 + $0x68] sm:$0xff] }
0x21c5   :  { %3837 = vmatpush3.msra.mxu0 %v3228_v21  ;;  %v3266_v21 = vld [vmem:[%s5708_s6 + $0x198] sm:$0xff] }
0x2234   :  { %v2986_v17 = vpop.permute.xlu1 %2985 }
0x2235   :  { %v5228_v18 = vadd.f32 %v2986_v17, %v2979_v1  ;;  %v3261_v1 = vld [vmem:[%s5708_s6 + $0x170] sm:$0xff]  ;;  %v3276_v17 = vld [vmem:[%s5708_s6 + $0x1e8] sm:$0xff] }
0x2236   :  { %v2988_v20 = vpop.permute.xlu0 %2987 }
0x2237   :  { %4234 = vtanh.f32 %v5228_v18  ;;  %v5231_v56 = vadd.f32 %v2988_v20, %v2980_v52  ;;  %v3243_v52 = vld [vmem:[%s5708_s6 + $0xe0] sm:$0xff]  ;;  %v3260_v20 = vld [vmem:[%s5708_s6 + $0x168] sm:$0xff] }
0x2238   :  { %3838 = vmatprep.subr.mxu0 %v3243_v52  ;;  %v3232_v52 = vld [vmem:[%s5708_s6 + $0x88] sm:$0xff] }
0x2239   :  { %4236 = vtanh.f32 %v5231_v56 }
0x2244   :  { %v4235_v39 = vpop.eup %4234 }
0x2245   :  { %3003 = vrot.lane.b32.xlu1 %v4235_v39, %s4311_s16  ;;  %v3227_v39 = vld [vmem:[%s5708_s6 + $0x60] sm:$0xff] }
0x2246   :  { %v4237_v40 = vpop.eup %4236  ;;  %3839 = vmatpush3.msra.mxu0 %v3227_v39  ;;  %v3216_v39 = vld [vmem:[%s5708_s6 + $0x8] sm:$0xff] }
0x2247   :  { %3005 = vrot.lane.b32.xlu0 %v4237_v40, %s4311_s16  ;;  %v3275_v40 = vld [vmem:[%s5708_s6 + $0x1e0] sm:$0xff] }
0x22b7   :  { %v3004_v31 = vpop.permute.xlu1 %3003 }
0x22b8   :  { %v3009_v28 = vmul.f32 %v3004_v31, %v2997_v43  ;;  %v3242_v31 = vld [vmem:[%s5708_s6 + $0xd8] sm:$0xff] }
0x22b9   :  { %v3006_v45 = vpop.permute.xlu0 %3005  ;;  %3840 = vmatprep.subr.mxu0 %v3242_v31  ;;  %v3231_v31 = vld [vmem:[%s5708_s6 + $0x80] sm:$0xff] }
0x22ba   :  { %v3010_v16 = vmul.f32 %v3006_v45, %v2998_v19 }
0x22bc   :  { %v3013_v29 = vcombine.low %v3009_v28, %v3010_v16 }
0x22be   :  { %v3020_v0 = vrot.slane %v3013_v29, %v4578_v24  ;;  %v3033_v25 = vrot.slane %v3013_v29, %v4553_v59 }
0x22c0   :  { %v3040_v46 = vrot.slane %v3033_v25, %v4553_v59  ;;  %3022 = vst.msk [vmem:[#allocation3 + $0xe] sm:$0x3] %vm374_vm1, %v3020_v0  ;;  %v3226_v0 = vld [vmem:[%s5708_s6 + $0x58] sm:$0xff]  ;;  %v3259_v25 = vld [vmem:[%s5708_s6 + $0x160] sm:$0xff] }
0x22c1   :  { %3841 = vmatpush3.msra.mxu0 %v3226_v0 }
0x22c2   :  { %3825 = vmatmul.mubr.msk.f32.vlgmr.msra.gmra.mxu1 %vm174_vm0, %v3040_v46  ;;  %v3225_v46 = vld [vmem:[%s5708_s6 + $0x50] sm:$0xff] }
0x22c3   :  { %3868 = vmatpush3.msra.mxu1 %v3262_v8  ;;  %v3218_v8 = vld [vmem:[%s5708_s6 + $0x18] sm:$0xff] }
0x22c4   :  { %3869 = vmatprep.subr.mxu1 %v3277_v14  ;;  %v3233_v14 = vld [vmem:[%s5708_s6 + $0x90] sm:$0xff] }
0x22c5   :  { %3870 = vmatpush3.msra.mxu1 %v3261_v1  ;;  %v3217_v1 = vld [vmem:[%s5708_s6 + $0x10] sm:$0xff] }
0x22c6   :  { %3871 = vmatprep.subr.mxu1 %v3276_v17  ;;  %v3250_v17 = vld [vmem:[%s5708_s6 + $0x118] sm:$0xff] }
0x22c7   :  { %3872 = vmatpush3.msra.mxu1 %v3260_v20  ;;  %v3265_v20 = vld [vmem:[%s5708_s6 + $0x190] sm:$0xff] }
0x22c8   :  { %3873 = vmatprep.subr.mxu1 %v3275_v40  ;;  %v3249_v40 = vld [vmem:[%s5708_s6 + $0x110] sm:$0xff] }
0x22c9   :  { %3874 = vmatpush3.msra.mxu1 %v3259_v25 }
0x2382   :  { %v3109_v37 = vpop.f32.mrf.mxu1 }
0x2384   :  { %v3111_v38 = vpop.f32.mrf.mxu1 }
0x2385   :  { %v3116_v30 = vcombine.low %v3109_v37, %v3111_v38  ;;  %v3258_v37 = vld [vmem:[%s5708_s6 + $0x158] sm:$0xff]  ;;  %v3240_v38 = vld [vmem:[%s5708_s6 + $0xc8] sm:$0xff] }
0x2387   :  { %v3123_v47 = vrot.slane %v3116_v30, %v4553_v59  ;;  %v3273_v30 = vld [vmem:[%s5708_s6 + $0x1d0] sm:$0xff] }
0x2389   :  { %v3124_v44 = vcombine.high %v3123_v47, %v3123_v47  ;;  %v3131_v36 = vrot.slane %v3123_v47, %v4553_v59  ;;  %v3224_v47 = vld [vmem:[%s5708_s6 + $0x48] sm:$0xff] }
0x238b   :  { %v3138_v32 = vrot.slane %v3124_v44, %v4553_v59  ;;  %v3141_v50 = vadd.f32 %v3131_v36, %v3024_v41  ;;  %v3257_v44 = vld [vmem:[%s5708_s6 + $0x150] sm:$0xff]  ;;  %v3239_v36 = vld [vmem:[%s5708_s6 + $0xc0] sm:$0xff]  ;;  %v3272_v41 = vld [vmem:[%s5708_s6 + $0x1c8] sm:$0xff] }
0x238d   :  { %3157 = vrot.lane.b32.xlu1 %v3141_v50, %s4311_s16  ;;  %v3142_v55 = vadd.f32 %v3138_v32, %v3026_v54  ;;  %v3826_v6 = vmul.f32 -1.442695, %v3141_v50  ;;  %v3223_v32 = vld [vmem:[%s5708_s6 + $0x40] sm:$0xff]  ;;  %v3256_v50 = vld [vmem:[%s5708_s6 + $0x148] sm:$0xff]  ;;  %v3238_v54 = vld [vmem:[%s5708_s6 + $0xb8] sm:$0xff] }
0x238f   :  { %3159 = vrot.lane.b32.xlu0 %v3142_v55, %s4311_s16  ;;  %v3827_v22 = vmul.f32 -1.442695, %v3142_v55  ;;  %4238 = vpow2.f32 %v3826_v6  ;;  %v3271_v55 = vld [vmem:[%s5708_s6 + $0x1c0] sm:$0xff]  ;;  %v3222_v6 = vld [vmem:[%s5708_s6 + $0x38] sm:$0xff] }
0x2391   :  { %4240 = vpow2.f32 %v3827_v22  ;;  %v3255_v22 = vld [vmem:[%s5708_s6 + $0x140] sm:$0xff] }
0x239c   :  { %v4239_v26 = vpop.eup %4238 }
0x239d   :  { %v3149_v27 = vadd.f32 1.0, %v4239_v26  ;;  %v3237_v26 = vld [vmem:[%s5708_s6 + $0xb0] sm:$0xff] }
0x239e   :  { %v4241_v51 = vpop.eup %4240 }
0x239f   :  { %v3150_v33 = vadd.f32 1.0, %v4241_v51  ;;  %4242 = vrcp.f32 %v3149_v27  ;;  %v3270_v51 = vld [vmem:[%s5708_s6 + $0x1b8] sm:$0xff]  ;;  %v3221_v27 = vld [vmem:[%s5708_s6 + $0x30] sm:$0xff] }
0x23ac   :  { %v5246_v5 = vpop.eup %4242 }
0x23ad   :  { %v3167_v43 = vmul.f32 %v5246_v5, %v5228_v18  ;;  %v3241_v18 = vld [vmem:[%s5708_s6 + $0xd0] sm:$0xff]  ;;  %v3185_v25 = vrot.slane %v5246_v5, 1 }
0x23ae   :  { %3842 = vmatprep.subr.mxu0 %v3241_v18 }
0x23af   :  { %3843 = vmatpush3.msra.mxu0 %v3225_v46 }
0x23b0   :  { %3844 = vmatprep.subr.mxu0 %v3240_v38 }
0x23b1   :  { %3845 = vmatpush3.msra.mxu0 %v3224_v47 }
0x23b2   :  { %3846 = vmatprep.subr.mxu0 %v3239_v36  ;;  %v4313_v36 = vmov 1983009808  }
0x23b3   :  { %3847 = vmatpush3.msra.mxu0 %v3223_v32 }
0x23b4   :  { %3848 = vmatprep.subr.mxu0 %v3238_v54 }
0x23b5   :  { %3849 = vmatpush3.msra.mxu0 %v3222_v6 }
0x23b6   :  { %3850 = vmatprep.subr.mxu0 %v3237_v26 }
0x23b7   :  { %3851 = vmatpush3.msra.mxu0 %v3221_v27 }
0x23ff   :  { %v3158_v34 = vpop.permute.xlu1 %3157 }
0x2400   :  { %v3161_v2 = vrot.slane %v3158_v34, 1  ;;  %v3236_v34 = vld [vmem:[%s5708_s6 + $0xa8] sm:$0xff] }
0x2401   :  { %v3160_v3 = vpop.permute.xlu0 %3159  ;;  %3852 = vmatprep.subr.mxu0 %v3236_v34 }
0x2402   :  { %4244 = vtanh.f32 %v3161_v2  ;;  %v3162_v59 = vrot.slane %v3160_v3, 1  ;;  %v3269_v3 = vld [vmem:[%s5708_s6 + $0x1b0] sm:$0xff] }
0x2403   :  { %4246 = vrcp.f32 %v3150_v33  ;;  %v3254_v33 = vld [vmem:[%s5708_s6 + $0x138] sm:$0xff] }
0x2404   :  { %4248 = vtanh.f32 %v3162_v59  ;;  %v3220_v59 = vld [vmem:[%s5708_s6 + $0x28] sm:$0xff] }
0x2405   :  { %3853 = vmatpush3.msra.mxu0 %v3220_v59  ;;  %v3308_v59 = vld [vmem:[%s5708_s6 + $0x2e8] sm:$0xff] }
0x240f   :  { %v4245_v7 = vpop.eup %4244 }
0x2410   :  { %v5248_v9 = vpop.eup %4246  ;;  %v3169_v10 = vmul.f32 %v4245_v7, %v5246_v5  ;;  %v3253_v7 = vld [vmem:[%s5708_s6 + $0x130] sm:$0xff] }
0x2411   :  { %v4249_v12 = vpop.eup %4248  ;;  %v3168_v28 = vmul.f32 %v5248_v9, %v5231_v56  ;;  %v3274_v56 = vld [vmem:[%s5708_s6 + $0x1d8] sm:$0xff]  ;;  %v3186_v18 = vrot.slane %v5248_v9, 1 }
0x2412   :  { %3173 = vrot.lane.b32.xlu1 %v3169_v10, %s4311_s16  ;;  %v3170_v13 = vmul.f32 %v4249_v12, %v5248_v9  ;;  %3875 = vmatprep.subr.mxu1 %v3274_v56  ;;  %v3235_v12 = vld [vmem:[%s5708_s6 + $0xa0] sm:$0xff] }
0x2413   :  { %3876 = vmatpush3.msra.mxu1 %v3258_v37  ;;  %3854 = vmatprep.subr.mxu0 %v3235_v12  ;;  %v3325_v12 = vld [vmem:[%s5708_s6 + $0x370] sm:$0xff] }
0x2414   :  { %3175 = vrot.lane.b32.xlu0 %v3170_v13, %s4311_s16  ;;  %3877 = vmatprep.subr.mxu1 %v3273_v30  ;;  %v561_v13 = vrot.slane %v4619_v58, %v4578_v24  ;;  %v940_v58 = vrot.slane %v4698_v42, %v4578_v24  ;;  %v1318_v42 = vrot.slane %v4782_v62, %v4578_v24 }
0x2415   :  { %3878 = vmatpush3.msra.mxu1 %v3257_v44  ;;  %3855 = vmatpush3.msra.mxu0 %v3219_v60  ;;  %v1696_v62 = vrot.slane %v4944_v53, %v4578_v24  ;;  %v2074_v53 = vrot.slane %v5035_v35, %v4578_v24  ;;  %v2452_v35 = vrot.slane %v5114_v49, %v4578_v24  ;;  %v3291_v60 = vld [vmem:[%s5708_s6 + $0x260] sm:$0xff] }
0x2416   :  { %3879 = vmatprep.subr.mxu1 %v3272_v41  ;;  %3856 = vmatprep.subr.mxu0 %v3234_v57  ;;  %v2830_v49 = vrot.slane %v5215_v48, %v4578_v24  ;;  %v3247_v48 = vld [vmem:[%s5708_s6 + $0x100] sm:$0xff]  ;;  %v3354_v41 = vunpack.c.l.s4 %v4313_v36  ;;  %v3297_v36 = vld [vmem:[%s5708_s6 + $0x290] sm:$0xff] }
0x2417   :  { %3880 = vmatpush3.msra.mxu1 %v3256_v50  ;;  %3857 = vmatpush3.msra.mxu0 %v3218_v8  ;;  %v3339_v57 = vld [vmem:[%s5708_s6 + $0x3e0] sm:$0xff] }
0x2418   :  { %3881 = vmatprep.subr.mxu1 %v3271_v55  ;;  %3858 = vmatprep.subr.mxu0 %v3233_v14  ;;  %v3355_v9 = vunpack.c.0.s8 %v3354_v41  ;;  %v3323_v8 = vld [vmem:[%s5708_s6 + $0x360] sm:$0xff]  ;;  %v3289_v14 = vld [vmem:[%s5708_s6 + $0x250] sm:$0xff]  ;;  %v3330_v41 = vld [vmem:[%s5708_s6 + $0x398] sm:$0xff] }
0x2419   :  { %3882 = vmatpush3.msra.mxu1 %v3255_v22  ;;  %3859 = vmatpush3.msra.mxu0 %v3217_v1  ;;  %v3337_v1 = vld [vmem:[%s5708_s6 + $0x3d0] sm:$0xff] }
0x241a   :  { %3883 = vmatprep.subr.mxu1 %v3270_v51  ;;  %3860 = vmatprep.subr.mxu0 %v3232_v52  ;;  %v3321_v52 = vld [vmem:[%s5708_s6 + $0x350] sm:$0xff] }
0x241b   :  { %3884 = vmatpush3.msra.mxu1 %v3254_v33  ;;  %3861 = vmatpush3.msra.mxu0 %v3216_v39  ;;  %v3294_v33 = vld [vmem:[%s5708_s6 + $0x278] sm:$0xff]  ;;  %v3287_v39 = vld [vmem:[%s5708_s6 + $0x240] sm:$0xff] }
0x241c   :  { %3885 = vmatprep.subr.mxu1 %v3269_v3  ;;  %3862 = vmatprep.subr.mxu0 %v3231_v31  ;;  %v3326_v3 = vld [vmem:[%s5708_s6 + $0x378] sm:$0xff]  ;;  %v3335_v31 = vld [vmem:[%s5708_s6 + $0x3c0] sm:$0xff] }
0x241d   :  { %3886 = vmatpush3.msra.mxu1 %v3253_v7  ;;  %v3341_v7 = vld [vmem:[%s5708_s6 + $0x3f0] sm:$0xff] }
0x241e   :  { %3887 = vmatprep.subr.mxu1 %v3268_v15  ;;  %v3340_v15 = vld [vmem:[%s5708_s6 + $0x3e8] sm:$0xff] }
0x241f   :  { %3888 = vmatpush3.msra.mxu1 %v3252_v61  ;;  %v3324_v61 = vld [vmem:[%s5708_s6 + $0x368] sm:$0xff] }
0x2420   :  { %3889 = vmatprep.subr.mxu1 %v3267_v63  ;;  %v3290_v63 = vld [vmem:[%s5708_s6 + $0x258] sm:$0xff] }
0x2421   :  { %3890 = vmatpush3.msra.mxu1 %v3251_v11  ;;  %v3338_v11 = vld [vmem:[%s5708_s6 + $0x3d8] sm:$0xff] }
0x2422   :  { %3891 = vmatprep.subr.mxu1 %v3266_v21  ;;  %v3322_v21 = vld [vmem:[%s5708_s6 + $0x358] sm:$0xff] }
0x2423   :  { %3892 = vmatpush3.msra.mxu1 %v3250_v17  ;;  %v3288_v17 = vld [vmem:[%s5708_s6 + $0x248] sm:$0xff] }
0x2424   :  { %3893 = vmatprep.subr.mxu1 %v3265_v20  ;;  %v3336_v20 = vld [vmem:[%s5708_s6 + $0x3c8] sm:$0xff] }
0x2425   :  { %3894 = vmatpush3.msra.mxu1 %v3249_v40  ;;  %v3320_v40 = vld [vmem:[%s5708_s6 + $0x348] sm:$0xff] }
0x2484   :  { %v3174_v19 = vpop.permute.xlu1 %3173 }
0x2485   :  { %v3179_v45 = vadd.f32 %v3174_v19, %v3167_v43  ;;  %v3264_v43 = vld [vmem:[%s5708_s6 + $0x188] sm:$0xff]  ;;  %v3215_v19 = vld [vmem:[%s5708_s6] sm:$0xff] }
0x2486   :  { %v3176_v16 = vpop.permute.xlu0 %3175  ;;  %3895 = vmatprep.subr.mxu1 %v3264_v43  ;;  %3863 = vmatpush3.msra.mxu0 %v3215_v19  ;;  %v3286_v43 = vld [vmem:[%s5708_s6 + $0x238] sm:$0xff]  ;;  %v3319_v19 = vld [vmem:[%s5708_s6 + $0x340] sm:$0xff] }
0x2487   :  { %4250 = vtanh.f32 %v3179_v45  ;;  %v3180_v29 = vadd.f32 %v3176_v16, %v3168_v28  ;;  %v3248_v45 = vld [vmem:[%s5708_s6 + $0x108] sm:$0xff]  ;;  %v3310_v28 = vld [vmem:[%s5708_s6 + $0x2f8] sm:$0xff]  ;;  %v3263_v16 = vld [vmem:[%s5708_s6 + $0x180] sm:$0xff] }
0x2488   :  { %3896 = vmatpush3.msra.mxu1 %v3248_v45  ;;  %3902 = vmatprep.subr.mxu0 %v3310_v28  ;;  %v3334_v45 = vld [vmem:[%s5708_s6 + $0x3b8] sm:$0xff]  ;;  %v3285_v28 = vld [vmem:[%s5708_s6 + $0x230] sm:$0xff] }
0x2489   :  { %4252 = vtanh.f32 %v3180_v29  ;;  %v3342_v29 = vld [vmem:[%s5708_s6 + $0x3f8] sm:$0xff]  ;;  %3897 = vmatprep.subr.mxu1 %v3263_v16 }
0x248a   :  { %3898 = vmatpush3.msra.mxu1 %v3247_v48  ;;  %v3318_v16 = vld [vmem:[%s5708_s6 + $0x338] sm:$0xff]  ;;  %v3300_v48 = vld [vmem:[%s5708_s6 + $0x2a8] sm:$0xff] }
0x248b   :  { %3937 = vmatprep.subr.mxu1 %v3342_v29  ;;  %v3333_v29 = vld [vmem:[%s5708_s6 + $0x3b0] sm:$0xff] }
0x2494   :  { %v4251_v2 = vpop.eup %4250 }
0x2495   :  { %3191 = vrot.lane.b32.xlu1 %v4251_v2, %s4311_s16  ;;  %v3293_v2 = vld [vmem:[%s5708_s6 + $0x270] sm:$0xff] }
0x2496   :  { %v4253_v10 = vpop.eup %4252 }
0x2497   :  { %3193 = vrot.lane.b32.xlu0 %v4253_v10, %s4311_s16  ;;  %v3292_v10 = vld [vmem:[%s5708_s6 + $0x268] sm:$0xff] }
0x2499   :  { %562 = vrot.lane.b32.xlu1 %v561_v13, %s4311_s16  ;;  %v3307_v13 = vld [vmem:[%s5708_s6 + $0x2e0] sm:$0xff] }
0x249b   :  { %941 = vrot.lane.b32.xlu0 %v940_v58, %s4311_s16  ;;  %v3306_v58 = vld [vmem:[%s5708_s6 + $0x2d8] sm:$0xff] }
0x249d   :  { %1319 = vrot.lane.b32.xlu1 %v1318_v42, %s4311_s16  ;;  %v3305_v42 = vld [vmem:[%s5708_s6 + $0x2d0] sm:$0xff] }
0x249f   :  { %1697 = vrot.lane.b32.xlu0 %v1696_v62, %s4311_s16  ;;  %v3304_v62 = vld [vmem:[%s5708_s6 + $0x2c8] sm:$0xff] }
0x24a1   :  { %2075 = vrot.lane.b32.xlu1 %v2074_v53, %s4311_s16  ;;  %v3303_v53 = vld [vmem:[%s5708_s6 + $0x2c0] sm:$0xff] }
0x24a3   :  { %2453 = vrot.lane.b32.xlu0 %v2452_v35, %s4311_s16  ;;  %v3302_v35 = vld [vmem:[%s5708_s6 + $0x2b8] sm:$0xff] }
0x24a5   :  { %2831 = vrot.lane.b32.xlu1 %v2830_v49, %s4311_s16  ;;  %v3301_v49 = vld [vmem:[%s5708_s6 + $0x2b0] sm:$0xff] }
0x2507   :  { %v3192_v0 = vpop.permute.xlu1 %3191 }
0x2508   :  { %v3197_v46 = vmul.f32 %v3192_v0, %v3185_v25  ;;  %v3284_v0 = vld [vmem:[%s5708_s6 + $0x228] sm:$0xff]  ;;  %v3317_v25 = vld [vmem:[%s5708_s6 + $0x330] sm:$0xff] }
0x2509   :  { %v3194_v56 = vpop.permute.xlu0 %3193 }
0x250a   :  { %v3198_v37 = vmul.f32 %v3194_v56, %v3186_v18  ;;  %v3299_v18 = vld [vmem:[%s5708_s6 + $0x2a0] sm:$0xff]  ;;  %v3332_v56 = vld [vmem:[%s5708_s6 + $0x3a8] sm:$0xff] }
0x250b   :  { %v563_v38 = vpop.permute.xlu1 %562 }
0x250c   :  { %v3201_v30 = vcombine.low %v3197_v46, %v3198_v37  ;;  %566 = vst.msk [vmem:[#allocation3] sm:$0x3] %vm565_vm2, %v563_v38  ;;  %v3283_v46 = vld [vmem:[%s5708_s6 + $0x220] sm:$0xff]  ;;  %v3316_v37 = vld [vmem:[%s5708_s6 + $0x328] sm:$0xff]  ;;  %v3298_v38 = vld [vmem:[%s5708_s6 + $0x298] sm:$0xff] }
0x250d   :  { %v942_v47 = vpop.permute.xlu0 %941 }
0x250e   :  { %v3208_v44 = vrot.slane %v3201_v30, %v4578_v24  ;;  %944 = vst.msk [vmem:[#allocation3 + $0x2] sm:$0x3] %vm565_vm2, %v942_v47  ;;  %v5490_v24 = vsub.s32 %v3355_v9, %v4515_v23  ;;  %v3309_v23 = vld [vmem:[%s5708_s6 + $0x2f0] sm:$0xff]  ;;  %v3331_v30 = vld [vmem:[%s5708_s6 + $0x3a0] sm:$0xff]  ;;  %v3282_v47 = vld [vmem:[%s5708_s6 + $0x218] sm:$0xff] }
0x250f   :  { %v1320_v32 = vpop.permute.xlu1 %1319  ;;  %v3296_v9 = vld [vmem:[%s5708_s6 + $0x288] sm:$0xff] }
0x2510   :  { %1322 = vst.msk [vmem:[#allocation3 + $0x4] sm:$0x3] %vm565_vm2, %v1320_v32  ;;  %3209 = vrot.lane.b32.xlu0 %v3208_v44, %s4311_s16  ;;  %v3315_v44 = vld [vmem:[%s5708_s6 + $0x320] sm:$0xff]  ;;  %v3281_v32 = vld [vmem:[%s5708_s6 + $0x210] sm:$0xff] }
0x2511   :  { %v1698_v5 = vpop.permute.xlu0 %1697 }
0x2512   :  { %1700 = vst.msk [vmem:[#allocation3 + $0x6] sm:$0x3] %vm565_vm2, %v1698_v5  ;;  %v3314_v5 = vld [vmem:[%s5708_s6 + $0x318] sm:$0xff] }
0x2513   :  { %v2076_v50 = vpop.permute.xlu1 %2075 }
0x2514   :  { %2078 = vst.msk [vmem:[#allocation3 + $0x8] sm:$0x3] %vm565_vm2, %v2076_v50  ;;  %v3329_v50 = vld [vmem:[%s5708_s6 + $0x390] sm:$0xff] }
0x2515   :  { %v2454_v54 = vpop.permute.xlu0 %2453 }
0x2516   :  { %2456 = vst.msk [vmem:[#allocation3 + $0xa] sm:$0x3] %vm565_vm2, %v2454_v54  ;;  %v3280_v54 = vld [vmem:[%s5708_s6 + $0x208] sm:$0xff] }
0x2517   :  { %v2832_v55 = vpop.permute.xlu1 %2831 }
0x2518   :  { %2834 = vst.msk [vmem:[#allocation3 + $0xc] sm:$0x3] %vm565_vm2, %v2832_v55  ;;  %v3313_v55 = vld [vmem:[%s5708_s6 + $0x310] sm:$0xff] }
0x2519   :  { %v3213_v6 = vld [vmem:[#allocation3] sm:$0xff] }
0x251a   :  { %v3359_v22 = vrot.slane %v3213_v6, %v5490_v24  ;;  %v3352_v26 = vcombine.high %v3213_v6, %v3213_v6  ;;  %v3295_v6 = vld [vmem:[%s5708_s6 + $0x280] sm:$0xff] }
0x251c   :  { %v3367_v51 = vcombine.high %v3359_v22, %v3359_v22  ;;  %v3366_v27 = vrot.slane %v3352_v26, %v5490_v24  ;;  %v3279_v26 = vld [vmem:[%s5708_s6 + $0x200] sm:$0xff] }
0x251e   :  { %3458 = vmatprep.mubr.f32.mxu0 %v3367_v51  ;;  %v3368_v34 = vcombine.high %v3366_v27, %v3366_v27  ;;  %v3312_v51 = vld [vmem:[%s5708_s6 + $0x308] sm:$0xff] }
0x251f   :  { %3459 = vmatmul.mubr.f32.vlgmr.msra.gmra.mxu0 %v3359_v22  ;;  %v3328_v22 = vld [vmem:[%s5708_s6 + $0x388] sm:$0xff] }
0x2520   :  { %3528 = vmatprep.mubr.f32.mxu1 %v3368_v34  ;;  %3903 = vmatpush3.msra.mxu0 %v3294_v33  ;;  %v3311_v33 = vld [vmem:[%s5708_s6 + $0x300] sm:$0xff] }
0x2521   :  { %3529 = vmatmul.mubr.f32.vlgmr.msra.gmra.mxu1 %v3366_v27  ;;  %3904 = vmatprep.subr.mxu0 %v3309_v23  ;;  %v3327_v27 = vld [vmem:[%s5708_s6 + $0x380] sm:$0xff] }
0x2522   :  { %3905 = vmatpush3.msra.mxu0 %v3293_v2  ;;  %3938 = vmatpush3.msra.mxu1 %v3326_v3 }
0x2523   :  { %3906 = vmatprep.subr.mxu0 %v3308_v59  ;;  %3939 = vmatprep.subr.mxu1 %v3341_v7 }
0x2524   :  { %3907 = vmatpush3.msra.mxu0 %v3292_v10  ;;  %3940 = vmatpush3.msra.mxu1 %v3325_v12  ;;  %v3676_v12 = vld [vmem:[%s5710_s8 + $0x8] sm:$0x3] }
0x2525   :  { %3908 = vmatprep.subr.mxu0 %v3307_v13  ;;  %3941 = vmatprep.subr.mxu1 %v3340_v15  ;;  %v3675_v13 = vld [vmem:[%s5710_s8] sm:$0xff] }
0x2526   :  { %3909 = vmatpush3.msra.mxu0 %v3291_v60  ;;  %3942 = vmatpush3.msra.mxu1 %v3324_v61 }
0x2527   :  { %3910 = vmatprep.subr.mxu0 %v3306_v58  ;;  %3943 = vmatprep.subr.mxu1 %v3339_v57  ;;  %v3828_v58 = vld [vmem:[%s5709_s7] ss:$0 sm:$0xff]  ;;  %s4315_s7 = smov [#allocation4]  }
0x2528   :  { %3911 = vmatpush3.msra.mxu0 %v3290_v63  ;;  %3944 = vmatpush3.msra.mxu1 %v3323_v8  ;;  %s3770_s16 = sshll.u32 %s4315_s7, 4  ;;  %s3771_s16 = int_to_ptr.vmem [resolvable:$true] %s3770_s16 }
0x2529   :  { %3912 = vmatprep.subr.mxu0 %v3305_v42  ;;  %3945 = vmatprep.subr.mxu1 %v3338_v11  ;;  %s4285_s17 = scalar_lea.vmem %s3771_s16, 32  ;;  %p4290_p1 = scmp.lt.s32.totalorder %s3771_s16, %s3771_s16 }
0x252a   :  { %3913 = vmatpush3.msra.mxu0 %v3289_v14  ;;  %3946 = vmatpush3.msra.mxu1 %v3322_v21  ;;  %p4286_p0 = scmp.ne.s32.totalorder %s3771_s16, %s4285_s17  ;;  %p4291_p2 = scmp.lt.s32.totalorder %s4285_s17, %s4285_s17 }
0x252b   :  { %3914 = vmatprep.subr.mxu0 %v3304_v62  ;;  %3947 = vmatprep.subr.mxu1 %v3337_v1 }
0x252c   :  { %3915 = vmatpush3.msra.mxu0 %v3288_v17  ;;  %3948 = vmatpush3.msra.mxu1 %v3321_v52  ;;  %p4292_p3 = por %p4291_p2, %p4290_p1 }
0x252d   :  { %3916 = vmatprep.subr.mxu0 %v3303_v53  ;;  %3949 = vmatprep.subr.mxu1 %v3336_v20  ;;  %v3829_v20 = vld [vmem:[%s5711_s9] ss:$0 sm:$0xff] }
0x252e   :  { %3917 = vmatpush3.msra.mxu0 %v3287_v39  ;;  %3950 = vmatpush3.msra.mxu1 %v3320_v40  ;;  %p4293_p4 = pnand %p4292_p3, %p4286_p0 }
0x252f   :  { %3918 = vmatprep.subr.mxu0 %v3302_v35  ;;  %3951 = vmatprep.subr.mxu1 %v3335_v31 }
0x2530   :  { %3919 = vmatpush3.msra.mxu0 %v3286_v43  ;;  %3952 = vmatpush3.msra.mxu1 %v3319_v19 }
0x2531   :  { %3920 = vmatprep.subr.mxu0 %v3301_v49  ;;  %3953 = vmatprep.subr.mxu1 %v3334_v45 }
0x2532   :  { %3921 = vmatpush3.msra.mxu0 %v3285_v28  ;;  %3954 = vmatpush3.msra.mxu1 %v3318_v16 }
0x2533   :  { %3922 = vmatprep.subr.mxu0 %v3300_v48  ;;  %3955 = vmatprep.subr.mxu1 %v3333_v29 }
0x2534   :  { %3923 = vmatpush3.msra.mxu0 %v3284_v0  ;;  %3956 = vmatpush3.msra.mxu1 %v3317_v25 }
0x2535   :  { %3924 = vmatprep.subr.mxu0 %v3299_v18  ;;  %3957 = vmatprep.subr.mxu1 %v3332_v56 }
0x2536   :  { %3925 = vmatpush3.msra.mxu0 %v3283_v46  ;;  %3958 = vmatpush3.msra.mxu1 %v3316_v37 }
0x2537   :  { %3926 = vmatprep.subr.mxu0 %v3298_v38  ;;  %3959 = vmatprep.subr.mxu1 %v3331_v30 }
0x2538   :  { %3927 = vmatpush3.msra.mxu0 %v3282_v47  ;;  %3960 = vmatpush3.msra.mxu1 %v3315_v44 }
0x2539   :  { %3928 = vmatprep.subr.mxu0 %v3297_v36  ;;  %3961 = vmatprep.subr.mxu1 %v3330_v41 }
0x253a   :  { %3929 = vmatpush3.msra.mxu0 %v3281_v32  ;;  %3962 = vmatpush3.msra.mxu1 %v3314_v5 }
0x253b   :  { %3930 = vmatprep.subr.mxu0 %v3296_v9  ;;  %3963 = vmatprep.subr.mxu1 %v3329_v50 }
0x253c   :  { %3931 = vmatpush3.msra.mxu0 %v3280_v54  ;;  %3964 = vmatpush3.msra.mxu1 %v3313_v55 }
0x253d   :  { %3932 = vmatprep.subr.mxu0 %v3295_v6  ;;  %3965 = vmatprep.subr.mxu1 %v3328_v22 }
0x253e   :  { %3933 = vmatpush3.msra.mxu0 %v3279_v26  ;;  %3966 = vmatpush3.msra.mxu1 %v3312_v51 }
0x253f   :  { %3967 = vmatprep.subr.mxu1 %v3327_v27  ;;  %3975 = vmatprep.subr.mxu0 %v4307_v4 }
0x2540   :  { %3968 = vmatpush3.msra.mxu1 %v3311_v33 }
0x2582   :  { %v3210_v34 = vpop.permute.xlu0 %3209 }
0x2583   :  { %3212 = vst.msk [vmem:[#allocation3 + $0xe] sm:$0x3] %vm565_vm2, %v3210_v34 }
0x258a   :  { %v3214_v23 = vld [vmem:[#allocation3 + $0x8] sm:$0xff] }
0x258b   :  { %v3376_v2 = vrot.slane %v3214_v23, %v5490_v24  ;;  %v3369_v3 = vcombine.high %v3214_v23, %v3214_v23 }
0x258d   :  { %v3384_v59 = vcombine.high %v3376_v2, %v3376_v2  ;;  %v3383_v7 = vrot.slane %v3369_v3, %v5490_v24 }
0x258f   :  { %3598 = vmatprep.mubr.f32.mxu0 %v3384_v59  ;;  %v3385_v10 = vcombine.high %v3383_v7, %v3383_v7 }
0x2590   :  { %3599 = vmatmul.mubr.f32.vlgmr.msra.gmra.mxu0 %v3376_v2 }
0x2591   :  { %3668 = vmatprep.mubr.f32.mxu1 %v3385_v10  ;;  %3976 = vmatpush3.msk.msra.mxu0 %vm3688_vm3, %v3676_v12 }
0x2592   :  { %3669 = vmatmul.mubr.f32.vlgmr.msra.gmra.mxu1 %v3383_v7  ;;  %3979 = vmatprep.mubr.msk.f32.mxu0 %vm4314_vm4, %v4307_v4 }
0x2593   :  { %3977 = vmatprep.subr.mxu0 %v4307_v4 }
0x2594   :  { %3978 = vmatpush3.msra.mxu0 %v3675_v13 }
0x25df   :  { %v3864_v24 = vpop.f32.mrf.mxu0 }
0x25e1   :  { %v3865_v15 = vpop.f32.mrf.mxu0  ;;  %v3899_v60 = vpop.f32.mrf.mxu1 }
0x25e2   :  { %v3866_v61 = vadd.f32 %v3865_v15, %v3864_v24 }
0x25e3   :  { %v3900_v57 = vpop.f32.mrf.mxu1 }
0x25e4   :  { %v3461_v63 = vadd.f32 %v3866_v61, %v3828_v58  ;;  %v3901_v8 = vadd.f32 %v3900_v57, %v3899_v60 }
0x25e6   :  { %v3531_v21 = vadd.f32 %v3901_v8, %v3461_v63 }
0x2650   :  { %v3934_v42 = vpop.f32.mrf.mxu0 }
0x2652   :  { %v3935_v11 = vpop.f32.mrf.mxu0  ;;  %v3969_v14 = vpop.f32.mrf.mxu1 }
0x2653   :  { %v3936_v62 = vadd.f32 %v3935_v11, %v3934_v42 }
0x2654   :  { %v3970_v1 = vpop.f32.mrf.mxu1 }
0x2655   :  { %v3601_v17 = vadd.f32 %v3936_v62, %v3531_v21  ;;  %v3971_v4 = vadd.f32 %v3970_v1, %v3969_v14 }
0x2657   :  { %v3671_v52 = vadd.f32 %v3971_v4, %v3601_v17 }
0x2659   :  { %v3674_v53 = vmax.f32 %v3671_v52, 0.0 }
0x265b   :  { %3980 = vmatmul.mubr.msk.f32.vlgmr.msra.gmra.mxu0 %vm3684_vm5, %v3674_v53 }
0x271b   :  { %v3758_v39 = vpop.f32.mrf.mxu0 }
0x271c   :  { %v3759_v40 = vadd.f32 %v3829_v20, %v3758_v39 }
0x271d   :  { %v3981_v35 = vpop.f32.mrf.mxu0 }
0x271e   :  { %3763 = vst.msk [vmem:[#allocation4] sm:$0x3] %vm3762_vm6, %v3759_v40 }
0x271f   :  { %4296 = shalt.err (!%p4293_p4)
}
0x2720   :  { %3773 = dma.vmem_to_hbm [thread:$0]  %s3771_s16, 32, %s5712_s10, [#allocation5]  }
0x2721   :  { %4305 = dma.done.wait [#allocation5], 32  }
0x2722   :  { %4306 = vsyncadd [#allocation5], 4294967264 }
0x2723   :  { %3777 = vsyncpa [#allocation5], 1 }

</bundles_post_ra>
